<compile_context>
chip_gen: v7x
topology: tpu7x:2x2x1
jax: 0.10.0
libtpu: 0.0.40
codegen_flags: <defaults>
</compile_context>

<pallas_src>
import math
from functools import partial

import jax
import jax.numpy as jnp
from jax.experimental import pallas as pl
from jax.experimental.pallas import tpu as pltpu


# 48 MiB: safe on v7x (64 MiB per TensorCore); v5e/v6e (128 MiB) can go higher
# if tiles are pushed beyond the defaults below.
_VMEM_LIMIT_BYTES = 48 * 1024 * 1024


# ------------------------------ tiling helpers -------------------------------

def _round_up(x, m):
    return ((x + m - 1) // m) * m


def _tile_and_pad(dim, target, align):
    """Pick a tile for `dim` and the padded extent it requires.

    Returns (tile, padded_dim) with padded_dim % tile == 0.  Small dims use a
    single full-dim block (always legal, always <= target).  Larger dims get
    an aligned divisor if one exists (no padding); otherwise the dim is padded
    up to a multiple of the aligned target so an oversized full-dim block is
    never silently created (that fallback bites hardest on v7x's 64 MiB VMEM).
    """
    if dim <= max(target, align):
        return dim, dim
    t = max(align, target - target % align)
    s = t
    while s >= align:
        if dim % s == 0:
            return s, dim
        s -= align
    return t, _round_up(dim, t)


def _attn_tiles(n, tq, tkv, align):
    """Clamp/align the q and kv tiles; return (tq, tkv, padded_N)."""
    def pick(t):
        t = max(align, min(t, _round_up(n, align)))
        t -= t % align
        s = t
        # Prefer an exact divisor of N (no padding / masking) if one exists
        # reasonably close to the target tile size.
        while s >= max(align, t // 2):
            if n % s == 0:
                return s
            s -= align
        return t

    tq, tkv = pick(tq), pick(tkv)
    step = tq * tkv // math.gcd(tq, tkv)
    return tq, tkv, _round_up(n, step)


# ---------------------------- tiled GEMM kernels -----------------------------

def _matmul_kernel(x_ref, w_ref, o_ref, acc_ref):
    # grid = (M tiles, N tiles, K tiles); K is the reduction ("arbitrary") axis.
    @pl.when(pl.program_id(2) == 0)
    def _init():
        acc_ref[...] = jnp.zeros_like(acc_ref)

    acc_ref[...] += jnp.dot(x_ref[...], w_ref[...],
                            preferred_element_type=jnp.float32)

    @pl.when(pl.program_id(2) == pl.num_programs(2) - 1)
    def _finalize():
        o_ref[...] = acc_ref[...].astype(o_ref.dtype)


def _matmul_bias_kernel(x_ref, w_ref, b_ref, o_ref, acc_ref):
    @pl.when(pl.program_id(2) == 0)
    def _init():
        acc_ref[...] = jnp.zeros_like(acc_ref)

    acc_ref[...] += jnp.dot(x_ref[...], w_ref[...],
                            preferred_element_type=jnp.float32)

    @pl.when(pl.program_id(2) == pl.num_programs(2) - 1)
    def _finalize():
        o_ref[...] = (acc_ref[...] +
                      b_ref[...].astype(jnp.float32)).astype(o_ref.dtype)


def pallas_linear(x2d, w_t, b=None, *, tm=512, tn=512, tk=1024):
    """y = x2d @ w_t (+ b). x2d: (M, Cin), w_t: (Cin, Cout), b: (Cout,)|None."""
    M, Cin = x2d.shape
    Cout = w_t.shape[1]
    out_dtype = x2d.dtype

    m_align = 16 if x2d.dtype.itemsize == 2 else 8   # bf16: 16-sublane packing
    tm, Mp = _tile_and_pad(M, tm, m_align)
    tn, Cp = _tile_and_pad(Cout, tn, 128)
    tk, Kp = _tile_and_pad(Cin, tk, 128)

    # Zero-padding is exact: padded K rows/cols contribute nothing to the dot,
    # padded M rows / Cout cols are sliced off below.
    if Mp != M or Kp != Cin:
        x2d = jnp.pad(x2d, ((0, Mp - M), (0, Kp - Cin)))
    if Kp != Cin or Cp != Cout:
        w_t = jnp.pad(w_t, ((0, Kp - Cin), (0, Cp - Cout)))

    grid = (Mp // tm, Cp // tn, Kp // tk)
    x_spec = pl.BlockSpec((tm, tk), lambda i, j, k: (i, k))
    w_spec = pl.BlockSpec((tk, tn), lambda i, j, k: (k, j))
    o_spec = pl.BlockSpec((tm, tn), lambda i, j, k: (i, j))
    scratch = [pltpu.VMEM((tm, tn), jnp.float32)]

    itemsize = x2d.dtype.itemsize
    cost = pl.CostEstimate(
        flops=2 * M * Cin * Cout,
        transcendentals=0,
        bytes_accessed=itemsize * (M * Cin + Cin * Cout + M * Cout),
    )
    cparams = pltpu.CompilerParams(
        dimension_semantics=("parallel", "parallel", "arbitrary"),
        vmem_limit_bytes=_VMEM_LIMIT_BYTES,
    )
    out_shape = jax.ShapeDtypeStruct((Mp, Cp), out_dtype)

    if b is None:
        out = pl.pallas_call(
            _matmul_kernel,
            out_shape=out_shape,
            grid=grid,
            in_specs=[x_spec, w_spec],
            out_specs=o_spec,
            scratch_shapes=scratch,
            compiler_params=cparams,
            cost_estimate=cost,
        )(x2d, w_t)
    else:
        if Cp != Cout:
            b = jnp.pad(b, (0, Cp - Cout))
        b2 = b.reshape(1, Cp)
        b_spec = pl.BlockSpec((1, tn), lambda i, j, k: (0, j))
        out = pl.pallas_call(
            _matmul_bias_kernel,
            out_shape=out_shape,
            grid=grid,
            in_specs=[x_spec, w_spec, b_spec],
            out_specs=o_spec,
            scratch_shapes=scratch,
            compiler_params=cparams,
            cost_estimate=cost,
        )(x2d, w_t, b2)

    if Mp != M or Cp != Cout:
        out = out[:M, :Cout]
    return out


# ----------------------- flash-attention core kernel ------------------------

def _flash_attn_kernel(q_ref, k_ref, v_ref, o_ref,
                       q_sc, m_sc, l_sc, acc_sc, *,
                       n_valid, tkv, approx_recip):
    """Online-softmax flash attention; grid = (B, q tiles, kv tiles)."""
    ki = pl.program_id(2)
    H, hd = q_ref.shape[3], q_ref.shape[4]

    @pl.when(ki == 0)
    def _init():
        # All q-side work hoisted out of the kv loop: stage q per head into
        # VMEM scratch once per q tile.  The softmax scale is already folded
        # into the fused qkv projection weights host-side, so no multiply here.
        for h in range(H):
            q_sc[h] = q_ref[0, :, 0, h, :]                    # (tq, hd)
        m_sc[...] = jnp.full_like(m_sc, -jnp.inf)
        l_sc[...] = jnp.zeros_like(l_sc)
        acc_sc[...] = jnp.zeros_like(acc_sc)

    mask = None
    if n_valid is not None:
        # Padded sequence: mask out-of-range kv columns (computed once,
        # broadcast over heads and q rows).
        col = ki * tkv + jax.lax.broadcasted_iota(jnp.int32, (1, tkv), 1)
        mask = col < n_valid

    # Per-head online softmax.  The head loop is a static unroll of plain 2-D
    # MXU matmuls (the batched einsum lowers to the same per-head matmuls),
    # so no in-kernel transposes/relayouts are needed for k or v.
    # TODO(synk): a per-head grid (B, H, q, kv) would also shrink the k/v DMA
    # blocks, but needs a head-major (B, 3, H, N, hd) projection layout (or
    # head_dim % 128 == 0) to satisfy the BlockSpec last-two-dims rules.
    for h in range(H):
        k_h = k_ref[0, :, 0, h, :]                            # (tkv, hd)
        v_h = v_ref[0, :, 0, h, :]                            # (tkv, hd)

        # q @ k^T (contract last dims, no explicit transpose), f32 on the MXU.
        s = jax.lax.dot_general(q_sc[h], k_h, (((1,), (1,)), ((), ())),
                                preferred_element_type=jnp.float32)  # (tq, tkv)
        if mask is not None:
            s = jnp.where(mask, s, -1e30)

        m_prev = m_sc[h]                                      # (tq, 1)
        m_new = jnp.maximum(m_prev, s.max(axis=-1, keepdims=True))
        alpha = jnp.exp(m_prev - m_new)
        p = jnp.exp(s - m_new)                                # (tq, tkv)

        l_sc[h] = alpha * l_sc[h] + p.sum(axis=-1, keepdims=True)
        acc_sc[h] = alpha * acc_sc[h] + jnp.dot(
            p.astype(v_h.dtype), v_h, preferred_element_type=jnp.float32)
        m_sc[h] = m_new

    @pl.when(ki == pl.num_programs(2) - 1)
    def _finalize():
        # Lane-dense output: the block is (1, tq, C), so the HBM writeback
        # streams dense C-wide rows; each head fills its column slice once
        # per q tile.
        for h in range(H):
            if approx_recip:
                o_h = acc_sc[h] * pl.reciprocal(l_sc[h], approx=True)  # EUP
            else:
                o_h = acc_sc[h] / l_sc[h]
            o_ref[0, :, h * hd:(h + 1) * hd] = o_h.astype(o_ref.dtype)


def pallas_flash_attention(qkv, *, tq=256, tkv=256, approx_recip=True):
    """qkv: (B, N, 3, H, hd) fused projection output. Returns (B, N, C)."""
    B, N, three, H, hd = qkv.shape
    assert three == 3
    C = H * hd

    align = 16 if qkv.dtype.itemsize == 2 else 8
    tq, tkv, Np = _attn_tiles(N, tq, tkv, align)
    if Np != N:
        qkv = jnp.pad(qkv, ((0, 0), (0, Np - N), (0, 0), (0, 0), (0, 0)))

    grid = (B, Np // tq, Np // tkv)

    # q/k/v selection is pure DMA addressing via the index_maps (no XLA
    # slices/transposes of the activations).
    q_spec = pl.BlockSpec((1, tq, 1, H, hd), lambda b, qi, ki: (b, qi, 0, 0, 0))
    k_spec = pl.BlockSpec((1, tkv, 1, H, hd), lambda b, qi, ki: (b, ki, 1, 0, 0))
    v_spec = pl.BlockSpec((1, tkv, 1, H, hd), lambda b, qi, ki: (b, ki, 2, 0, 0))
    # Lane-dense output block: last dim is C (typically a multiple of 128).
    o_spec = pl.BlockSpec((1, tq, C), lambda b, qi, ki: (b, qi, 0))
    # TODO(synk): add pipeline_mode=pl.Buffered(3) to k_spec/v_spec if
    # profiling shows exposed k/v DMA for small head_dim.

    itemsize = qkv.dtype.itemsize
    cost = pl.CostEstimate(
        flops=4 * B * H * Np * Np * hd,
        transcendentals=B * H * Np * Np,
        bytes_accessed=itemsize * (qkv.size + B * Np * C),
    )

    out = pl.pallas_call(
        partial(_flash_attn_kernel,
                n_valid=None if Np == N else N,
                tkv=tkv,
                approx_recip=approx_recip),
        out_shape=jax.ShapeDtypeStruct((B, Np, C), qkv.dtype),
        grid=grid,
        in_specs=[q_spec, k_spec, v_spec],
        out_specs=o_spec,
        scratch_shapes=[
            pltpu.VMEM((H, tq, hd), qkv.dtype),    # q staged per head
            pltpu.VMEM((H, tq, 1), jnp.float32),   # m: running row max
            pltpu.VMEM((H, tq, 1), jnp.float32),   # l: running denominator
            pltpu.VMEM((H, tq, hd), jnp.float32),  # acc: unnormalized output
        ],
        compiler_params=pltpu.CompilerParams(
            # TODO(synk): on v7x consider pltpu.CORE_PARALLEL on the leading
            # axis (or pl.core_map) to guarantee both TensorCores get work.
            dimension_semantics=("parallel", "parallel", "arbitrary"),
            vmem_limit_bytes=_VMEM_LIMIT_BYTES,
        ),
        cost_estimate=cost,
    )(qkv, qkv, qkv)

    if Np != N:
        out = out[:, :N, :]
    return out


# ------------------------------ module wrapper -------------------------------

def make_attention_params(wq_t, wkv_t, wproj_t, bproj, *, num_heads):
    """Fuse q/kv weights and fold the softmax scale into q (host-side, free)."""
    C = wq_t.shape[0]
    hd = C // num_heads
    scale = hd ** (-0.5)
    return {
        # fused q/kv weight, pre-transposed to (in_features, out_features);
        # columns [0:C]=q (pre-scaled), [C:2C]=k, [2C:3C]=v.
        "wqkv_t": jnp.concatenate([wq_t * scale, wkv_t], axis=1),   # (C, 3C)
        "wproj_t": wproj_t,
        "bproj": bproj,
    }


def attention_forward(x, params, *, num_heads, tq=256, tkv=256):
    """Pallas implementation of Attention.forward. x: (B, N, C)."""
    B, N, C = x.shape
    H = num_heads
    assert C % H == 0
    hd = C // H

    x2d = x.reshape(B * N, C)

    # Fused q/kv projection (qkv_bias=False -> no bias); scale pre-folded.
    qkv2d = pallas_linear(x2d, params["wqkv_t"])                    # (B*N, 3C)
    qkv = qkv2d.reshape(B, N, 3, H, hd)                             # free

    o = pallas_flash_attention(qkv, tq=tq, tkv=tkv)                 # (B, N, C)

    y2d = pallas_linear(o.reshape(B * N, C),
                        params["wproj_t"], params["bproj"])         # (B*N, C)
    return y2d.reshape(B, N, C)


def attention_reference(x, wq_t, wkv_t, wproj_t, bproj, num_heads):
    """Pure-JAX reference (mirrors the PyTorch forward)."""
    B, N, C = x.shape
    H = num_heads
    hd = C // H
    scale = hd ** (-0.5)
    q = (x @ wq_t).reshape(B, N, H, hd).transpose(0, 2, 1, 3)           # (B,H,N,hd)
    kv = (x @ wkv_t).reshape(B, N, 2, H, hd).transpose(2, 0, 3, 1, 4)   # (2,B,H,N,hd)
    k, v = kv[0], kv[1]
    attn = jax.nn.softmax(jnp.einsum("bhqd,bhkd->bhqk", q, k) * scale, axis=-1)
    o = jnp.einsum("bhqk,bhkd->bhqd", attn, v)
    o = o.transpose(0, 2, 1, 3).reshape(B, N, C)
    return o @ wproj_t + bproj


# ----------------------------------- main ------------------------------------

def _run_case(key, *, B, N, C, num_heads, dtype, tq, tkv, atol, rtol, name):
    kx, kq, kkv, kp, kpb = jax.random.split(key, 5)

    bound = 1.0 / math.sqrt(C)
    wq_t = jax.random.uniform(kq, (C, C), jnp.float32, -bound, bound)
    wkv_t = jax.random.uniform(kkv, (C, 2 * C), jnp.float32, -bound, bound)
    wproj_t = jax.random.uniform(kp, (C, C), jnp.float32, -bound, bound)
    bproj = jax.random.uniform(kpb, (C,), jnp.float32, -bound, bound)
    x = jax.random.normal(kx, (B, N, C), jnp.float32)

    # Quantize operands to the test dtype; the f32 reference uses the *same*
    # quantized values so the tolerance only covers compute-path differences.
    xq = x.astype(dtype)
    wq_q, wkv_q = wq_t.astype(dtype), wkv_t.astype(dtype)
    wproj_q, bproj_q = wproj_t.astype(dtype), bproj.astype(dtype)

    params = make_attention_params(wq_q, wkv_q, wproj_q, bproj_q,
                                   num_heads=num_heads)
    fwd = jax.jit(partial(attention_forward, num_heads=num_heads,
                          tq=tq, tkv=tkv))
    y = jax.block_until_ready(fwd(xq, params))

    y_ref = attention_reference(
        xq.astype(jnp.float32), wq_q.astype(jnp.float32),
        wkv_q.astype(jnp.float32), wproj_q.astype(jnp.float32),
        bproj_q.astype(jnp.float32), num_heads)

    assert y.shape == (B, N, C), f"{name}: bad output shape {y.shape}"
    ok = jnp.allclose(y.astype(jnp.float32), y_ref, rtol=rtol, atol=atol)
    assert bool(ok), f"{name}: mismatch vs reference"


if __name__ == "__main__":
    key = jax.random.PRNGKey(0)
    k1, k2, k3 = jax.random.split(key, 3)

    # 1) Small smoke test (single-block path), module-default num_heads=8.
    _run_case(k1, B=2, N=8, C=32, num_heads=8, dtype=jnp.float32,
              tq=256, tkv=256, atol=1e-2, rtol=1e-2, name="small_f32")

    # 2) Tiled path: multiple kv tiles (online-softmax accumulation across
    #    tiles) plus a padded + masked sequence remainder (N=200 -> 256).
    _run_case(k2, B=2, N=200, C=128, num_heads=2, dtype=jnp.float32,
              tq=128, tkv=128, atol=1e-2, rtol=1e-2, name="tiled_masked_f32")

    # 3) bf16 path with MXU-sized 256 tiles.
    _run_case(k3, B=1, N=512, C=128, num_heads=2, dtype=jnp.bfloat16,
              tq=256, tkv=256, atol=3e-2, rtol=3e-2, name="bf16_tiled")

    print("KERNEL_OK")
</pallas_src>

<mosaic_0001>
module attributes {stable_mosaic.version = 11 : i64} {
  func.func @_matmul_bias_kernel(%arg0: i32, %arg1: i32, %arg2: i32, %arg3: memref<16x32xf32, #tpu.memory_space<vmem>>, %arg4: memref<32x32xf32, #tpu.memory_space<vmem>>, %arg5: memref<1x32xf32, #tpu.memory_space<vmem>>, %arg6: memref<16x32xf32, #tpu.memory_space<vmem>>, %arg7: memref<16x32xf32, #tpu.memory_space<vmem>>) attributes {dimension_semantics = [#tpu.dimension_semantics<parallel>, #tpu.dimension_semantics<parallel>, #tpu.dimension_semantics<arbitrary>], iteration_bounds = array<i64: 1, 1, 1>, scalar_prefetch = 0 : i64, scratch_operands = 1 : i64, tpu.core_type = #tpu.core_type<tc>, window_params = [{transform_indices = @transform_0, window_bounds = array<i64: 16, 32>}, {transform_indices = @transform_1, window_bounds = array<i64: 32, 32>}, {transform_indices = @transform_2, window_bounds = array<i64: 1, 32>}, {transform_indices = @transform_3, window_bounds = array<i64: 16, 32>}]} {
    %c0_i32 = arith.constant 0 : i32
    %0 = arith.cmpi eq, %arg2, %c0_i32 : i32
    %1 = arith.extui %0 : i1 to i32
    %c0_i32_0 = arith.constant 0 : i32
    %2 = arith.cmpi ne, %1, %c0_i32_0 : i32
    scf.if %2 {
      %cst_10 = arith.constant 0.000000e+00 : f32
      %12 = vector.broadcast %cst_10 : f32 to vector<16x32xf32>
      %c0_11 = arith.constant 0 : index
      %c0_12 = arith.constant 0 : index
      %13 = vector.load %arg7[%c0_11, %c0_12] : memref<16x32xf32, #tpu.memory_space<vmem>>, vector<16x32xf32>
      tpu.vector_store %arg7[%c0_11, %c0_12], %12 {strides = array<i32>} : memref<16x32xf32, #tpu.memory_space<vmem>>, vector<16x32xf32>,
    } else {
    }
    %c0 = arith.constant 0 : index
    %c0_1 = arith.constant 0 : index
    %3 = vector.load %arg7[%c0, %c0_1] : memref<16x32xf32, #tpu.memory_space<vmem>>, vector<16x32xf32>
    %c0_2 = arith.constant 0 : index
    %c0_3 = arith.constant 0 : index
    %4 = vector.load %arg3[%c0_2, %c0_3] : memref<16x32xf32, #tpu.memory_space<vmem>>, vector<16x32xf32>
    %c0_4 = arith.constant 0 : index
    %c0_5 = arith.constant 0 : index
    %5 = vector.load %arg4[%c0_4, %c0_5] : memref<32x32xf32, #tpu.memory_space<vmem>>, vector<32x32xf32>
    %cst = arith.constant dense<0.000000e+00> : vector<16x32xf32>
    %6 = tpu.matmul %4, %5, %cst {dimension_numbers = #tpu.dot_dimension_numbers<[1], [0], [0], [1], [0, 0, 1, 1], [], []>} : vector<16x32xf32>, vector<32x32xf32>, vector<16x32xf32> -> vector<16x32xf32>
    %7 = arith.addf %3, %6 : vector<16x32xf32>
    %c0_6 = arith.constant 0 : index
    %c0_7 = arith.constant 0 : index
    %8 = vector.load %arg7[%c0_6, %c0_7] : memref<16x32xf32, #tpu.memory_space<vmem>>, vector<16x32xf32>
    tpu.vector_store %arg7[%c0_6, %c0_7], %7 {strides = array<i32>} : memref<16x32xf32, #tpu.memory_space<vmem>>, vector<16x32xf32>,
    %c0_i32_8 = arith.constant 0 : i32
    %9 = arith.cmpi eq, %arg2, %c0_i32_8 : i32
    %10 = arith.extui %9 : i1 to i32
    %c0_i32_9 = arith.constant 0 : i32
    %11 = arith.cmpi ne, %10, %c0_i32_9 : i32
    scf.if %11 {
      %c0_10 = arith.constant 0 : index
      %c0_11 = arith.constant 0 : index
      %12 = vector.load %arg7[%c0_10, %c0_11] : memref<16x32xf32, #tpu.memory_space<vmem>>, vector<16x32xf32>
      %c0_12 = arith.constant 0 : index
      %c0_13 = arith.constant 0 : index
      %13 = vector.load %arg5[%c0_12, %c0_13] : memref<1x32xf32, #tpu.memory_space<vmem>>, vector<1x32xf32>
      %14 = vector.broadcast %13 : vector<1x32xf32> to vector<16x32xf32>
      %15 = arith.addf %12, %14 : vector<16x32xf32>
      %c0_14 = arith.constant 0 : index
      %c0_15 = arith.constant 0 : index
      %16 = vector.load %arg6[%c0_14, %c0_15] : memref<16x32xf32, #tpu.memory_space<vmem>>, vector<16x32xf32>
      tpu.vector_store %arg6[%c0_14, %c0_15], %15 {strides = array<i32>} : memref<16x32xf32, #tpu.memory_space<vmem>>, vector<16x32xf32>,
    } else {
    }
    return
  }
  func.func @transform_0(%arg0: i32, %arg1: i32, %arg2: i32) -> (i32, i32) {
    %c0_i32 = arith.constant 0 : i32
    return %arg0, %arg2 : i32, i32
  }
  func.func @transform_1(%arg0: i32, %arg1: i32, %arg2: i32) -> (i32, i32) {
    %c0_i32 = arith.constant 0 : i32
    return %arg2, %arg1 : i32, i32
  }
  func.func @transform_2(%arg0: i32, %arg1: i32, %arg2: i32) -> (i32, i32) {
    %c0_i32 = arith.constant 0 : i32
    %c0_i32_0 = arith.constant 0 : i32
    return %c0_i32, %arg1 : i32, i32
  }
  func.func @transform_3(%arg0: i32, %arg1: i32, %arg2: i32) -> (i32, i32) {
    %c0_i32 = arith.constant 0 : i32
    return %arg0, %arg1 : i32, i32
  }
}

module attributes {stable_mosaic.version = 11 : i64} {
  func.func @_matmul_kernel(%arg0: i32, %arg1: i32, %arg2: i32, %arg3: memref<16x32xf32, #tpu.memory_space<vmem>>, %arg4: memref<32x96xf32, #tpu.memory_space<vmem>>, %arg5: memref<16x96xf32, #tpu.memory_space<vmem>>, %arg6: memref<16x96xf32, #tpu.memory_space<vmem>>) attributes {dimension_semantics = [#tpu.dimension_semantics<parallel>, #tpu.dimension_semantics<parallel>, #tpu.dimension_semantics<arbitrary>], iteration_bounds = array<i64: 1, 1, 1>, scalar_prefetch = 0 : i64, scratch_operands = 1 : i64, tpu.core_type = #tpu.core_type<tc>, window_params = [{transform_indices = @transform_0, window_bounds = array<i64: 16, 32>}, {transform_indices = @transform_1, window_bounds = array<i64: 32, 96>}, {transform_indices = @transform_2, window_bounds = array<i64: 16, 96>}]} {
    %c0_i32 = arith.constant 0 : i32
    %0 = arith.cmpi eq, %arg2, %c0_i32 : i32
    %1 = arith.extui %0 : i1 to i32
    %c0_i32_0 = arith.constant 0 : i32
    %2 = arith.cmpi ne, %1, %c0_i32_0 : i32
    scf.if %2 {
      %cst_10 = arith.constant 0.000000e+00 : f32
      %12 = vector.broadcast %cst_10 : f32 to vector<16x96xf32>
      %c0_11 = arith.constant 0 : index
      %c0_12 = arith.constant 0 : index
      %13 = vector.load %arg6[%c0_11, %c0_12] : memref<16x96xf32, #tpu.memory_space<vmem>>, vector<16x96xf32>
      tpu.vector_store %arg6[%c0_11, %c0_12], %12 {strides = array<i32>} : memref<16x96xf32, #tpu.memory_space<vmem>>, vector<16x96xf32>,
    } else {
    }
    %c0 = arith.constant 0 : index
    %c0_1 = arith.constant 0 : index
    %3 = vector.load %arg6[%c0, %c0_1] : memref<16x96xf32, #tpu.memory_space<vmem>>, vector<16x96xf32>
    %c0_2 = arith.constant 0 : index
    %c0_3 = arith.constant 0 : index
    %4 = vector.load %arg3[%c0_2, %c0_3] : memref<16x32xf32, #tpu.memory_space<vmem>>, vector<16x32xf32>
    %c0_4 = arith.constant 0 : index
    %c0_5 = arith.constant 0 : index
    %5 = vector.load %arg4[%c0_4, %c0_5] : memref<32x96xf32, #tpu.memory_space<vmem>>, vector<32x96xf32>
    %cst = arith.constant dense<0.000000e+00> : vector<16x96xf32>
    %6 = tpu.matmul %4, %5, %cst {dimension_numbers = #tpu.dot_dimension_numbers<[1], [0], [0], [1], [0, 0, 1, 1], [], []>} : vector<16x32xf32>, vector<32x96xf32>, vector<16x96xf32> -> vector<16x96xf32>
    %7 = arith.addf %3, %6 : vector<16x96xf32>
    %c0_6 = arith.constant 0 : index
    %c0_7 = arith.constant 0 : index
    %8 = vector.load %arg6[%c0_6, %c0_7] : memref<16x96xf32, #tpu.memory_space<vmem>>, vector<16x96xf32>
    tpu.vector_store %arg6[%c0_6, %c0_7], %7 {strides = array<i32>} : memref<16x96xf32, #tpu.memory_space<vmem>>, vector<16x96xf32>,
    %c0_i32_8 = arith.constant 0 : i32
    %9 = arith.cmpi eq, %arg2, %c0_i32_8 : i32
    %10 = arith.extui %9 : i1 to i32
    %c0_i32_9 = arith.constant 0 : i32
    %11 = arith.cmpi ne, %10, %c0_i32_9 : i32
    scf.if %11 {
      %c0_10 = arith.constant 0 : index
      %c0_11 = arith.constant 0 : index
      %12 = vector.load %arg6[%c0_10, %c0_11] : memref<16x96xf32, #tpu.memory_space<vmem>>, vector<16x96xf32>
      %c0_12 = arith.constant 0 : index
      %c0_13 = arith.constant 0 : index
      %13 = vector.load %arg5[%c0_12, %c0_13] : memref<16x96xf32, #tpu.memory_space<vmem>>, vector<16x96xf32>
      tpu.vector_store %arg5[%c0_12, %c0_13], %12 {strides = array<i32>} : memref<16x96xf32, #tpu.memory_space<vmem>>, vector<16x96xf32>,
    } else {
    }
    return
  }
  func.func @transform_0(%arg0: i32, %arg1: i32, %arg2: i32) -> (i32, i32) {
    %c0_i32 = arith.constant 0 : i32
    return %arg0, %arg2 : i32, i32
  }
  func.func @transform_1(%arg0: i32, %arg1: i32, %arg2: i32) -> (i32, i32) {
    %c0_i32 = arith.constant 0 : i32
    return %arg2, %arg1 : i32, i32
  }
  func.func @transform_2(%arg0: i32, %arg1: i32, %arg2: i32) -> (i32, i32) {
    %c0_i32 = arith.constant 0 : i32
    return %arg0, %arg1 : i32, i32
  }
}

module attributes {stable_mosaic.version = 11 : i64} {
  func.func @_flash_attn_kernel(%arg0: i32, %arg1: i32, %arg2: i32, %arg3: memref<1x8x1x8x4xf32, #tpu.memory_space<vmem>>, %arg4: memref<1x8x1x8x4xf32, #tpu.memory_space<vmem>>, %arg5: memref<1x8x1x8x4xf32, #tpu.memory_space<vmem>>, %arg6: memref<1x8x32xf32, #tpu.memory_space<vmem>>, %arg7: memref<8x8x4xf32, #tpu.memory_space<vmem>>, %arg8: memref<8x8x1xf32, #tpu.memory_space<vmem>>, %arg9: memref<8x8x1xf32, #tpu.memory_space<vmem>>, %arg10: memref<8x8x4xf32, #tpu.memory_space<vmem>>) attributes {dimension_semantics = [#tpu.dimension_semantics<parallel>, #tpu.dimension_semantics<parallel>, #tpu.dimension_semantics<arbitrary>], iteration_bounds = array<i64: 2, 1, 1>, scalar_prefetch = 0 : i64, scratch_operands = 4 : i64, tpu.core_type = #tpu.core_type<tc>, window_params = [{transform_indices = @transform_0, window_bounds = array<i64: 1, 8, 1, 8, 4>}, {transform_indices = @transform_1, window_bounds = array<i64: 1, 8, 1, 8, 4>}, {transform_indices = @transform_2, window_bounds = array<i64: 1, 8, 1, 8, 4>}, {transform_indices = @transform_3, window_bounds = array<i64: 1, 8, 32>}]} {
    %c0_i32 = arith.constant 0 : i32
    %0 = arith.cmpi eq, %arg2, %c0_i32 : i32
    %1 = arith.extui %0 : i1 to i32
    %c0_i32_0 = arith.constant 0 : i32
    %2 = arith.cmpi ne, %1, %c0_i32_0 : i32
    scf.if %2 {
      %c0_274 = arith.constant 0 : index
      %c0_275 = arith.constant 0 : index
      %c0_276 = arith.constant 0 : index
      %c0_277 = arith.constant 0 : index
      %c0_278 = arith.constant 0 : index
      %310 = vector.load %arg3[%c0_274, %c0_275, %c0_276, %c0_277, %c0_278] : memref<1x8x1x8x4xf32, #tpu.memory_space<vmem>>, vector<1x8x1x1x4xf32>
      %311 = vector.shape_cast %310 : vector<1x8x1x1x4xf32> to vector<8x4xf32>
      %c0_279 = arith.constant 0 : index
      %c0_280 = arith.constant 0 : index
      %c0_281 = arith.constant 0 : index
      %312 = vector.load %arg7[%c0_279, %c0_280, %c0_281] : memref<8x8x4xf32, #tpu.memory_space<vmem>>, vector<1x8x4xf32>
      %313 = vector.shape_cast %312 : vector<1x8x4xf32> to vector<8x4xf32>
      %314 = vector.shape_cast %311 : vector<8x4xf32> to vector<1x8x4xf32>
      tpu.vector_store %arg7[%c0_279, %c0_280, %c0_281], %314 {strides = array<i32>} : memref<8x8x4xf32, #tpu.memory_space<vmem>>, vector<1x8x4xf32>,
      %c0_282 = arith.constant 0 : index
      %c0_283 = arith.constant 0 : index
      %c0_284 = arith.constant 0 : index
      %c1_285 = arith.constant 1 : index
      %c0_286 = arith.constant 0 : index
      %315 = vector.load %arg3[%c0_282, %c0_283, %c0_284, %c1_285, %c0_286] : memref<1x8x1x8x4xf32, #tpu.memory_space<vmem>>, vector<1x8x1x1x4xf32>
      %316 = vector.shape_cast %315 : vector<1x8x1x1x4xf32> to vector<8x4xf32>
      %c1_287 = arith.constant 1 : index
      %c0_288 = arith.constant 0 : index
      %c0_289 = arith.constant 0 : index
      %317 = vector.load %arg7[%c1_287, %c0_288, %c0_289] : memref<8x8x4xf32, #tpu.memory_space<vmem>>, vector<1x8x4xf32>
      %318 = vector.shape_cast %317 : vector<1x8x4xf32> to vector<8x4xf32>
      %319 = vector.shape_cast %316 : vector<8x4xf32> to vector<1x8x4xf32>
      tpu.vector_store %arg7[%c1_287, %c0_288, %c0_289], %319 {strides = array<i32>} : memref<8x8x4xf32, #tpu.memory_space<vmem>>, vector<1x8x4xf32>,
      %c0_290 = arith.constant 0 : index
      %c0_291 = arith.constant 0 : index
      %c0_292 = arith.constant 0 : index
      %c2_293 = arith.constant 2 : index
      %c0_294 = arith.constant 0 : index
      %320 = vector.load %arg3[%c0_290, %c0_291, %c0_292, %c2_293, %c0_294] : memref<1x8x1x8x4xf32, #tpu.memory_space<vmem>>, vector<1x8x1x1x4xf32>
      %321 = vector.shape_cast %320 : vector<1x8x1x1x4xf32> to vector<8x4xf32>
      %c2_295 = arith.constant 2 : index
      %c0_296 = arith.constant 0 : index
      %c0_297 = arith.constant 0 : index
      %322 = vector.load %arg7[%c2_295, %c0_296, %c0_297] : memref<8x8x4xf32, #tpu.memory_space<vmem>>, vector<1x8x4xf32>
      %323 = vector.shape_cast %322 : vector<1x8x4xf32> to vector<8x4xf32>
      %324 = vector.shape_cast %321 : vector<8x4xf32> to vector<1x8x4xf32>
      tpu.vector_store %arg7[%c2_295, %c0_296, %c0_297], %324 {strides = array<i32>} : memref<8x8x4xf32, #tpu.memory_space<vmem>>, vector<1x8x4xf32>,
      %c0_298 = arith.constant 0 : index
      %c0_299 = arith.constant 0 : index
      %c0_300 = arith.constant 0 : index
      %c3_301 = arith.constant 3 : index
      %c0_302 = arith.constant 0 : index
      %325 = vector.load %arg3[%c0_298, %c0_299, %c0_300, %c3_301, %c0_302] : memref<1x8x1x8x4xf32, #tpu.memory_space<vmem>>, vector<1x8x1x1x4xf32>
      %326 = vector.shape_cast %325 : vector<1x8x1x1x4xf32> to vector<8x4xf32>
      %c3_303 = arith.constant 3 : index
      %c0_304 = arith.constant 0 : index
      %c0_305 = arith.constant 0 : index
      %327 = vector.load %arg7[%c3_303, %c0_304, %c0_305] : memref<8x8x4xf32, #tpu.memory_space<vmem>>, vector<1x8x4xf32>
      %328 = vector.shape_cast %327 : vector<1x8x4xf32> to vector<8x4xf32>
      %329 = vector.shape_cast %326 : vector<8x4xf32> to vector<1x8x4xf32>
      tpu.vector_store %arg7[%c3_303, %c0_304, %c0_305], %329 {strides = array<i32>} : memref<8x8x4xf32, #tpu.memory_space<vmem>>, vector<1x8x4xf32>,
      %c0_306 = arith.constant 0 : index
      %c0_307 = arith.constant 0 : index
      %c0_308 = arith.constant 0 : index
      %c4_309 = arith.constant 4 : index
      %c0_310 = arith.constant 0 : index
      %330 = vector.load %arg3[%c0_306, %c0_307, %c0_308, %c4_309, %c0_310] : memref<1x8x1x8x4xf32, #tpu.memory_space<vmem>>, vector<1x8x1x1x4xf32>
      %331 = vector.shape_cast %330 : vector<1x8x1x1x4xf32> to vector<8x4xf32>
      %c4_311 = arith.constant 4 : index
      %c0_312 = arith.constant 0 : index
      %c0_313 = arith.constant 0 : index
      %332 = vector.load %arg7[%c4_311, %c0_312, %c0_313] : memref<8x8x4xf32, #tpu.memory_space<vmem>>, vector<1x8x4xf32>
      %333 = vector.shape_cast %332 : vector<1x8x4xf32> to vector<8x4xf32>
      %334 = vector.shape_cast %331 : vector<8x4xf32> to vector<1x8x4xf32>
      tpu.vector_store %arg7[%c4_311, %c0_312, %c0_313], %334 {strides = array<i32>} : memref<8x8x4xf32, #tpu.memory_space<vmem>>, vector<1x8x4xf32>,
      %c0_314 = arith.constant 0 : index
      %c0_315 = arith.constant 0 : index
      %c0_316 = arith.constant 0 : index
      %c5_317 = arith.constant 5 : index
      %c0_318 = arith.constant 0 : index
      %335 = vector.load %arg3[%c0_314, %c0_315, %c0_316, %c5_317, %c0_318] : memref<1x8x1x8x4xf32, #tpu.memory_space<vmem>>, vector<1x8x1x1x4xf32>
      %336 = vector.shape_cast %335 : vector<1x8x1x1x4xf32> to vector<8x4xf32>
      %c5_319 = arith.constant 5 : index
      %c0_320 = arith.constant 0 : index
      %c0_321 = arith.constant 0 : index
      %337 = vector.load %arg7[%c5_319, %c0_320, %c0_321] : memref<8x8x4xf32, #tpu.memory_space<vmem>>, vector<1x8x4xf32>
      %338 = vector.shape_cast %337 : vector<1x8x4xf32> to vector<8x4xf32>
      %339 = vector.shape_cast %336 : vector<8x4xf32> to vector<1x8x4xf32>
      tpu.vector_store %arg7[%c5_319, %c0_320, %c0_321], %339 {strides = array<i32>} : memref<8x8x4xf32, #tpu.memory_space<vmem>>, vector<1x8x4xf32>,
      %c0_322 = arith.constant 0 : index
      %c0_323 = arith.constant 0 : index
      %c0_324 = arith.constant 0 : index
      %c6_325 = arith.constant 6 : index
      %c0_326 = arith.constant 0 : index
      %340 = vector.load %arg3[%c0_322, %c0_323, %c0_324, %c6_325, %c0_326] : memref<1x8x1x8x4xf32, #tpu.memory_space<vmem>>, vector<1x8x1x1x4xf32>
      %341 = vector.shape_cast %340 : vector<1x8x1x1x4xf32> to vector<8x4xf32>
      %c6_327 = arith.constant 6 : index
      %c0_328 = arith.constant 0 : index
      %c0_329 = arith.constant 0 : index
      %342 = vector.load %arg7[%c6_327, %c0_328, %c0_329] : memref<8x8x4xf32, #tpu.memory_space<vmem>>, vector<1x8x4xf32>
      %343 = vector.shape_cast %342 : vector<1x8x4xf32> to vector<8x4xf32>
      %344 = vector.shape_cast %341 : vector<8x4xf32> to vector<1x8x4xf32>
      tpu.vector_store %arg7[%c6_327, %c0_328, %c0_329], %344 {strides = array<i32>} : memref<8x8x4xf32, #tpu.memory_space<vmem>>, vector<1x8x4xf32>,
      %c0_330 = arith.constant 0 : index
      %c0_331 = arith.constant 0 : index
      %c0_332 = arith.constant 0 : index
      %c7_333 = arith.constant 7 : index
      %c0_334 = arith.constant 0 : index
      %345 = vector.load %arg3[%c0_330, %c0_331, %c0_332, %c7_333, %c0_334] : memref<1x8x1x8x4xf32, #tpu.memory_space<vmem>>, vector<1x8x1x1x4xf32>
      %346 = vector.shape_cast %345 : vector<1x8x1x1x4xf32> to vector<8x4xf32>
      %c7_335 = arith.constant 7 : index
      %c0_336 = arith.constant 0 : index
      %c0_337 = arith.constant 0 : index
      %347 = vector.load %arg7[%c7_335, %c0_336, %c0_337] : memref<8x8x4xf32, #tpu.memory_space<vmem>>, vector<1x8x4xf32>
      %348 = vector.shape_cast %347 : vector<1x8x4xf32> to vector<8x4xf32>
      %349 = vector.shape_cast %346 : vector<8x4xf32> to vector<1x8x4xf32>
      tpu.vector_store %arg7[%c7_335, %c0_336, %c0_337], %349 {strides = array<i32>} : memref<8x8x4xf32, #tpu.memory_space<vmem>>, vector<1x8x4xf32>,
      %cst_338 = arith.constant 0xFF800000 : f32
      %350 = vector.broadcast %cst_338 : f32 to vector<8x8x1xf32>
      %c0_339 = arith.constant 0 : index
      %c0_340 = arith.constant 0 : index
      %c0_341 = arith.constant 0 : index
      %351 = vector.load %arg8[%c0_339, %c0_340, %c0_341] : memref<8x8x1xf32, #tpu.memory_space<vmem>>, vector<8x8x1xf32>
      tpu.vector_store %arg8[%c0_339, %c0_340, %c0_341], %350 {strides = array<i32>} : memref<8x8x1xf32, #tpu.memory_space<vmem>>, vector<8x8x1xf32>,
      %cst_342 = arith.constant 0.000000e+00 : f32
      %352 = vector.broadcast %cst_342 : f32 to vector<8x8x1xf32>
      %c0_343 = arith.constant 0 : index
      %c0_344 = arith.constant 0 : index
      %c0_345 = arith.constant 0 : index
      %353 = vector.load %arg9[%c0_343, %c0_344, %c0_345] : memref<8x8x1xf32, #tpu.memory_space<vmem>>, vector<8x8x1xf32>
      tpu.vector_store %arg9[%c0_343, %c0_344, %c0_345], %352 {strides = array<i32>} : memref<8x8x1xf32, #tpu.memory_space<vmem>>, vector<8x8x1xf32>,
      %cst_346 = arith.constant 0.000000e+00 : f32
      %354 = vector.broadcast %cst_346 : f32 to vector<8x8x4xf32>
      %c0_347 = arith.constant 0 : index
      %c0_348 = arith.constant 0 : index
      %c0_349 = arith.constant 0 : index
      %355 = vector.load %arg10[%c0_347, %c0_348, %c0_349] : memref<8x8x4xf32, #tpu.memory_space<vmem>>, vector<8x8x4xf32>
      tpu.vector_store %arg10[%c0_347, %c0_348, %c0_349], %354 {strides = array<i32>} : memref<8x8x4xf32, #tpu.memory_space<vmem>>, vector<8x8x4xf32>,
    } else {
    }
    %c0 = arith.constant 0 : index
    %c0_1 = arith.constant 0 : index
    %c0_2 = arith.constant 0 : index
    %c0_3 = arith.constant 0 : index
    %c0_4 = arith.constant 0 : index
    %3 = vector.load %arg4[%c0, %c0_1, %c0_2, %c0_3, %c0_4] : memref<1x8x1x8x4xf32, #tpu.memory_space<vmem>>, vector<1x8x1x1x4xf32>
    %4 = vector.shape_cast %3 : vector<1x8x1x1x4xf32> to vector<8x4xf32>
    %c0_5 = arith.constant 0 : index
    %c0_6 = arith.constant 0 : index
    %c0_7 = arith.constant 0 : index
    %c0_8 = arith.constant 0 : index
    %c0_9 = arith.constant 0 : index
    %5 = vector.load %arg5[%c0_5, %c0_6, %c0_7, %c0_8, %c0_9] : memref<1x8x1x8x4xf32, #tpu.memory_space<vmem>>, vector<1x8x1x1x4xf32>
    %6 = vector.shape_cast %5 : vector<1x8x1x1x4xf32> to vector<8x4xf32>
    %c0_10 = arith.constant 0 : index
    %c0_11 = arith.constant 0 : index
    %c0_12 = arith.constant 0 : index
    %7 = vector.load %arg7[%c0_10, %c0_11, %c0_12] : memref<8x8x4xf32, #tpu.memory_space<vmem>>, vector<1x8x4xf32>
    %8 = vector.shape_cast %7 : vector<1x8x4xf32> to vector<8x4xf32>
    %cst = arith.constant dense<0.000000e+00> : vector<8x8xf32>
    %9 = tpu.matmul %8, %4, %cst {dimension_numbers = #tpu.dot_dimension_numbers<[1], [1], [0], [0], [0, 0, 1, 0], [], []>} : vector<8x4xf32>, vector<8x4xf32>, vector<8x8xf32> -> vector<8x8xf32>
    %c0_13 = arith.constant 0 : index
    %c0_14 = arith.constant 0 : index
    %c0_15 = arith.constant 0 : index
    %10 = vector.load %arg8[%c0_13, %c0_14, %c0_15] : memref<8x8x1xf32, #tpu.memory_space<vmem>>, vector<1x8x1xf32>
    %11 = vector.shape_cast %10 : vector<1x8x1xf32> to vector<8x1xf32>
    %cst_16 = arith.constant dense<0xFF800000> : vector<8xf32>
    %12 = vector.multi_reduction <maximumf>, %9, %cst_16 [1] : vector<8x8xf32> to vector<8xf32>
    %13 = vector.shape_cast %12 : vector<8xf32> to vector<8x1xf32>
    %14 = arith.maximumf %11, %13 : vector<8x1xf32>
    %15 = arith.subf %11, %14 : vector<8x1xf32>
    %16 = math.exp %15 : vector<8x1xf32>
    %17 = vector.broadcast %14 : vector<8x1xf32> to vector<8x8xf32>
    %18 = arith.subf %9, %17 : vector<8x8xf32>
    %19 = math.exp %18 : vector<8x8xf32>
    %c0_17 = arith.constant 0 : index
    %c0_18 = arith.constant 0 : index
    %c0_19 = arith.constant 0 : index
    %20 = vector.load %arg9[%c0_17, %c0_18, %c0_19] : memref<8x8x1xf32, #tpu.memory_space<vmem>>, vector<1x8x1xf32>
    %21 = vector.shape_cast %20 : vector<1x8x1xf32> to vector<8x1xf32>
    %22 = arith.mulf %16, %21 : vector<8x1xf32>
    %cst_20 = arith.constant dense<0.000000e+00> : vector<8xf32>
    %23 = vector.multi_reduction <add>, %19, %cst_20 [1] : vector<8x8xf32> to vector<8xf32>
    %24 = vector.shape_cast %23 : vector<8xf32> to vector<8x1xf32>
    %25 = arith.addf %22, %24 : vector<8x1xf32>
    %c0_21 = arith.constant 0 : index
    %c0_22 = arith.constant 0 : index
    %c0_23 = arith.constant 0 : index
    %26 = vector.load %arg9[%c0_21, %c0_22, %c0_23] : memref<8x8x1xf32, #tpu.memory_space<vmem>>, vector<1x8x1xf32>
    %27 = vector.shape_cast %26 : vector<1x8x1xf32> to vector<8x1xf32>
    %28 = vector.shape_cast %25 : vector<8x1xf32> to vector<1x8x1xf32>
    tpu.vector_store %arg9[%c0_21, %c0_22, %c0_23], %28 {strides = array<i32>} : memref<8x8x1xf32, #tpu.memory_space<vmem>>, vector<1x8x1xf32>,
    %c0_24 = arith.constant 0 : index
    %c0_25 = arith.constant 0 : index
    %c0_26 = arith.constant 0 : index
    %29 = vector.load %arg10[%c0_24, %c0_25, %c0_26] : memref<8x8x4xf32, #tpu.memory_space<vmem>>, vector<1x8x4xf32>
    %30 = vector.shape_cast %29 : vector<1x8x4xf32> to vector<8x4xf32>
    %31 = vector.broadcast %16 : vector<8x1xf32> to vector<8x4xf32>
    %32 = arith.mulf %31, %30 : vector<8x4xf32>
    %cst_27 = arith.constant dense<0.000000e+00> : vector<8x4xf32>
    %33 = tpu.matmul %19, %6, %cst_27 {dimension_numbers = #tpu.dot_dimension_numbers<[1], [0], [0], [1], [0, 0, 1, 1], [], []>} : vector<8x8xf32>, vector<8x4xf32>, vector<8x4xf32> -> vector<8x4xf32>
    %34 = arith.addf %32, %33 : vector<8x4xf32>
    %c0_28 = arith.constant 0 : index
    %c0_29 = arith.constant 0 : index
    %c0_30 = arith.constant 0 : index
    %35 = vector.load %arg10[%c0_28, %c0_29, %c0_30] : memref<8x8x4xf32, #tpu.memory_space<vmem>>, vector<1x8x4xf32>
    %36 = vector.shape_cast %35 : vector<1x8x4xf32> to vector<8x4xf32>
    %37 = vector.shape_cast %34 : vector<8x4xf32> to vector<1x8x4xf32>
    tpu.vector_store %arg10[%c0_28, %c0_29, %c0_30], %37 {strides = array<i32>} : memref<8x8x4xf32, #tpu.memory_space<vmem>>, vector<1x8x4xf32>,
    %c0_31 = arith.constant 0 : index
    %c0_32 = arith.constant 0 : index
    %c0_33 = arith.constant 0 : index
    %38 = vector.load %arg8[%c0_31, %c0_32, %c0_33] : memref<8x8x1xf32, #tpu.memory_space<vmem>>, vector<1x8x1xf32>
    %39 = vector.shape_cast %38 : vector<1x8x1xf32> to vector<8x1xf32>
    %40 = vector.shape_cast %14 : vector<8x1xf32> to vector<1x8x1xf32>
    tpu.vector_store %arg8[%c0_31, %c0_32, %c0_33], %40 {strides = array<i32>} : memref<8x8x1xf32, #tpu.memory_space<vmem>>, vector<1x8x1xf32>,
    %c0_34 = arith.constant 0 : index
    %c0_35 = arith.constant 0 : index
    %c0_36 = arith.constant 0 : index
    %c1 = arith.constant 1 : index
    %c0_37 = arith.constant 0 : index
    %41 = vector.load %arg4[%c0_34, %c0_35, %c0_36, %c1, %c0_37] : memref<1x8x1x8x4xf32, #tpu.memory_space<vmem>>, vector<1x8x1x1x4xf32>
    %42 = vector.shape_cast %41 : vector<1x8x1x1x4xf32> to vector<8x4xf32>
    %c0_38 = arith.constant 0 : index
    %c0_39 = arith.constant 0 : index
    %c0_40 = arith.constant 0 : index
    %c1_41 = arith.constant 1 : index
    %c0_42 = arith.constant 0 : index
    %43 = vector.load %arg5[%c0_38, %c0_39, %c0_40, %c1_41, %c0_42] : memref<1x8x1x8x4xf32, #tpu.memory_space<vmem>>, vector<1x8x1x1x4xf32>
    %44 = vector.shape_cast %43 : vector<1x8x1x1x4xf32> to vector<8x4xf32>
    %c1_43 = arith.constant 1 : index
    %c0_44 = arith.constant 0 : index
    %c0_45 = arith.constant 0 : index
    %45 = vector.load %arg7[%c1_43, %c0_44, %c0_45] : memref<8x8x4xf32, #tpu.memory_space<vmem>>, vector<1x8x4xf32>
    %46 = vector.shape_cast %45 : vector<1x8x4xf32> to vector<8x4xf32>
    %cst_46 = arith.constant dense<0.000000e+00> : vector<8x8xf32>
    %47 = tpu.matmul %46, %42, %cst_46 {dimension_numbers = #tpu.dot_dimension_numbers<[1], [1], [0], [0], [0, 0, 1, 0], [], []>} : vector<8x4xf32>, vector<8x4xf32>, vector<8x8xf32> -> vector<8x8xf32>
    %c1_47 = arith.constant 1 : index
    %c0_48 = arith.constant 0 : index
    %c0_49 = arith.constant 0 : index
    %48 = vector.load %arg8[%c1_47, %c0_48, %c0_49] : memref<8x8x1xf32, #tpu.memory_space<vmem>>, vector<1x8x1xf32>
    %49 = vector.shape_cast %48 : vector<1x8x1xf32> to vector<8x1xf32>
    %cst_50 = arith.constant dense<0xFF800000> : vector<8xf32>
    %50 = vector.multi_reduction <maximumf>, %47, %cst_50 [1] : vector<8x8xf32> to vector<8xf32>
    %51 = vector.shape_cast %50 : vector<8xf32> to vector<8x1xf32>
    %52 = arith.maximumf %49, %51 : vector<8x1xf32>
    %53 = arith.subf %49, %52 : vector<8x1xf32>
    %54 = math.exp %53 : vector<8x1xf32>
    %55 = vector.broadcast %52 : vector<8x1xf32> to vector<8x8xf32>
    %56 = arith.subf %47, %55 : vector<8x8xf32>
    %57 = math.exp %56 : vector<8x8xf32>
    %c1_51 = arith.constant 1 : index
    %c0_52 = arith.constant 0 : index
    %c0_53 = arith.constant 0 : index
    %58 = vector.load %arg9[%c1_51, %c0_52, %c0_53] : memref<8x8x1xf32, #tpu.memory_space<vmem>>, vector<1x8x1xf32>
    %59 = vector.shape_cast %58 : vector<1x8x1xf32> to vector<8x1xf32>
    %60 = arith.mulf %54, %59 : vector<8x1xf32>
    %cst_54 = arith.constant dense<0.000000e+00> : vector<8xf32>
    %61 = vector.multi_reduction <add>, %57, %cst_54 [1] : vector<8x8xf32> to vector<8xf32>
    %62 = vector.shape_cast %61 : vector<8xf32> to vector<8x1xf32>
    %63 = arith.addf %60, %62 : vector<8x1xf32>
    %c1_55 = arith.constant 1 : index
    %c0_56 = arith.constant 0 : index
    %c0_57 = arith.constant 0 : index
    %64 = vector.load %arg9[%c1_55, %c0_56, %c0_57] : memref<8x8x1xf32, #tpu.memory_space<vmem>>, vector<1x8x1xf32>
    %65 = vector.shape_cast %64 : vector<1x8x1xf32> to vector<8x1xf32>
    %66 = vector.shape_cast %63 : vector<8x1xf32> to vector<1x8x1xf32>
    tpu.vector_store %arg9[%c1_55, %c0_56, %c0_57], %66 {strides = array<i32>} : memref<8x8x1xf32, #tpu.memory_space<vmem>>, vector<1x8x1xf32>,
    %c1_58 = arith.constant 1 : index
    %c0_59 = arith.constant 0 : index
    %c0_60 = arith.constant 0 : index
    %67 = vector.load %arg10[%c1_58, %c0_59, %c0_60] : memref<8x8x4xf32, #tpu.memory_space<vmem>>, vector<1x8x4xf32>
    %68 = vector.shape_cast %67 : vector<1x8x4xf32> to vector<8x4xf32>
    %69 = vector.broadcast %54 : vector<8x1xf32> to vector<8x4xf32>
    %70 = arith.mulf %69, %68 : vector<8x4xf32>
    %cst_61 = arith.constant dense<0.000000e+00> : vector<8x4xf32>
    %71 = tpu.matmul %57, %44, %cst_61 {dimension_numbers = #tpu.dot_dimension_numbers<[1], [0], [0], [1], [0, 0, 1, 1], [], []>} : vector<8x8xf32>, vector<8x4xf32>, vector<8x4xf32> -> vector<8x4xf32>
    %72 = arith.addf %70, %71 : vector<8x4xf32>
    %c1_62 = arith.constant 1 : index
    %c0_63 = arith.constant 0 : index
    %c0_64 = arith.constant 0 : index
    %73 = vector.load %arg10[%c1_62, %c0_63, %c0_64] : memref<8x8x4xf32, #tpu.memory_space<vmem>>, vector<1x8x4xf32>
    %74 = vector.shape_cast %73 : vector<1x8x4xf32> to vector<8x4xf32>
    %75 = vector.shape_cast %72 : vector<8x4xf32> to vector<1x8x4xf32>
    tpu.vector_store %arg10[%c1_62, %c0_63, %c0_64], %75 {strides = array<i32>} : memref<8x8x4xf32, #tpu.memory_space<vmem>>, vector<1x8x4xf32>,
    %c1_65 = arith.constant 1 : index
    %c0_66 = arith.constant 0 : index
    %c0_67 = arith.constant 0 : index
    %76 = vector.load %arg8[%c1_65, %c0_66, %c0_67] : memref<8x8x1xf32, #tpu.memory_space<vmem>>, vector<1x8x1xf32>
    %77 = vector.shape_cast %76 : vector<1x8x1xf32> to vector<8x1xf32>
    %78 = vector.shape_cast %52 : vector<8x1xf32> to vector<1x8x1xf32>
    tpu.vector_store %arg8[%c1_65, %c0_66, %c0_67], %78 {strides = array<i32>} : memref<8x8x1xf32, #tpu.memory_space<vmem>>, vector<1x8x1xf32>,
    %c0_68 = arith.constant 0 : index
    %c0_69 = arith.constant 0 : index
    %c0_70 = arith.constant 0 : index
    %c2 = arith.constant 2 : index
    %c0_71 = arith.constant 0 : index
    %79 = vector.load %arg4[%c0_68, %c0_69, %c0_70, %c2, %c0_71] : memref<1x8x1x8x4xf32, #tpu.memory_space<vmem>>, vector<1x8x1x1x4xf32>
    %80 = vector.shape_cast %79 : vector<1x8x1x1x4xf32> to vector<8x4xf32>
    %c0_72 = arith.constant 0 : index
    %c0_73 = arith.constant 0 : index
    %c0_74 = arith.constant 0 : index
    %c2_75 = arith.constant 2 : index
    %c0_76 = arith.constant 0 : index
    %81 = vector.load %arg5[%c0_72, %c0_73, %c0_74, %c2_75, %c0_76] : memref<1x8x1x8x4xf32, #tpu.memory_space<vmem>>, vector<1x8x1x1x4xf32>
    %82 = vector.shape_cast %81 : vector<1x8x1x1x4xf32> to vector<8x4xf32>
    %c2_77 = arith.constant 2 : index
    %c0_78 = arith.constant 0 : index
    %c0_79 = arith.constant 0 : index
    %83 = vector.load %arg7[%c2_77, %c0_78, %c0_79] : memref<8x8x4xf32, #tpu.memory_space<vmem>>, vector<1x8x4xf32>
    %84 = vector.shape_cast %83 : vector<1x8x4xf32> to vector<8x4xf32>
    %cst_80 = arith.constant dense<0.000000e+00> : vector<8x8xf32>
    %85 = tpu.matmul %84, %80, %cst_80 {dimension_numbers = #tpu.dot_dimension_numbers<[1], [1], [0], [0], [0, 0, 1, 0], [], []>} : vector<8x4xf32>, vector<8x4xf32>, vector<8x8xf32> -> vector<8x8xf32>
    %c2_81 = arith.constant 2 : index
    %c0_82 = arith.constant 0 : index
    %c0_83 = arith.constant 0 : index
    %86 = vector.load %arg8[%c2_81, %c0_82, %c0_83] : memref<8x8x1xf32, #tpu.memory_space<vmem>>, vector<1x8x1xf32>
    %87 = vector.shape_cast %86 : vector<1x8x1xf32> to vector<8x1xf32>
    %cst_84 = arith.constant dense<0xFF800000> : vector<8xf32>
    %88 = vector.multi_reduction <maximumf>, %85, %cst_84 [1] : vector<8x8xf32> to vector<8xf32>
    %89 = vector.shape_cast %88 : vector<8xf32> to vector<8x1xf32>
    %90 = arith.maximumf %87, %89 : vector<8x1xf32>
    %91 = arith.subf %87, %90 : vector<8x1xf32>
    %92 = math.exp %91 : vector<8x1xf32>
    %93 = vector.broadcast %90 : vector<8x1xf32> to vector<8x8xf32>
    %94 = arith.subf %85, %93 : vector<8x8xf32>
    %95 = math.exp %94 : vector<8x8xf32>
    %c2_85 = arith.constant 2 : index
    %c0_86 = arith.constant 0 : index
    %c0_87 = arith.constant 0 : index
    %96 = vector.load %arg9[%c2_85, %c0_86, %c0_87] : memref<8x8x1xf32, #tpu.memory_space<vmem>>, vector<1x8x1xf32>
    %97 = vector.shape_cast %96 : vector<1x8x1xf32> to vector<8x1xf32>
    %98 = arith.mulf %92, %97 : vector<8x1xf32>
    %cst_88 = arith.constant dense<0.000000e+00> : vector<8xf32>
    %99 = vector.multi_reduction <add>, %95, %cst_88 [1] : vector<8x8xf32> to vector<8xf32>
    %100 = vector.shape_cast %99 : vector<8xf32> to vector<8x1xf32>
    %101 = arith.addf %98, %100 : vector<8x1xf32>
    %c2_89 = arith.constant 2 : index
    %c0_90 = arith.constant 0 : index
    %c0_91 = arith.constant 0 : index
    %102 = vector.load %arg9[%c2_89, %c0_90, %c0_91] : memref<8x8x1xf32, #tpu.memory_space<vmem>>, vector<1x8x1xf32>
    %103 = vector.shape_cast %102 : vector<1x8x1xf32> to vector<8x1xf32>
    %104 = vector.shape_cast %101 : vector<8x1xf32> to vector<1x8x1xf32>
    tpu.vector_store %arg9[%c2_89, %c0_90, %c0_91], %104 {strides = array<i32>} : memref<8x8x1xf32, #tpu.memory_space<vmem>>, vector<1x8x1xf32>,
    %c2_92 = arith.constant 2 : index
    %c0_93 = arith.constant 0 : index
    %c0_94 = arith.constant 0 : index
    %105 = vector.load %arg10[%c2_92, %c0_93, %c0_94] : memref<8x8x4xf32, #tpu.memory_space<vmem>>, vector<1x8x4xf32>
    %106 = vector.shape_cast %105 : vector<1x8x4xf32> to vector<8x4xf32>
    %107 = vector.broadcast %92 : vector<8x1xf32> to vector<8x4xf32>
    %108 = arith.mulf %107, %106 : vector<8x4xf32>
    %cst_95 = arith.constant dense<0.000000e+00> : vector<8x4xf32>
    %109 = tpu.matmul %95, %82, %cst_95 {dimension_numbers = #tpu.dot_dimension_numbers<[1], [0], [0], [1], [0, 0, 1, 1], [], []>} : vector<8x8xf32>, vector<8x4xf32>, vector<8x4xf32> -> vector<8x4xf32>
    %110 = arith.addf %108, %109 : vector<8x4xf32>
    %c2_96 = arith.constant 2 : index
    %c0_97 = arith.constant 0 : index
    %c0_98 = arith.constant 0 : index
    %111 = vector.load %arg10[%c2_96, %c0_97, %c0_98] : memref<8x8x4xf32, #tpu.memory_space<vmem>>, vector<1x8x4xf32>
    %112 = vector.shape_cast %111 : vector<1x8x4xf32> to vector<8x4xf32>
    %113 = vector.shape_cast %110 : vector<8x4xf32> to vector<1x8x4xf32>
    tpu.vector_store %arg10[%c2_96, %c0_97, %c0_98], %113 {strides = array<i32>} : memref<8x8x4xf32, #tpu.memory_space<vmem>>, vector<1x8x4xf32>,
    %c2_99 = arith.constant 2 : index
    %c0_100 = arith.constant 0 : index
    %c0_101 = arith.constant 0 : index
    %114 = vector.load %arg8[%c2_99, %c0_100, %c0_101] : memref<8x8x1xf32, #tpu.memory_space<vmem>>, vector<1x8x1xf32>
    %115 = vector.shape_cast %114 : vector<1x8x1xf32> to vector<8x1xf32>
    %116 = vector.shape_cast %90 : vector<8x1xf32> to vector<1x8x1xf32>
    tpu.vector_store %arg8[%c2_99, %c0_100, %c0_101], %116 {strides = array<i32>} : memref<8x8x1xf32, #tpu.memory_space<vmem>>, vector<1x8x1xf32>,
    %c0_102 = arith.constant 0 : index
    %c0_103 = arith.constant 0 : index
    %c0_104 = arith.constant 0 : index
    %c3 = arith.constant 3 : index
    %c0_105 = arith.constant 0 : index
    %117 = vector.load %arg4[%c0_102, %c0_103, %c0_104, %c3, %c0_105] : memref<1x8x1x8x4xf32, #tpu.memory_space<vmem>>, vector<1x8x1x1x4xf32>
    %118 = vector.shape_cast %117 : vector<1x8x1x1x4xf32> to vector<8x4xf32>
    %c0_106 = arith.constant 0 : index
    %c0_107 = arith.constant 0 : index
    %c0_108 = arith.constant 0 : index
    %c3_109 = arith.constant 3 : index
    %c0_110 = arith.constant 0 : index
    %119 = vector.load %arg5[%c0_106, %c0_107, %c0_108, %c3_109, %c0_110] : memref<1x8x1x8x4xf32, #tpu.memory_space<vmem>>, vector<1x8x1x1x4xf32>
    %120 = vector.shape_cast %119 : vector<1x8x1x1x4xf32> to vector<8x4xf32>
    %c3_111 = arith.constant 3 : index
    %c0_112 = arith.constant 0 : index
    %c0_113 = arith.constant 0 : index
    %121 = vector.load %arg7[%c3_111, %c0_112, %c0_113] : memref<8x8x4xf32, #tpu.memory_space<vmem>>, vector<1x8x4xf32>
    %122 = vector.shape_cast %121 : vector<1x8x4xf32> to vector<8x4xf32>
    %cst_114 = arith.constant dense<0.000000e+00> : vector<8x8xf32>
    %123 = tpu.matmul %122, %118, %cst_114 {dimension_numbers = #tpu.dot_dimension_numbers<[1], [1], [0], [0], [0, 0, 1, 0], [], []>} : vector<8x4xf32>, vector<8x4xf32>, vector<8x8xf32> -> vector<8x8xf32>
    %c3_115 = arith.constant 3 : index
    %c0_116 = arith.constant 0 : index
    %c0_117 = arith.constant 0 : index
    %124 = vector.load %arg8[%c3_115, %c0_116, %c0_117] : memref<8x8x1xf32, #tpu.memory_space<vmem>>, vector<1x8x1xf32>
    %125 = vector.shape_cast %124 : vector<1x8x1xf32> to vector<8x1xf32>
    %cst_118 = arith.constant dense<0xFF800000> : vector<8xf32>
    %126 = vector.multi_reduction <maximumf>, %123, %cst_118 [1] : vector<8x8xf32> to vector<8xf32>
    %127 = vector.shape_cast %126 : vector<8xf32> to vector<8x1xf32>
    %128 = arith.maximumf %125, %127 : vector<8x1xf32>
    %129 = arith.subf %125, %128 : vector<8x1xf32>
    %130 = math.exp %129 : vector<8x1xf32>
    %131 = vector.broadcast %128 : vector<8x1xf32> to vector<8x8xf32>
    %132 = arith.subf %123, %131 : vector<8x8xf32>
    %133 = math.exp %132 : vector<8x8xf32>
    %c3_119 = arith.constant 3 : index
    %c0_120 = arith.constant 0 : index
    %c0_121 = arith.constant 0 : index
    %134 = vector.load %arg9[%c3_119, %c0_120, %c0_121] : memref<8x8x1xf32, #tpu.memory_space<vmem>>, vector<1x8x1xf32>
    %135 = vector.shape_cast %134 : vector<1x8x1xf32> to vector<8x1xf32>
    %136 = arith.mulf %130, %135 : vector<8x1xf32>
    %cst_122 = arith.constant dense<0.000000e+00> : vector<8xf32>
    %137 = vector.multi_reduction <add>, %133, %cst_122 [1] : vector<8x8xf32> to vector<8xf32>
    %138 = vector.shape_cast %137 : vector<8xf32> to vector<8x1xf32>
    %139 = arith.addf %136, %138 : vector<8x1xf32>
    %c3_123 = arith.constant 3 : index
    %c0_124 = arith.constant 0 : index
    %c0_125 = arith.constant 0 : index
    %140 = vector.load %arg9[%c3_123, %c0_124, %c0_125] : memref<8x8x1xf32, #tpu.memory_space<vmem>>, vector<1x8x1xf32>
    %141 = vector.shape_cast %140 : vector<1x8x1xf32> to vector<8x1xf32>
    %142 = vector.shape_cast %139 : vector<8x1xf32> to vector<1x8x1xf32>
    tpu.vector_store %arg9[%c3_123, %c0_124, %c0_125], %142 {strides = array<i32>} : memref<8x8x1xf32, #tpu.memory_space<vmem>>, vector<1x8x1xf32>,
    %c3_126 = arith.constant 3 : index
    %c0_127 = arith.constant 0 : index
    %c0_128 = arith.constant 0 : index
    %143 = vector.load %arg10[%c3_126, %c0_127, %c0_128] : memref<8x8x4xf32, #tpu.memory_space<vmem>>, vector<1x8x4xf32>
    %144 = vector.shape_cast %143 : vector<1x8x4xf32> to vector<8x4xf32>
    %145 = vector.broadcast %130 : vector<8x1xf32> to vector<8x4xf32>
    %146 = arith.mulf %145, %144 : vector<8x4xf32>
    %cst_129 = arith.constant dense<0.000000e+00> : vector<8x4xf32>
    %147 = tpu.matmul %133, %120, %cst_129 {dimension_numbers = #tpu.dot_dimension_numbers<[1], [0], [0], [1], [0, 0, 1, 1], [], []>} : vector<8x8xf32>, vector<8x4xf32>, vector<8x4xf32> -> vector<8x4xf32>
    %148 = arith.addf %146, %147 : vector<8x4xf32>
    %c3_130 = arith.constant 3 : index
    %c0_131 = arith.constant 0 : index
    %c0_132 = arith.constant 0 : index
    %149 = vector.load %arg10[%c3_130, %c0_131, %c0_132] : memref<8x8x4xf32, #tpu.memory_space<vmem>>, vector<1x8x4xf32>
    %150 = vector.shape_cast %149 : vector<1x8x4xf32> to vector<8x4xf32>
    %151 = vector.shape_cast %148 : vector<8x4xf32> to vector<1x8x4xf32>
    tpu.vector_store %arg10[%c3_130, %c0_131, %c0_132], %151 {strides = array<i32>} : memref<8x8x4xf32, #tpu.memory_space<vmem>>, vector<1x8x4xf32>,
    %c3_133 = arith.constant 3 : index
    %c0_134 = arith.constant 0 : index
    %c0_135 = arith.constant 0 : index
    %152 = vector.load %arg8[%c3_133, %c0_134, %c0_135] : memref<8x8x1xf32, #tpu.memory_space<vmem>>, vector<1x8x1xf32>
    %153 = vector.shape_cast %152 : vector<1x8x1xf32> to vector<8x1xf32>
    %154 = vector.shape_cast %128 : vector<8x1xf32> to vector<1x8x1xf32>
    tpu.vector_store %arg8[%c3_133, %c0_134, %c0_135], %154 {strides = array<i32>} : memref<8x8x1xf32, #tpu.memory_space<vmem>>, vector<1x8x1xf32>,
    %c0_136 = arith.constant 0 : index
    %c0_137 = arith.constant 0 : index
    %c0_138 = arith.constant 0 : index
    %c4 = arith.constant 4 : index
    %c0_139 = arith.constant 0 : index
    %155 = vector.load %arg4[%c0_136, %c0_137, %c0_138, %c4, %c0_139] : memref<1x8x1x8x4xf32, #tpu.memory_space<vmem>>, vector<1x8x1x1x4xf32>
    %156 = vector.shape_cast %155 : vector<1x8x1x1x4xf32> to vector<8x4xf32>
    %c0_140 = arith.constant 0 : index
    %c0_141 = arith.constant 0 : index
    %c0_142 = arith.constant 0 : index
    %c4_143 = arith.constant 4 : index
    %c0_144 = arith.constant 0 : index
    %157 = vector.load %arg5[%c0_140, %c0_141, %c0_142, %c4_143, %c0_144] : memref<1x8x1x8x4xf32, #tpu.memory_space<vmem>>, vector<1x8x1x1x4xf32>
    %158 = vector.shape_cast %157 : vector<1x8x1x1x4xf32> to vector<8x4xf32>
    %c4_145 = arith.constant 4 : index
    %c0_146 = arith.constant 0 : index
    %c0_147 = arith.constant 0 : index
    %159 = vector.load %arg7[%c4_145, %c0_146, %c0_147] : memref<8x8x4xf32, #tpu.memory_space<vmem>>, vector<1x8x4xf32>
    %160 = vector.shape_cast %159 : vector<1x8x4xf32> to vector<8x4xf32>
    %cst_148 = arith.constant dense<0.000000e+00> : vector<8x8xf32>
    %161 = tpu.matmul %160, %156, %cst_148 {dimension_numbers = #tpu.dot_dimension_numbers<[1], [1], [0], [0], [0, 0, 1, 0], [], []>} : vector<8x4xf32>, vector<8x4xf32>, vector<8x8xf32> -> vector<8x8xf32>
    %c4_149 = arith.constant 4 : index
    %c0_150 = arith.constant 0 : index
    %c0_151 = arith.constant 0 : index
    %162 = vector.load %arg8[%c4_149, %c0_150, %c0_151] : memref<8x8x1xf32, #tpu.memory_space<vmem>>, vector<1x8x1xf32>
    %163 = vector.shape_cast %162 : vector<1x8x1xf32> to vector<8x1xf32>
    %cst_152 = arith.constant dense<0xFF800000> : vector<8xf32>
    %164 = vector.multi_reduction <maximumf>, %161, %cst_152 [1] : vector<8x8xf32> to vector<8xf32>
    %165 = vector.shape_cast %164 : vector<8xf32> to vector<8x1xf32>
    %166 = arith.maximumf %163, %165 : vector<8x1xf32>
    %167 = arith.subf %163, %166 : vector<8x1xf32>
    %168 = math.exp %167 : vector<8x1xf32>
    %169 = vector.broadcast %166 : vector<8x1xf32> to vector<8x8xf32>
    %170 = arith.subf %161, %169 : vector<8x8xf32>
    %171 = math.exp %170 : vector<8x8xf32>
    %c4_153 = arith.constant 4 : index
    %c0_154 = arith.constant 0 : index
    %c0_155 = arith.constant 0 : index
    %172 = vector.load %arg9[%c4_153, %c0_154, %c0_155] : memref<8x8x1xf32, #tpu.memory_space<vmem>>, vector<1x8x1xf32>
    %173 = vector.shape_cast %172 : vector<1x8x1xf32> to vector<8x1xf32>
    %174 = arith.mulf %168, %173 : vector<8x1xf32>
    %cst_156 = arith.constant dense<0.000000e+00> : vector<8xf32>
    %175 = vector.multi_reduction <add>, %171, %cst_156 [1] : vector<8x8xf32> to vector<8xf32>
    %176 = vector.shape_cast %175 : vector<8xf32> to vector<8x1xf32>
    %177 = arith.addf %174, %176 : vector<8x1xf32>
    %c4_157 = arith.constant 4 : index
    %c0_158 = arith.constant 0 : index
    %c0_159 = arith.constant 0 : index
    %178 = vector.load %arg9[%c4_157, %c0_158, %c0_159] : memref<8x8x1xf32, #tpu.memory_space<vmem>>, vector<1x8x1xf32>
    %179 = vector.shape_cast %178 : vector<1x8x1xf32> to vector<8x1xf32>
    %180 = vector.shape_cast %177 : vector<8x1xf32> to vector<1x8x1xf32>
    tpu.vector_store %arg9[%c4_157, %c0_158, %c0_159], %180 {strides = array<i32>} : memref<8x8x1xf32, #tpu.memory_space<vmem>>, vector<1x8x1xf32>,
    %c4_160 = arith.constant 4 : index
    %c0_161 = arith.constant 0 : index
    %c0_162 = arith.constant 0 : index
    %181 = vector.load %arg10[%c4_160, %c0_161, %c0_162] : memref<8x8x4xf32, #tpu.memory_space<vmem>>, vector<1x8x4xf32>
    %182 = vector.shape_cast %181 : vector<1x8x4xf32> to vector<8x4xf32>
    %183 = vector.broadcast %168 : vector<8x1xf32> to vector<8x4xf32>
    %184 = arith.mulf %183, %182 : vector<8x4xf32>
    %cst_163 = arith.constant dense<0.000000e+00> : vector<8x4xf32>
    %185 = tpu.matmul %171, %158, %cst_163 {dimension_numbers = #tpu.dot_dimension_numbers<[1], [0], [0], [1], [0, 0, 1, 1], [], []>} : vector<8x8xf32>, vector<8x4xf32>, vector<8x4xf32> -> vector<8x4xf32>
    %186 = arith.addf %184, %185 : vector<8x4xf32>
    %c4_164 = arith.constant 4 : index
    %c0_165 = arith.constant 0 : index
    %c0_166 = arith.constant 0 : index
    %187 = vector.load %arg10[%c4_164, %c0_165, %c0_166] : memref<8x8x4xf32, #tpu.memory_space<vmem>>, vector<1x8x4xf32>
    %188 = vector.shape_cast %187 : vector<1x8x4xf32> to vector<8x4xf32>
    %189 = vector.shape_cast %186 : vector<8x4xf32> to vector<1x8x4xf32>
    tpu.vector_store %arg10[%c4_164, %c0_165, %c0_166], %189 {strides = array<i32>} : memref<8x8x4xf32, #tpu.memory_space<vmem>>, vector<1x8x4xf32>,
    %c4_167 = arith.constant 4 : index
    %c0_168 = arith.constant 0 : index
    %c0_169 = arith.constant 0 : index
    %190 = vector.load %arg8[%c4_167, %c0_168, %c0_169] : memref<8x8x1xf32, #tpu.memory_space<vmem>>, vector<1x8x1xf32>
    %191 = vector.shape_cast %190 : vector<1x8x1xf32> to vector<8x1xf32>
    %192 = vector.shape_cast %166 : vector<8x1xf32> to vector<1x8x1xf32>
    tpu.vector_store %arg8[%c4_167, %c0_168, %c0_169], %192 {strides = array<i32>} : memref<8x8x1xf32, #tpu.memory_space<vmem>>, vector<1x8x1xf32>,
    %c0_170 = arith.constant 0 : index
    %c0_171 = arith.constant 0 : index
    %c0_172 = arith.constant 0 : index
    %c5 = arith.constant 5 : index
    %c0_173 = arith.constant 0 : index
    %193 = vector.load %arg4[%c0_170, %c0_171, %c0_172, %c5, %c0_173] : memref<1x8x1x8x4xf32, #tpu.memory_space<vmem>>, vector<1x8x1x1x4xf32>
    %194 = vector.shape_cast %193 : vector<1x8x1x1x4xf32> to vector<8x4xf32>
    %c0_174 = arith.constant 0 : index
    %c0_175 = arith.constant 0 : index
    %c0_176 = arith.constant 0 : index
    %c5_177 = arith.constant 5 : index
    %c0_178 = arith.constant 0 : index
    %195 = vector.load %arg5[%c0_174, %c0_175, %c0_176, %c5_177, %c0_178] : memref<1x8x1x8x4xf32, #tpu.memory_space<vmem>>, vector<1x8x1x1x4xf32>
    %196 = vector.shape_cast %195 : vector<1x8x1x1x4xf32> to vector<8x4xf32>
    %c5_179 = arith.constant 5 : index
    %c0_180 = arith.constant 0 : index
    %c0_181 = arith.constant 0 : index
    %197 = vector.load %arg7[%c5_179, %c0_180, %c0_181] : memref<8x8x4xf32, #tpu.memory_space<vmem>>, vector<1x8x4xf32>
    %198 = vector.shape_cast %197 : vector<1x8x4xf32> to vector<8x4xf32>
    %cst_182 = arith.constant dense<0.000000e+00> : vector<8x8xf32>
    %199 = tpu.matmul %198, %194, %cst_182 {dimension_numbers = #tpu.dot_dimension_numbers<[1], [1], [0], [0], [0, 0, 1, 0], [], []>} : vector<8x4xf32>, vector<8x4xf32>, vector<8x8xf32> -> vector<8x8xf32>
    %c5_183 = arith.constant 5 : index
    %c0_184 = arith.constant 0 : index
    %c0_185 = arith.constant 0 : index
    %200 = vector.load %arg8[%c5_183, %c0_184, %c0_185] : memref<8x8x1xf32, #tpu.memory_space<vmem>>, vector<1x8x1xf32>
    %201 = vector.shape_cast %200 : vector<1x8x1xf32> to vector<8x1xf32>
    %cst_186 = arith.constant dense<0xFF800000> : vector<8xf32>
    %202 = vector.multi_reduction <maximumf>, %199, %cst_186 [1] : vector<8x8xf32> to vector<8xf32>
    %203 = vector.shape_cast %202 : vector<8xf32> to vector<8x1xf32>
    %204 = arith.maximumf %201, %203 : vector<8x1xf32>
    %205 = arith.subf %201, %204 : vector<8x1xf32>
    %206 = math.exp %205 : vector<8x1xf32>
    %207 = vector.broadcast %204 : vector<8x1xf32> to vector<8x8xf32>
    %208 = arith.subf %199, %207 : vector<8x8xf32>
    %209 = math.exp %208 : vector<8x8xf32>
    %c5_187 = arith.constant 5 : index
    %c0_188 = arith.constant 0 : index
    %c0_189 = arith.constant 0 : index
    %210 = vector.load %arg9[%c5_187, %c0_188, %c0_189] : memref<8x8x1xf32, #tpu.memory_space<vmem>>, vector<1x8x1xf32>
    %211 = vector.shape_cast %210 : vector<1x8x1xf32> to vector<8x1xf32>
    %212 = arith.mulf %206, %211 : vector<8x1xf32>
    %cst_190 = arith.constant dense<0.000000e+00> : vector<8xf32>
    %213 = vector.multi_reduction <add>, %209, %cst_190 [1] : vector<8x8xf32> to vector<8xf32>
    %214 = vector.shape_cast %213 : vector<8xf32> to vector<8x1xf32>
    %215 = arith.addf %212, %214 : vector<8x1xf32>
    %c5_191 = arith.constant 5 : index
    %c0_192 = arith.constant 0 : index
    %c0_193 = arith.constant 0 : index
    %216 = vector.load %arg9[%c5_191, %c0_192, %c0_193] : memref<8x8x1xf32, #tpu.memory_space<vmem>>, vector<1x8x1xf32>
    %217 = vector.shape_cast %216 : vector<1x8x1xf32> to vector<8x1xf32>
    %218 = vector.shape_cast %215 : vector<8x1xf32> to vector<1x8x1xf32>
    tpu.vector_store %arg9[%c5_191, %c0_192, %c0_193], %218 {strides = array<i32>} : memref<8x8x1xf32, #tpu.memory_space<vmem>>, vector<1x8x1xf32>,
    %c5_194 = arith.constant 5 : index
    %c0_195 = arith.constant 0 : index
    %c0_196 = arith.constant 0 : index
    %219 = vector.load %arg10[%c5_194, %c0_195, %c0_196] : memref<8x8x4xf32, #tpu.memory_space<vmem>>, vector<1x8x4xf32>
    %220 = vector.shape_cast %219 : vector<1x8x4xf32> to vector<8x4xf32>
    %221 = vector.broadcast %206 : vector<8x1xf32> to vector<8x4xf32>
    %222 = arith.mulf %221, %220 : vector<8x4xf32>
    %cst_197 = arith.constant dense<0.000000e+00> : vector<8x4xf32>
    %223 = tpu.matmul %209, %196, %cst_197 {dimension_numbers = #tpu.dot_dimension_numbers<[1], [0], [0], [1], [0, 0, 1, 1], [], []>} : vector<8x8xf32>, vector<8x4xf32>, vector<8x4xf32> -> vector<8x4xf32>
    %224 = arith.addf %222, %223 : vector<8x4xf32>
    %c5_198 = arith.constant 5 : index
    %c0_199 = arith.constant 0 : index
    %c0_200 = arith.constant 0 : index
    %225 = vector.load %arg10[%c5_198, %c0_199, %c0_200] : memref<8x8x4xf32, #tpu.memory_space<vmem>>, vector<1x8x4xf32>
    %226 = vector.shape_cast %225 : vector<1x8x4xf32> to vector<8x4xf32>
    %227 = vector.shape_cast %224 : vector<8x4xf32> to vector<1x8x4xf32>
    tpu.vector_store %arg10[%c5_198, %c0_199, %c0_200], %227 {strides = array<i32>} : memref<8x8x4xf32, #tpu.memory_space<vmem>>, vector<1x8x4xf32>,
    %c5_201 = arith.constant 5 : index
    %c0_202 = arith.constant 0 : index
    %c0_203 = arith.constant 0 : index
    %228 = vector.load %arg8[%c5_201, %c0_202, %c0_203] : memref<8x8x1xf32, #tpu.memory_space<vmem>>, vector<1x8x1xf32>
    %229 = vector.shape_cast %228 : vector<1x8x1xf32> to vector<8x1xf32>
    %230 = vector.shape_cast %204 : vector<8x1xf32> to vector<1x8x1xf32>
    tpu.vector_store %arg8[%c5_201, %c0_202, %c0_203], %230 {strides = array<i32>} : memref<8x8x1xf32, #tpu.memory_space<vmem>>, vector<1x8x1xf32>,
    %c0_204 = arith.constant 0 : index
    %c0_205 = arith.constant 0 : index
    %c0_206 = arith.constant 0 : index
    %c6 = arith.constant 6 : index
    %c0_207 = arith.constant 0 : index
    %231 = vector.load %arg4[%c0_204, %c0_205, %c0_206, %c6, %c0_207] : memref<1x8x1x8x4xf32, #tpu.memory_space<vmem>>, vector<1x8x1x1x4xf32>
    %232 = vector.shape_cast %231 : vector<1x8x1x1x4xf32> to vector<8x4xf32>
    %c0_208 = arith.constant 0 : index
    %c0_209 = arith.constant 0 : index
    %c0_210 = arith.constant 0 : index
    %c6_211 = arith.constant 6 : index
    %c0_212 = arith.constant 0 : index
    %233 = vector.load %arg5[%c0_208, %c0_209, %c0_210, %c6_211, %c0_212] : memref<1x8x1x8x4xf32, #tpu.memory_space<vmem>>, vector<1x8x1x1x4xf32>
    %234 = vector.shape_cast %233 : vector<1x8x1x1x4xf32> to vector<8x4xf32>
    %c6_213 = arith.constant 6 : index
    %c0_214 = arith.constant 0 : index
    %c0_215 = arith.constant 0 : index
    %235 = vector.load %arg7[%c6_213, %c0_214, %c0_215] : memref<8x8x4xf32, #tpu.memory_space<vmem>>, vector<1x8x4xf32>
    %236 = vector.shape_cast %235 : vector<1x8x4xf32> to vector<8x4xf32>
    %cst_216 = arith.constant dense<0.000000e+00> : vector<8x8xf32>
    %237 = tpu.matmul %236, %232, %cst_216 {dimension_numbers = #tpu.dot_dimension_numbers<[1], [1], [0], [0], [0, 0, 1, 0], [], []>} : vector<8x4xf32>, vector<8x4xf32>, vector<8x8xf32> -> vector<8x8xf32>
    %c6_217 = arith.constant 6 : index
    %c0_218 = arith.constant 0 : index
    %c0_219 = arith.constant 0 : index
    %238 = vector.load %arg8[%c6_217, %c0_218, %c0_219] : memref<8x8x1xf32, #tpu.memory_space<vmem>>, vector<1x8x1xf32>
    %239 = vector.shape_cast %238 : vector<1x8x1xf32> to vector<8x1xf32>
    %cst_220 = arith.constant dense<0xFF800000> : vector<8xf32>
    %240 = vector.multi_reduction <maximumf>, %237, %cst_220 [1] : vector<8x8xf32> to vector<8xf32>
    %241 = vector.shape_cast %240 : vector<8xf32> to vector<8x1xf32>
    %242 = arith.maximumf %239, %241 : vector<8x1xf32>
    %243 = arith.subf %239, %242 : vector<8x1xf32>
    %244 = math.exp %243 : vector<8x1xf32>
    %245 = vector.broadcast %242 : vector<8x1xf32> to vector<8x8xf32>
    %246 = arith.subf %237, %245 : vector<8x8xf32>
    %247 = math.exp %246 : vector<8x8xf32>
    %c6_221 = arith.constant 6 : index
    %c0_222 = arith.constant 0 : index
    %c0_223 = arith.constant 0 : index
    %248 = vector.load %arg9[%c6_221, %c0_222, %c0_223] : memref<8x8x1xf32, #tpu.memory_space<vmem>>, vector<1x8x1xf32>
    %249 = vector.shape_cast %248 : vector<1x8x1xf32> to vector<8x1xf32>
    %250 = arith.mulf %244, %249 : vector<8x1xf32>
    %cst_224 = arith.constant dense<0.000000e+00> : vector<8xf32>
    %251 = vector.multi_reduction <add>, %247, %cst_224 [1] : vector<8x8xf32> to vector<8xf32>
    %252 = vector.shape_cast %251 : vector<8xf32> to vector<8x1xf32>
    %253 = arith.addf %250, %252 : vector<8x1xf32>
    %c6_225 = arith.constant 6 : index
    %c0_226 = arith.constant 0 : index
    %c0_227 = arith.constant 0 : index
    %254 = vector.load %arg9[%c6_225, %c0_226, %c0_227] : memref<8x8x1xf32, #tpu.memory_space<vmem>>, vector<1x8x1xf32>
    %255 = vector.shape_cast %254 : vector<1x8x1xf32> to vector<8x1xf32>
    %256 = vector.shape_cast %253 : vector<8x1xf32> to vector<1x8x1xf32>
    tpu.vector_store %arg9[%c6_225, %c0_226, %c0_227], %256 {strides = array<i32>} : memref<8x8x1xf32, #tpu.memory_space<vmem>>, vector<1x8x1xf32>,
    %c6_228 = arith.constant 6 : index
    %c0_229 = arith.constant 0 : index
    %c0_230 = arith.constant 0 : index
    %257 = vector.load %arg10[%c6_228, %c0_229, %c0_230] : memref<8x8x4xf32, #tpu.memory_space<vmem>>, vector<1x8x4xf32>
    %258 = vector.shape_cast %257 : vector<1x8x4xf32> to vector<8x4xf32>
    %259 = vector.broadcast %244 : vector<8x1xf32> to vector<8x4xf32>
    %260 = arith.mulf %259, %258 : vector<8x4xf32>
    %cst_231 = arith.constant dense<0.000000e+00> : vector<8x4xf32>
    %261 = tpu.matmul %247, %234, %cst_231 {dimension_numbers = #tpu.dot_dimension_numbers<[1], [0], [0], [1], [0, 0, 1, 1], [], []>} : vector<8x8xf32>, vector<8x4xf32>, vector<8x4xf32> -> vector<8x4xf32>
    %262 = arith.addf %260, %261 : vector<8x4xf32>
    %c6_232 = arith.constant 6 : index
    %c0_233 = arith.constant 0 : index
    %c0_234 = arith.constant 0 : index
    %263 = vector.load %arg10[%c6_232, %c0_233, %c0_234] : memref<8x8x4xf32, #tpu.memory_space<vmem>>, vector<1x8x4xf32>
    %264 = vector.shape_cast %263 : vector<1x8x4xf32> to vector<8x4xf32>
    %265 = vector.shape_cast %262 : vector<8x4xf32> to vector<1x8x4xf32>
    tpu.vector_store %arg10[%c6_232, %c0_233, %c0_234], %265 {strides = array<i32>} : memref<8x8x4xf32, #tpu.memory_space<vmem>>, vector<1x8x4xf32>,
    %c6_235 = arith.constant 6 : index
    %c0_236 = arith.constant 0 : index
    %c0_237 = arith.constant 0 : index
    %266 = vector.load %arg8[%c6_235, %c0_236, %c0_237] : memref<8x8x1xf32, #tpu.memory_space<vmem>>, vector<1x8x1xf32>
    %267 = vector.shape_cast %266 : vector<1x8x1xf32> to vector<8x1xf32>
    %268 = vector.shape_cast %242 : vector<8x1xf32> to vector<1x8x1xf32>
    tpu.vector_store %arg8[%c6_235, %c0_236, %c0_237], %268 {strides = array<i32>} : memref<8x8x1xf32, #tpu.memory_space<vmem>>, vector<1x8x1xf32>,
    %c0_238 = arith.constant 0 : index
    %c0_239 = arith.constant 0 : index
    %c0_240 = arith.constant 0 : index
    %c7 = arith.constant 7 : index
    %c0_241 = arith.constant 0 : index
    %269 = vector.load %arg4[%c0_238, %c0_239, %c0_240, %c7, %c0_241] : memref<1x8x1x8x4xf32, #tpu.memory_space<vmem>>, vector<1x8x1x1x4xf32>
    %270 = vector.shape_cast %269 : vector<1x8x1x1x4xf32> to vector<8x4xf32>
    %c0_242 = arith.constant 0 : index
    %c0_243 = arith.constant 0 : index
    %c0_244 = arith.constant 0 : index
    %c7_245 = arith.constant 7 : index
    %c0_246 = arith.constant 0 : index
    %271 = vector.load %arg5[%c0_242, %c0_243, %c0_244, %c7_245, %c0_246] : memref<1x8x1x8x4xf32, #tpu.memory_space<vmem>>, vector<1x8x1x1x4xf32>
    %272 = vector.shape_cast %271 : vector<1x8x1x1x4xf32> to vector<8x4xf32>
    %c7_247 = arith.constant 7 : index
    %c0_248 = arith.constant 0 : index
    %c0_249 = arith.constant 0 : index
    %273 = vector.load %arg7[%c7_247, %c0_248, %c0_249] : memref<8x8x4xf32, #tpu.memory_space<vmem>>, vector<1x8x4xf32>
    %274 = vector.shape_cast %273 : vector<1x8x4xf32> to vector<8x4xf32>
    %cst_250 = arith.constant dense<0.000000e+00> : vector<8x8xf32>
    %275 = tpu.matmul %274, %270, %cst_250 {dimension_numbers = #tpu.dot_dimension_numbers<[1], [1], [0], [0], [0, 0, 1, 0], [], []>} : vector<8x4xf32>, vector<8x4xf32>, vector<8x8xf32> -> vector<8x8xf32>
    %c7_251 = arith.constant 7 : index
    %c0_252 = arith.constant 0 : index
    %c0_253 = arith.constant 0 : index
    %276 = vector.load %arg8[%c7_251, %c0_252, %c0_253] : memref<8x8x1xf32, #tpu.memory_space<vmem>>, vector<1x8x1xf32>
    %277 = vector.shape_cast %276 : vector<1x8x1xf32> to vector<8x1xf32>
    %cst_254 = arith.constant dense<0xFF800000> : vector<8xf32>
    %278 = vector.multi_reduction <maximumf>, %275, %cst_254 [1] : vector<8x8xf32> to vector<8xf32>
    %279 = vector.shape_cast %278 : vector<8xf32> to vector<8x1xf32>
    %280 = arith.maximumf %277, %279 : vector<8x1xf32>
    %281 = arith.subf %277, %280 : vector<8x1xf32>
    %282 = math.exp %281 : vector<8x1xf32>
    %283 = vector.broadcast %280 : vector<8x1xf32> to vector<8x8xf32>
    %284 = arith.subf %275, %283 : vector<8x8xf32>
    %285 = math.exp %284 : vector<8x8xf32>
    %c7_255 = arith.constant 7 : index
    %c0_256 = arith.constant 0 : index
    %c0_257 = arith.constant 0 : index
    %286 = vector.load %arg9[%c7_255, %c0_256, %c0_257] : memref<8x8x1xf32, #tpu.memory_space<vmem>>, vector<1x8x1xf32>
    %287 = vector.shape_cast %286 : vector<1x8x1xf32> to vector<8x1xf32>
    %288 = arith.mulf %282, %287 : vector<8x1xf32>
    %cst_258 = arith.constant dense<0.000000e+00> : vector<8xf32>
    %289 = vector.multi_reduction <add>, %285, %cst_258 [1] : vector<8x8xf32> to vector<8xf32>
    %290 = vector.shape_cast %289 : vector<8xf32> to vector<8x1xf32>
    %291 = arith.addf %288, %290 : vector<8x1xf32>
    %c7_259 = arith.constant 7 : index
    %c0_260 = arith.constant 0 : index
    %c0_261 = arith.constant 0 : index
    %292 = vector.load %arg9[%c7_259, %c0_260, %c0_261] : memref<8x8x1xf32, #tpu.memory_space<vmem>>, vector<1x8x1xf32>
    %293 = vector.shape_cast %292 : vector<1x8x1xf32> to vector<8x1xf32>
    %294 = vector.shape_cast %291 : vector<8x1xf32> to vector<1x8x1xf32>
    tpu.vector_store %arg9[%c7_259, %c0_260, %c0_261], %294 {strides = array<i32>} : memref<8x8x1xf32, #tpu.memory_space<vmem>>, vector<1x8x1xf32>,
    %c7_262 = arith.constant 7 : index
    %c0_263 = arith.constant 0 : index
    %c0_264 = arith.constant 0 : index
    %295 = vector.load %arg10[%c7_262, %c0_263, %c0_264] : memref<8x8x4xf32, #tpu.memory_space<vmem>>, vector<1x8x4xf32>
    %296 = vector.shape_cast %295 : vector<1x8x4xf32> to vector<8x4xf32>
    %297 = vector.broadcast %282 : vector<8x1xf32> to vector<8x4xf32>
    %298 = arith.mulf %297, %296 : vector<8x4xf32>
    %cst_265 = arith.constant dense<0.000000e+00> : vector<8x4xf32>
    %299 = tpu.matmul %285, %272, %cst_265 {dimension_numbers = #tpu.dot_dimension_numbers<[1], [0], [0], [1], [0, 0, 1, 1], [], []>} : vector<8x8xf32>, vector<8x4xf32>, vector<8x4xf32> -> vector<8x4xf32>
    %300 = arith.addf %298, %299 : vector<8x4xf32>
    %c7_266 = arith.constant 7 : index
    %c0_267 = arith.constant 0 : index
    %c0_268 = arith.constant 0 : index
    %301 = vector.load %arg10[%c7_266, %c0_267, %c0_268] : memref<8x8x4xf32, #tpu.memory_space<vmem>>, vector<1x8x4xf32>
    %302 = vector.shape_cast %301 : vector<1x8x4xf32> to vector<8x4xf32>
    %303 = vector.shape_cast %300 : vector<8x4xf32> to vector<1x8x4xf32>
    tpu.vector_store %arg10[%c7_266, %c0_267, %c0_268], %303 {strides = array<i32>} : memref<8x8x4xf32, #tpu.memory_space<vmem>>, vector<1x8x4xf32>,
    %c7_269 = arith.constant 7 : index
    %c0_270 = arith.constant 0 : index
    %c0_271 = arith.constant 0 : index
    %304 = vector.load %arg8[%c7_269, %c0_270, %c0_271] : memref<8x8x1xf32, #tpu.memory_space<vmem>>, vector<1x8x1xf32>
    %305 = vector.shape_cast %304 : vector<1x8x1xf32> to vector<8x1xf32>
    %306 = vector.shape_cast %280 : vector<8x1xf32> to vector<1x8x1xf32>
    tpu.vector_store %arg8[%c7_269, %c0_270, %c0_271], %306 {strides = array<i32>} : memref<8x8x1xf32, #tpu.memory_space<vmem>>, vector<1x8x1xf32>,
    %c0_i32_272 = arith.constant 0 : i32
    %307 = arith.cmpi eq, %arg2, %c0_i32_272 : i32
    %308 = arith.extui %307 : i1 to i32
    %c0_i32_273 = arith.constant 0 : i32
    %309 = arith.cmpi ne, %308, %c0_i32_273 : i32
    scf.if %309 {
      %c0_274 = arith.constant 0 : index
      %c0_275 = arith.constant 0 : index
      %c0_276 = arith.constant 0 : index
      %310 = vector.load %arg10[%c0_274, %c0_275, %c0_276] : memref<8x8x4xf32, #tpu.memory_space<vmem>>, vector<1x8x4xf32>
      %311 = vector.shape_cast %310 : vector<1x8x4xf32> to vector<8x4xf32>
      %c0_277 = arith.constant 0 : index
      %c0_278 = arith.constant 0 : index
      %c0_279 = arith.constant 0 : index
      %312 = vector.load %arg9[%c0_277, %c0_278, %c0_279] : memref<8x8x1xf32, #tpu.memory_space<vmem>>, vector<1x8x1xf32>
      %313 = vector.shape_cast %312 : vector<1x8x1xf32> to vector<8x1xf32>
      %314 = tpu.reciprocal %313 {approx = true} : vector<8x1xf32> -> vector<8x1xf32>
      %315 = vector.broadcast %314 : vector<8x1xf32> to vector<8x4xf32>
      %316 = arith.mulf %311, %315 : vector<8x4xf32>
      %c0_280 = arith.constant 0 : index
      %c0_281 = arith.constant 0 : index
      %c0_282 = arith.constant 0 : index
      %317 = vector.load %arg6[%c0_280, %c0_281, %c0_282] : memref<1x8x32xf32, #tpu.memory_space<vmem>>, vector<1x8x4xf32>
      %318 = vector.shape_cast %317 : vector<1x8x4xf32> to vector<8x4xf32>
      %319 = vector.shape_cast %316 : vector<8x4xf32> to vector<1x8x4xf32>
      tpu.vector_store %arg6[%c0_280, %c0_281, %c0_282], %319 {strides = array<i32>} : memref<1x8x32xf32, #tpu.memory_space<vmem>>, vector<1x8x4xf32>,
      %c1_283 = arith.constant 1 : index
      %c0_284 = arith.constant 0 : index
      %c0_285 = arith.constant 0 : index
      %320 = vector.load %arg10[%c1_283, %c0_284, %c0_285] : memref<8x8x4xf32, #tpu.memory_space<vmem>>, vector<1x8x4xf32>
      %321 = vector.shape_cast %320 : vector<1x8x4xf32> to vector<8x4xf32>
      %c1_286 = arith.constant 1 : index
      %c0_287 = arith.constant 0 : index
      %c0_288 = arith.constant 0 : index
      %322 = vector.load %arg9[%c1_286, %c0_287, %c0_288] : memref<8x8x1xf32, #tpu.memory_space<vmem>>, vector<1x8x1xf32>
      %323 = vector.shape_cast %322 : vector<1x8x1xf32> to vector<8x1xf32>
      %324 = tpu.reciprocal %323 {approx = true} : vector<8x1xf32> -> vector<8x1xf32>
      %325 = vector.broadcast %324 : vector<8x1xf32> to vector<8x4xf32>
      %326 = arith.mulf %321, %325 : vector<8x4xf32>
      %c0_289 = arith.constant 0 : index
      %c0_290 = arith.constant 0 : index
      %c4_291 = arith.constant 4 : index
      %327 = vector.load %arg6[%c0_289, %c0_290, %c4_291] : memref<1x8x32xf32, #tpu.memory_space<vmem>>, vector<1x8x4xf32>
      %328 = vector.shape_cast %327 : vector<1x8x4xf32> to vector<8x4xf32>
      %329 = vector.shape_cast %326 : vector<8x4xf32> to vector<1x8x4xf32>
      tpu.vector_store %arg6[%c0_289, %c0_290, %c4_291], %329 {strides = array<i32>} : memref<1x8x32xf32, #tpu.memory_space<vmem>>, vector<1x8x4xf32>,
      %c2_292 = arith.constant 2 : index
      %c0_293 = arith.constant 0 : index
      %c0_294 = arith.constant 0 : index
      %330 = vector.load %arg10[%c2_292, %c0_293, %c0_294] : memref<8x8x4xf32, #tpu.memory_space<vmem>>, vector<1x8x4xf32>
      %331 = vector.shape_cast %330 : vector<1x8x4xf32> to vector<8x4xf32>
      %c2_295 = arith.constant 2 : index
      %c0_296 = arith.constant 0 : index
      %c0_297 = arith.constant 0 : index
      %332 = vector.load %arg9[%c2_295, %c0_296, %c0_297] : memref<8x8x1xf32, #tpu.memory_space<vmem>>, vector<1x8x1xf32>
      %333 = vector.shape_cast %332 : vector<1x8x1xf32> to vector<8x1xf32>
      %334 = tpu.reciprocal %333 {approx = true} : vector<8x1xf32> -> vector<8x1xf32>
      %335 = vector.broadcast %334 : vector<8x1xf32> to vector<8x4xf32>
      %336 = arith.mulf %331, %335 : vector<8x4xf32>
      %c0_298 = arith.constant 0 : index
      %c0_299 = arith.constant 0 : index
      %c8 = arith.constant 8 : index
      %337 = vector.load %arg6[%c0_298, %c0_299, %c8] : memref<1x8x32xf32, #tpu.memory_space<vmem>>, vector<1x8x4xf32>
      %338 = vector.shape_cast %337 : vector<1x8x4xf32> to vector<8x4xf32>
      %339 = vector.shape_cast %336 : vector<8x4xf32> to vector<1x8x4xf32>
      tpu.vector_store %arg6[%c0_298, %c0_299, %c8], %339 {strides = array<i32>} : memref<1x8x32xf32, #tpu.memory_space<vmem>>, vector<1x8x4xf32>,
      %c3_300 = arith.constant 3 : index
      %c0_301 = arith.constant 0 : index
      %c0_302 = arith.constant 0 : index
      %340 = vector.load %arg10[%c3_300, %c0_301, %c0_302] : memref<8x8x4xf32, #tpu.memory_space<vmem>>, vector<1x8x4xf32>
      %341 = vector.shape_cast %340 : vector<1x8x4xf32> to vector<8x4xf32>
      %c3_303 = arith.constant 3 : index
      %c0_304 = arith.constant 0 : index
      %c0_305 = arith.constant 0 : index
      %342 = vector.load %arg9[%c3_303, %c0_304, %c0_305] : memref<8x8x1xf32, #tpu.memory_space<vmem>>, vector<1x8x1xf32>
      %343 = vector.shape_cast %342 : vector<1x8x1xf32> to vector<8x1xf32>
      %344 = tpu.reciprocal %343 {approx = true} : vector<8x1xf32> -> vector<8x1xf32>
      %345 = vector.broadcast %344 : vector<8x1xf32> to vector<8x4xf32>
      %346 = arith.mulf %341, %345 : vector<8x4xf32>
      %c0_306 = arith.constant 0 : index
      %c0_307 = arith.constant 0 : index
      %c12 = arith.constant 12 : index
      %347 = vector.load %arg6[%c0_306, %c0_307, %c12] : memref<1x8x32xf32, #tpu.memory_space<vmem>>, vector<1x8x4xf32>
      %348 = vector.shape_cast %347 : vector<1x8x4xf32> to vector<8x4xf32>
      %349 = vector.shape_cast %346 : vector<8x4xf32> to vector<1x8x4xf32>
      tpu.vector_store %arg6[%c0_306, %c0_307, %c12], %349 {strides = array<i32>} : memref<1x8x32xf32, #tpu.memory_space<vmem>>, vector<1x8x4xf32>,
      %c4_308 = arith.constant 4 : index
      %c0_309 = arith.constant 0 : index
      %c0_310 = arith.constant 0 : index
      %350 = vector.load %arg10[%c4_308, %c0_309, %c0_310] : memref<8x8x4xf32, #tpu.memory_space<vmem>>, vector<1x8x4xf32>
      %351 = vector.shape_cast %350 : vector<1x8x4xf32> to vector<8x4xf32>
      %c4_311 = arith.constant 4 : index
      %c0_312 = arith.constant 0 : index
      %c0_313 = arith.constant 0 : index
      %352 = vector.load %arg9[%c4_311, %c0_312, %c0_313] : memref<8x8x1xf32, #tpu.memory_space<vmem>>, vector<1x8x1xf32>
      %353 = vector.shape_cast %352 : vector<1x8x1xf32> to vector<8x1xf32>
      %354 = tpu.reciprocal %353 {approx = true} : vector<8x1xf32> -> vector<8x1xf32>
      %355 = vector.broadcast %354 : vector<8x1xf32> to vector<8x4xf32>
      %356 = arith.mulf %351, %355 : vector<8x4xf32>
      %c0_314 = arith.constant 0 : index
      %c0_315 = arith.constant 0 : index
      %c16 = arith.constant 16 : index
      %357 = vector.load %arg6[%c0_314, %c0_315, %c16] : memref<1x8x32xf32, #tpu.memory_space<vmem>>, vector<1x8x4xf32>
      %358 = vector.shape_cast %357 : vector<1x8x4xf32> to vector<8x4xf32>
      %359 = vector.shape_cast %356 : vector<8x4xf32> to vector<1x8x4xf32>
      tpu.vector_store %arg6[%c0_314, %c0_315, %c16], %359 {strides = array<i32>} : memref<1x8x32xf32, #tpu.memory_space<vmem>>, vector<1x8x4xf32>,
      %c5_316 = arith.constant 5 : index
      %c0_317 = arith.constant 0 : index
      %c0_318 = arith.constant 0 : index
      %360 = vector.load %arg10[%c5_316, %c0_317, %c0_318] : memref<8x8x4xf32, #tpu.memory_space<vmem>>, vector<1x8x4xf32>
      %361 = vector.shape_cast %360 : vector<1x8x4xf32> to vector<8x4xf32>
      %c5_319 = arith.constant 5 : index
      %c0_320 = arith.constant 0 : index
      %c0_321 = arith.constant 0 : index
      %362 = vector.load %arg9[%c5_319, %c0_320, %c0_321] : memref<8x8x1xf32, #tpu.memory_space<vmem>>, vector<1x8x1xf32>
      %363 = vector.shape_cast %362 : vector<1x8x1xf32> to vector<8x1xf32>
      %364 = tpu.reciprocal %363 {approx = true} : vector<8x1xf32> -> vector<8x1xf32>
      %365 = vector.broadcast %364 : vector<8x1xf32> to vector<8x4xf32>
      %366 = arith.mulf %361, %365 : vector<8x4xf32>
      %c0_322 = arith.constant 0 : index
      %c0_323 = arith.constant 0 : index
      %c20 = arith.constant 20 : index
      %367 = vector.load %arg6[%c0_322, %c0_323, %c20] : memref<1x8x32xf32, #tpu.memory_space<vmem>>, vector<1x8x4xf32>
      %368 = vector.shape_cast %367 : vector<1x8x4xf32> to vector<8x4xf32>
      %369 = vector.shape_cast %366 : vector<8x4xf32> to vector<1x8x4xf32>
      tpu.vector_store %arg6[%c0_322, %c0_323, %c20], %369 {strides = array<i32>} : memref<1x8x32xf32, #tpu.memory_space<vmem>>, vector<1x8x4xf32>,
      %c6_324 = arith.constant 6 : index
      %c0_325 = arith.constant 0 : index
      %c0_326 = arith.constant 0 : index
      %370 = vector.load %arg10[%c6_324, %c0_325, %c0_326] : memref<8x8x4xf32, #tpu.memory_space<vmem>>, vector<1x8x4xf32>
      %371 = vector.shape_cast %370 : vector<1x8x4xf32> to vector<8x4xf32>
      %c6_327 = arith.constant 6 : index
      %c0_328 = arith.constant 0 : index
      %c0_329 = arith.constant 0 : index
      %372 = vector.load %arg9[%c6_327, %c0_328, %c0_329] : memref<8x8x1xf32, #tpu.memory_space<vmem>>, vector<1x8x1xf32>
      %373 = vector.shape_cast %372 : vector<1x8x1xf32> to vector<8x1xf32>
      %374 = tpu.reciprocal %373 {approx = true} : vector<8x1xf32> -> vector<8x1xf32>
      %375 = vector.broadcast %374 : vector<8x1xf32> to vector<8x4xf32>
      %376 = arith.mulf %371, %375 : vector<8x4xf32>
      %c0_330 = arith.constant 0 : index
      %c0_331 = arith.constant 0 : index
      %c24 = arith.constant 24 : index
      %377 = vector.load %arg6[%c0_330, %c0_331, %c24] : memref<1x8x32xf32, #tpu.memory_space<vmem>>, vector<1x8x4xf32>
      %378 = vector.shape_cast %377 : vector<1x8x4xf32> to vector<8x4xf32>
      %379 = vector.shape_cast %376 : vector<8x4xf32> to vector<1x8x4xf32>
      tpu.vector_store %arg6[%c0_330, %c0_331, %c24], %379 {strides = array<i32>} : memref<1x8x32xf32, #tpu.memory_space<vmem>>, vector<1x8x4xf32>,
      %c7_332 = arith.constant 7 : index
      %c0_333 = arith.constant 0 : index
      %c0_334 = arith.constant 0 : index
      %380 = vector.load %arg10[%c7_332, %c0_333, %c0_334] : memref<8x8x4xf32, #tpu.memory_space<vmem>>, vector<1x8x4xf32>
      %381 = vector.shape_cast %380 : vector<1x8x4xf32> to vector<8x4xf32>
      %c7_335 = arith.constant 7 : index
      %c0_336 = arith.constant 0 : index
      %c0_337 = arith.constant 0 : index
      %382 = vector.load %arg9[%c7_335, %c0_336, %c0_337] : memref<8x8x1xf32, #tpu.memory_space<vmem>>, vector<1x8x1xf32>
      %383 = vector.shape_cast %382 : vector<1x8x1xf32> to vector<8x1xf32>
      %384 = tpu.reciprocal %383 {approx = true} : vector<8x1xf32> -> vector<8x1xf32>
      %385 = vector.broadcast %384 : vector<8x1xf32> to vector<8x4xf32>
      %386 = arith.mulf %381, %385 : vector<8x4xf32>
      %c0_338 = arith.constant 0 : index
      %c0_339 = arith.constant 0 : index
      %c28 = arith.constant 28 : index
      %387 = vector.load %arg6[%c0_338, %c0_339, %c28] : memref<1x8x32xf32, #tpu.memory_space<vmem>>, vector<1x8x4xf32>
      %388 = vector.shape_cast %387 : vector<1x8x4xf32> to vector<8x4xf32>
      %389 = vector.shape_cast %386 : vector<8x4xf32> to vector<1x8x4xf32>
      tpu.vector_store %arg6[%c0_338, %c0_339, %c28], %389 {strides = array<i32>} : memref<1x8x32xf32, #tpu.memory_space<vmem>>, vector<1x8x4xf32>,
    } else {
    }
    return
  }
  func.func @transform_0(%arg0: i32, %arg1: i32, %arg2: i32) -> (i32, i32, i32, i32, i32) {
    %c0_i32 = arith.constant 0 : i32
    %c0_i32_0 = arith.constant 0 : i32
    %c0_i32_1 = arith.constant 0 : i32
    %c0_i32_2 = arith.constant 0 : i32
    return %arg0, %arg1, %c0_i32, %c0_i32_0, %c0_i32_1 : i32, i32, i32, i32, i32
  }
  func.func @transform_1(%arg0: i32, %arg1: i32, %arg2: i32) -> (i32, i32, i32, i32, i32) {
    %c1_i32 = arith.constant 1 : i32
    %c0_i32 = arith.constant 0 : i32
    %c0_i32_0 = arith.constant 0 : i32
    %c0_i32_1 = arith.constant 0 : i32
    return %arg0, %arg2, %c1_i32, %c0_i32, %c0_i32_0 : i32, i32, i32, i32, i32
  }
  func.func @transform_2(%arg0: i32, %arg1: i32, %arg2: i32) -> (i32, i32, i32, i32, i32) {
    %c2_i32 = arith.constant 2 : i32
    %c0_i32 = arith.constant 0 : i32
    %c0_i32_0 = arith.constant 0 : i32
    %c0_i32_1 = arith.constant 0 : i32
    return %arg0, %arg2, %c2_i32, %c0_i32, %c0_i32_0 : i32, i32, i32, i32, i32
  }
  func.func @transform_3(%arg0: i32, %arg1: i32, %arg2: i32) -> (i32, i32, i32) {
    %c0_i32 = arith.constant 0 : i32
    %c0_i32_0 = arith.constant 0 : i32
    return %arg0, %arg1, %c0_i32 : i32, i32, i32
  }
}

</mosaic_0001>

<bundles_post_ra>
// kernel: attention_forward.5
= control target key start
LH: loop header
LB: loop body
LE: loop exit
PB: predicated region body
PF: predicated region fallthrough
CT: control target
= control target key end

     0   :  { %vm19_vm0 = vcmask 261120   ;;  %v204_v6 = vmov 0.0   ;;  %s269_s0 = inlined_call_operand.vmem [shape: f32[16,32], index: 0, kind: input, shape index: {}]   ;;  %s270_s1 = inlined_call_operand.vmem [shape: f32[32,32], index: 1, kind: input, shape index: {}]   ;;  %s271_s2 = inlined_call_operand.vmem [shape: f32[1,32], index: 2, kind: input, shape index: {}]   ;;  %s272_s3 = inlined_call_operand.hbm [shape: f32[16,32], index: 3, kind: output, shape index: {}]  }
   0x1   :  { %v26_v0 = vld [vmem:[%s270_s1] sm:$0xff]  ;;  %v27_v1 = vld [vmem:[%s270_s1 + $0x8] sm:$0xff]  ;;  %v28_v2 = vld [vmem:[%s270_s1 + $0x10] sm:$0xff]  ;;  %21 = vst.msk [vmem:[#allocation2 + $0x8] sm:$0xff] %vm19_vm0, %v204_v6 }
   0x2   :  { %v168_v3 = vpack.c.bf16 %v27_v1, %v26_v0  ;;  %v29_v4 = vld [vmem:[%s270_s1 + $0x18] sm:$0xff]  ;;  %v24_v5 = vld [vmem:[%s269_s0] sm:$0xff]  ;;  %20 = vst.msk [vmem:[#allocation2] sm:$0xff] %vm19_vm0, %v204_v6 }
   0x3   :  { %v172_v7 = vpack.c.bf16 %v29_v4, %v28_v2  ;;  %165 = vmatprep.mubr.msk.f32.mxu0 %vm19_vm0, %v24_v5 }
   0x4   :  { %8 = vsyncpa [#allocation4], 0  ;;  %169 = vmatprep.subr.bf16.mxu0 %v168_v3  ;;  %v25_v8 = vld [vmem:[%s269_s0 + $0x8] sm:$0xff]  ;;  %v150_v15 = vld [vmem:[%s271_s2] ss:$0 sm:$0xff]  ;;  %s205_s25 = smov [#allocation3]  }
   0x5   :  { %171 = vmatpush3.bf16.msra.mxu0 %v168_v3  ;;  %s137_s26 = sshll.u32 %s205_s25, 4  ;;  %s138_s26 = int_to_ptr.vmem [resolvable:$true] %s137_s26 }
   0x6   :  { %173 = vmatprep.subr.bf16.mxu0 %v172_v7  ;;  %s180_s0 = scalar_lea.vmem %s138_s26, 256  ;;  %p185_p1 = scmp.lt.s32.totalorder %s138_s26, %s138_s26 }
   0x7   :  { %p181_p0 = scmp.ne.s32.totalorder %s138_s26, %s180_s0  ;;  %p186_p2 = scmp.lt.s32.totalorder %s180_s0, %s180_s0 }
   0x8   :  { %v23_v9 = vld [vmem:[#allocation2 + $0x8] sm:$0xff] }
   0x9   :  { %175 = vmatpush3.bf16.msra.mxu0 %v172_v7  ;;  %v22_v10 = vld [vmem:[#allocation2] sm:$0xff]  ;;  %p187_p3 = por %p186_p2, %p185_p1 }
   0xb   :  { %p188_p4 = pnand %p187_p3, %p181_p0 }
   0xc   :  { %166 = vmatmul.mubr.msk.f32.vlgmr.msra.gmra.mrb[0].mxu0 %vm19_vm0, %v25_v8 }
  0xdf   :  { %v167_v11 = vpop.f32.mrb[0].mxu0 }
  0xe0   :  { %v113_v12 = vadd.f32 %v167_v11, %v23_v9  ;;  %v103_v13 = vpop.f32.mrb[1].mxu0 }
  0xe1   :  { %v112_v14 = vadd.f32 %v103_v13, %v22_v10 }
  0xe2   :  { %115 = vst.msk [vmem:[#allocation2 + $0x8] sm:$0xff] %vm19_vm0, %v113_v12 }
  0xe3   :  { %114 = vst.msk [vmem:[#allocation2] sm:$0xff] %vm19_vm0, %v112_v14 }
  0xe9   :  { %v120_v16 = vld [vmem:[#allocation2 + $0x8] sm:$0xff] }
  0xea   :  { %v119_v17 = vld [vmem:[#allocation2] sm:$0xff]  ;;  %v129_v18 = vadd.f32 %v150_v15, %v120_v16 }
  0xeb   :  { %v128_v19 = vadd.f32 %v150_v15, %v119_v17 }
  0xec   :  { %131 = vst.msk [vmem:[#allocation3 + $0x8] sm:$0xff] %vm19_vm0, %v129_v18 }
  0xed   :  { %130 = vst.msk [vmem:[#allocation3] sm:$0xff] %vm19_vm0, %v128_v19 }
  0xee   :  { %191 = shalt.err (!%p188_p4)
}
  0xef   :  { %s192_s28 = scalar_lea.hbm %s272_s3, 256 }
  0xf0   :  { %p193_p5 = scmp.ne.s32.totalorder %s272_s3, %s192_s28  ;;  %p196_p6 = scmp.lt.u32.totalorder %s192_s28, %s272_s3 }
  0xf2   :  { %p198_p7 = pnand %p196_p6, %p193_p5 }
  0xf4   :  { %201 = shalt.err (!%p198_p7)
}
  0xf5   :  { %s206_s6 = smov 128   ;;  %s207_s7 = smov 8  }
  0xf6   :  { %143 = dma.vmem_to_hbm [thread:$0]  %s138_s26, 256, %s272_s3, [#allocation4], %s206_s6, %s206_s6, %s207_s7  }
  0xf7   :  { %202 = dma.done.wait [#allocation4], 256  }
  0xf8   :  { %203 = vsyncadd [#allocation4], 4294967040 }
  0xf9   :  { %147 = vsyncpa [#allocation4], 1 }

// kernel: attention_forward.3
= control target key start
LH: loop header
LB: loop body
LE: loop exit
PB: predicated region body
PF: predicated region fallthrough
CT: control target
= control target key end

     0   :  { %7 = vsyncpa [#allocation4], 0  ;;  %s290_s0 = inlined_call_operand.hbm [shape: f32[16,32], index: 0, kind: input, shape index: {}]   ;;  %s291_s1 = inlined_call_operand.hbm [shape: f32[32,96], index: 1, kind: input, shape index: {}]   ;;  %s292_s2 = inlined_call_operand.vmem [shape: f32[16,96], index: 2, kind: output, shape index: {}]  }
   0x1   :  { %8 = vsyncpa [#allocation6], 0  ;;  %s234_s9 = smov [#allocation3]   ;;  %s186_s13 = scalar_lea.hbm %s290_s0, 256 }
   0x2   :  { %s14_s10 = sshll.u32 %s234_s9, 4  ;;  %p187_p0 = scmp.ne.s32.totalorder %s290_s0, %s186_s13  ;;  %s15_s10 = int_to_ptr.vmem [resolvable:$true] %s14_s10 }
   0x3   :  { %p190_p1 = scmp.lt.u32.totalorder %s186_s13, %s290_s0 }
   0x5   :  { %p192_p2 = pnand %p190_p1, %p187_p0 }
   0x7   :  { %195 = shalt.err (!%p192_p2)
}
   0x8   :  { %s196_s18 = scalar_lea.vmem %s15_s10, 256  ;;  %p201_p4 = scmp.lt.s32.totalorder %s15_s10, %s15_s10 }
   0x9   :  { %p197_p3 = scmp.ne.s32.totalorder %s15_s10, %s196_s18  ;;  %p202_p5 = scmp.lt.s32.totalorder %s196_s18, %s196_s18 }
   0xb   :  { %p203_p6 = por %p202_p5, %p201_p4 }
   0xd   :  { %p204_p7 = pnand %p203_p6, %p197_p3 }
   0xf   :  { %207 = shalt.err (!%p204_p7)
}
  0x10   :  { %s235_s19 = smov 128   ;;  %s236_s20 = smov 8  }
  0x11   :  { %20 = dma.hbm_to_vmem [thread:$0]  %s290_s0, 256, %s15_s10, [#allocation4], %s235_s19, %s235_s19, %s236_s20  }
  0x12   :  { %s237_s23 = smov [#allocation5]   ;;  %s208_s27 = scalar_lea.hbm %s291_s1, 512 }
  0x13   :  { %s26_s24 = sshll.u32 %s237_s23, 4  ;;  %p209_p8 = scmp.ne.s32.totalorder %s291_s1, %s208_s27  ;;  %s27_s24 = int_to_ptr.vmem [resolvable:$true] %s26_s24 }
  0x14   :  { %p212_p9 = scmp.lt.u32.totalorder %s208_s27, %s291_s1 }
  0x16   :  { %p214_p10 = pnand %p212_p9, %p209_p8 }
  0x18   :  { %217 = shalt.err (!%p214_p10)
}
  0x19   :  { %s218_s4 = scalar_lea.vmem %s27_s24, 512  ;;  %p223_p12 = scmp.lt.s32.totalorder %s27_s24, %s27_s24 }
  0x1a   :  { %p219_p11 = scmp.ne.s32.totalorder %s27_s24, %s218_s4  ;;  %p224_p13 = scmp.lt.s32.totalorder %s218_s4, %s218_s4 }
  0x1c   :  { %p225_p0 = por %p224_p13, %p223_p12 }
  0x1e   :  { %p226_p1 = pnand %p225_p0, %p219_p11 }
  0x20   :  { %229 = shalt.err (!%p226_p1)
}
  0x21   :  { %32 = dma.hbm_to_vmem [thread:$0]  %s291_s1, 512, %s27_s24, [#allocation6], %s235_s19, %s235_s19, %s236_s20  }
  0x22   :  { %230 = dma.done.wait [#allocation4], 256  }
  0x23   :  { %231 = vsyncadd [#allocation4], 4294967040 }
  0x24   :  { %232 = dma.done.wait [#allocation6], 512  }
  0x25   :  { %233 = vsyncadd [#allocation6], 4294966784  ;;  %vm43_vm0 = vcmask 785408   ;;  %v238_v0 = vmov 0.0   ;;  %vm54_vm1 = vcmask 261120   ;;  %v50_v1 = vld [vmem:[#allocation5] sm:$0xff] }
  0x26   :  { %45 = vst.msk [vmem:[#allocation2 + $0x8] sm:$0xff] %vm43_vm0, %v238_v0  ;;  %44 = vst.msk [vmem:[#allocation2] sm:$0xff] %vm43_vm0, %v238_v0  ;;  %v51_v2 = vld [vmem:[#allocation5 + $0x8] sm:$0xff]  ;;  %v52_v3 = vld [vmem:[#allocation5 + $0x10] sm:$0xff] }
  0x27   :  { %v173_v4 = vpack.c.bf16 %v51_v2, %v50_v1  ;;  %v53_v5 = vld [vmem:[#allocation5 + $0x18] sm:$0xff]  ;;  %v48_v6 = vld [vmem:[#allocation3] sm:$0xff] }
  0x28   :  { %v177_v7 = vpack.c.bf16 %v53_v5, %v52_v3  ;;  %170 = vmatprep.mubr.msk.f32.mxu0 %vm54_vm1, %v48_v6  ;;  %v49_v8 = vld [vmem:[#allocation3 + $0x8] sm:$0xff] }
  0x29   :  { %174 = vmatprep.subr.bf16.mxu0 %v173_v4 }
  0x2a   :  { %176 = vmatpush3.bf16.msra.mxu0 %v173_v4 }
  0x2b   :  { %178 = vmatprep.subr.bf16.mxu0 %v177_v7 }
  0x2d   :  { %v47_v9 = vld [vmem:[#allocation2 + $0x8] sm:$0xff]  ;;  %v46_v10 = vld [vmem:[#allocation2] sm:$0xff] }
  0x2e   :  { %180 = vmatpush3.bf16.msra.mxu0 %v177_v7 }
  0x31   :  { %171 = vmatmul.mubr.msk.f32.vlgmr.msra.gmra.mrb[0].mxu0 %vm54_vm1, %v49_v8 }
 0x104   :  { %v172_v11 = vpop.f32.mrb[0].mxu0 }
 0x105   :  { %v137_v12 = vadd.f32 %v172_v11, %v47_v9  ;;  %v127_v13 = vpop.f32.mrb[1].mxu0 }
 0x106   :  { %v136_v14 = vadd.f32 %v127_v13, %v46_v10 }
 0x107   :  { %140 = vst.msk [vmem:[#allocation2 + $0x8] sm:$0xff] %vm43_vm0, %v137_v12 }
 0x108   :  { %139 = vst.msk [vmem:[#allocation2] sm:$0xff] %vm43_vm0, %v136_v14 }
 0x10e   :  { %v145_v15 = vld [vmem:[#allocation2 + $0x8] sm:$0xff] }
 0x10f   :  { %147 = vst.msk [vmem:[%s292_s2 + $0x8] sm:$0xff] %vm43_vm0, %v145_v15  ;;  %v144_v16 = vld [vmem:[#allocation2] sm:$0xff] }
 0x110   :  { %146 = vst.msk [vmem:[%s292_s2] sm:$0xff] %vm43_vm0, %v144_v16 }
 0x111   :  { %152 = vsyncpa [#allocation4], 1 }
 0x112   :  { %153 = vsyncpa [#allocation6], 1 }

// kernel: attention_forward.4
= control target key start
LH: loop header
LB: loop body
LE: loop exit
PB: predicated region body
PF: predicated region fallthrough
CT: control target
= control target key end

     0   :  { %s3314_s12 = smov 0   ;;  %s3316_s13 = smov 0   ;;  %s4063_s0 = inlined_call_operand.vmem [shape: f32[2,8,3,8,4], index: 0, kind: input, shape index: {}, may-alias: {0,1,2}]   ;;  %s4064_s1 = inlined_call_operand.vmem [shape: f32[2,8,3,8,4], index: 1, kind: input, shape index: {}, may-alias: {0,1,2}]   ;;  %s4065_s2 = inlined_call_operand.vmem [shape: f32[2,8,3,8,4], index: 2, kind: input, shape index: {}, may-alias: {0,1,2}]   ;;  %s4066_s3 = inlined_call_operand.vmem [shape: f32[2,8,32], index: 3, kind: output, shape index: {}]  }
   0x1   :  { %s3318_s14 = smov 0   ;;  %s3320_s15 = smov 0  }
   0x2   :  { %s3322_s16 = smov 0  }
   0x3 LB: > { %s32_s17 = sadd.s32 1, %s3277_s15  ;;  %p48_p1 = scmp.ne.s32.totalorder %s3269_s13, %s3265_s12  ;;  %s3281_s16 = sphi %s3322_s16, %s13_s16   ;;  %s3277_s15 = sphi %s3320_s15, %s4071_s15   ;;  %s3273_s14 = sphi %s3318_s14, %s4070_s14   ;;  %s3269_s13 = sphi %s3316_s13, %s4069_s13   ;;  %s3265_s12 = sphi %s3314_s12, %s4068_s12  }
   0x4   : > { %p34_p0 = scmp.ge.s32.totalorder %s32_s17, 2  ;;  %p49_p2 = scmp.eq.s32.totalorder %s3281_s16, 0 }
   0x5   : > { %s41_s20 = sadd.s32 1, %s3269_s13  ;;  %p2975_p5 = scmp.ge.s32.totalorder %s3281_s16, 2 }
   0x6   : > { %s4073_s17 = smov (%p34_p0, %s32_s17), 0  ;;  %p3345_p3 = por %p49_p2, %p48_p1 }
   0x7   : > { %s36_s19 = ssub.s32 %s3277_s15, %s4073_s17  ;;  %158 = sbr.rel (%p2975_p5) target bundleno = 41 (0x29), region = 16 }
   0x8   : > { %p39_p4 = scmp.eq.s32.totalorder %s36_s19, 0 }
   0xa   : > { %s3353_s21 = scalar_select %p39_p4, %s3269_s13, %s41_s20  }
   0xe   : > { %161 = sbr.rel (!%p3345_p3) target bundleno = 23 (0x17), region = 20  ;;  %s163_s22 = sand.u32 (%p3345_p3), 1, %s3269_s13  }
   0xf   : > { %s3141_s23 = smul.u32 (%p3345_p3), 192, %s3277_s15  ;;  %s2976_s24 = sshll.u32 (%p3345_p3), %s163_s22, 6 }
  0x10   : > { %s165_s28 = scalar_lea.vmem (%p3345_p3), [#allocation6], %s2976_s24 }
  0x11   : > { %s171_s27 = scalar_lea.vmem (%p3345_p3), %s4063_s0, %s3141_s23 }
  0x12   : > { %v213_v0 = vld [vmem:[%s171_s27] sm:$0xff] (%p3345_p3)  ;;  %v215_v1 = vld [vmem:[%s171_s27 + $0x18] sm:$0xff] (%p3345_p3)  ;;  %v217_v2 = vld [vmem:[%s171_s27 + $0x30] sm:$0xff] (%p3345_p3) }
  0x13   : > { %214 = vst [vmem:[%s165_s28] sm:$0xff] (%p3345_p3), %v213_v0  ;;  %216 = vst [vmem:[%s165_s28 + $0x8] sm:$0xff] (%p3345_p3), %v215_v1  ;;  %v219_v3 = vld [vmem:[%s171_s27 + $0x48] sm:$0xff] (%p3345_p3)  ;;  %v221_v4 = vld [vmem:[%s171_s27 + $0x60] sm:$0xff] (%p3345_p3) }
  0x14   : > { %218 = vst [vmem:[%s165_s28 + $0x10] sm:$0xff] (%p3345_p3), %v217_v2  ;;  %v223_v5 = vld [vmem:[%s171_s27 + $0x78] sm:$0xff] (%p3345_p3)  ;;  %220 = vst [vmem:[%s165_s28 + $0x18] sm:$0xff] (%p3345_p3), %v219_v3  ;;  %v225_v6 = vld [vmem:[%s171_s27 + $0x90] sm:$0xff] (%p3345_p3) }
  0x15   : > { %222 = vst [vmem:[%s165_s28 + $0x20] sm:$0xff] %v221_v4  ;;  %224 = vst [vmem:[%s165_s28 + $0x28] sm:$0xff] %v223_v5  ;;  %v227_v7 = vld [vmem:[%s171_s27 + $0xa8] sm:$0xff] }
  0x16   : > { %226 = vst [vmem:[%s165_s28 + $0x30] sm:$0xff] %v225_v6  ;;  %228 = vst [vmem:[%s165_s28 + $0x38] sm:$0xff] %v227_v7 }
  0x17 PF: > { %234 = sbr.rel (!%p3345_p3) target bundleno = 32 (0x20), region = 58  ;;  %s236_s29 = sand.u32 (%p3345_p3), 1, %s3269_s13  }
  0x18   : > { %s2979_s30 = smul.u32 (%p3345_p3), 192, %s3277_s15  ;;  %s2978_s4 = sshll.u32 (%p3345_p3), %s236_s29, 6 }
  0x19   : > { %s238_s8 = scalar_lea.vmem (%p3345_p3), [#allocation7], %s2978_s4 }
  0x1a   : > { %s2883_s7 = scalar_lea.vmem (%p3345_p3), %s4064_s1, %s2979_s30 }
  0x1b   : > { %v2980_v8 = vld [vmem:[%s2883_s7 + $0x8] sm:$0xff] (%p3345_p3)  ;;  %v2981_v9 = vld [vmem:[%s2883_s7 + $0x20] sm:$0xff] (%p3345_p3)  ;;  %v2982_v10 = vld [vmem:[%s2883_s7 + $0x38] sm:$0xff] (%p3345_p3) }
  0x1c   : > { %288 = vst [vmem:[%s238_s8] sm:$0xff] (%p3345_p3), %v2980_v8  ;;  %290 = vst [vmem:[%s238_s8 + $0x8] sm:$0xff] (%p3345_p3), %v2981_v9  ;;  %v2983_v11 = vld [vmem:[%s2883_s7 + $0x50] sm:$0xff] (%p3345_p3)  ;;  %v2984_v12 = vld [vmem:[%s2883_s7 + $0x68] sm:$0xff] (%p3345_p3) }
  0x1d   : > { %292 = vst [vmem:[%s238_s8 + $0x10] sm:$0xff] (%p3345_p3), %v2982_v10  ;;  %v2985_v13 = vld [vmem:[%s2883_s7 + $0x80] sm:$0xff] (%p3345_p3)  ;;  %294 = vst [vmem:[%s238_s8 + $0x18] sm:$0xff] (%p3345_p3), %v2983_v11  ;;  %v2986_v14 = vld [vmem:[%s2883_s7 + $0x98] sm:$0xff] (%p3345_p3) }
  0x1e   : > { %296 = vst [vmem:[%s238_s8 + $0x20] sm:$0xff] %v2984_v12  ;;  %298 = vst [vmem:[%s238_s8 + $0x28] sm:$0xff] %v2985_v13  ;;  %v2987_v15 = vld [vmem:[%s2883_s7 + $0xb0] sm:$0xff] }
  0x1f   : > { %300 = vst [vmem:[%s238_s8 + $0x30] sm:$0xff] %v2986_v14  ;;  %302 = vst [vmem:[%s238_s8 + $0x38] sm:$0xff] %v2987_v15 }
  0x20 PF: > { %308 = sbr.rel (!%p3345_p3) target bundleno = 41 (0x29), region = 96  ;;  %s310_s9 = sand.u32 (%p3345_p3), 1, %s3269_s13  }
  0x21   : > { %s2989_s10 = smul.u32 (%p3345_p3), 192, %s3277_s15  ;;  %s2988_s11 = sshll.u32 (%p3345_p3), %s310_s9, 6 }
  0x22   : > { %s312_s23 = scalar_lea.vmem (%p3345_p3), [#allocation8], %s2988_s11 }
  0x23   : > { %s2891_s22 = scalar_lea.vmem (%p3345_p3), %s4065_s2, %s2989_s10 }
  0x24   : > { %v2990_v16 = vld [vmem:[%s2891_s22 + $0x10] sm:$0xff] (%p3345_p3)  ;;  %v2991_v17 = vld [vmem:[%s2891_s22 + $0x28] sm:$0xff] (%p3345_p3)  ;;  %v2992_v18 = vld [vmem:[%s2891_s22 + $0x40] sm:$0xff] (%p3345_p3) }
  0x25   : > { %362 = vst [vmem:[%s312_s23] sm:$0xff] (%p3345_p3), %v2990_v16  ;;  %364 = vst [vmem:[%s312_s23 + $0x8] sm:$0xff] (%p3345_p3), %v2991_v17  ;;  %v2993_v19 = vld [vmem:[%s2891_s22 + $0x58] sm:$0xff] (%p3345_p3)  ;;  %v2994_v20 = vld [vmem:[%s2891_s22 + $0x70] sm:$0xff] (%p3345_p3) }
  0x26   : > { %366 = vst [vmem:[%s312_s23 + $0x10] sm:$0xff] (%p3345_p3), %v2992_v18  ;;  %v2995_v21 = vld [vmem:[%s2891_s22 + $0x88] sm:$0xff] (%p3345_p3)  ;;  %368 = vst [vmem:[%s312_s23 + $0x18] sm:$0xff] (%p3345_p3), %v2993_v19  ;;  %v2996_v22 = vld [vmem:[%s2891_s22 + $0xa0] sm:$0xff] (%p3345_p3) }
  0x27   : > { %370 = vst [vmem:[%s312_s23 + $0x20] sm:$0xff] %v2994_v20  ;;  %372 = vst [vmem:[%s312_s23 + $0x28] sm:$0xff] %v2995_v21  ;;  %v2997_v23 = vld [vmem:[%s2891_s22 + $0xb8] sm:$0xff] }
  0x28   : > { %374 = vst [vmem:[%s312_s23 + $0x30] sm:$0xff] %v2996_v22  ;;  %376 = vst [vmem:[%s312_s23 + $0x38] sm:$0xff] %v2997_v23 }
  0x29 PF: > { %p2998_p6 = scmp.ge.s32.totalorder %s3281_s16, 1  ;;  %p381_p7 = scmp.lt.s32.totalorder %s3281_s16, 3 }
  0x2b   : > { %p382_p8 = pnand %p2998_p6, %p381_p7 }
  0x2c   : > { %s388_s18 = sand.u32 (!%p382_p8), 1, %s3265_s12   ;;  %v3283_v24 = vmov (!%p382_p8), 0.0   ;;  %vm466_vm0 = vcmask (!%p382_p8), 1041409   ;;  %vm469_vm1 = vcmask (!%p382_p8), 1042434   ;;  %vm487_vm2 = vcmask (!%p382_p8), 31744   ;;  %p438_p9 = scmp.lt.s32.totalorder (!%p382_p8), %s3273_s14, 1 }
  0x2d   : > { %385 = sbr.rel (%p382_p8) target bundleno = 1622 (0x656), region = 134  ;;  %3061 = vmatprep.subr.mxu0 (!%p382_p8), %v3283_v24  ;;  %s3381_s24 = sshll.u32 (!%p382_p8), %s388_s18, 6  ;;  %3066 = vmatprep.subr.mxu1 (!%p382_p8), %v3283_v24  ;;  %737 = vst.msk [vmem:[#allocation5] sm:$0xff] (!%p382_p8), %vm487_vm2, %v3283_v24  ;;  %738 = vst.msk [vmem:[#allocation5 + $0x8] sm:$0xff] (!%p382_p8), %vm487_vm2, %v3283_v24  ;;  %vm3284_vm3 = vmmov (!%p382_p8), 0   ;;  %vm472_vm4 = vcmask (!%p382_p8), 1043459  }
  0x2e   : > { %s3385_s25 = scalar_lea.vmem (!%p382_p8), [#allocation7], %s3381_s24  ;;  %739 = vst.msk [vmem:[#allocation5 + $0x10] sm:$0xff] (!%p382_p8), %vm487_vm2, %v3283_v24  ;;  %740 = vst.msk [vmem:[#allocation5 + $0x18] sm:$0xff] (!%p382_p8), %vm487_vm2, %v3283_v24  ;;  %3063 = vmatprep.mubr.msk.f32.mxu0 (!%p382_p8), %vm3284_vm3, %v3283_v24  ;;  %3068 = vmatprep.mubr.msk.f32.mxu1 (!%p382_p8), %vm3284_vm3, %v3283_v24  ;;  %vm475_vm5 = vcmask (!%p382_p8), 1044484   ;;  %s3417_s12 = scalar_lea.vmem (!%p382_p8), [#allocation6], %s3381_s24  ;;  %vm478_vm6 = vcmask (!%p382_p8), 1045509  }
  0x2f   : > { %v745_v25 = vld [vmem:[%s3385_s25] sm:$0x1] (!%p382_p8)  ;;  %v746_v26 = vld [vmem:[%s3385_s25 + $0x8] sm:$0x1] (!%p382_p8)  ;;  %v747_v27 = vld [vmem:[%s3385_s25 + $0x10] sm:$0x1] (!%p382_p8) }
  0x30   : > { %741 = vst.msk [vmem:[#allocation5 + $0x20] sm:$0xff] (!%p382_p8), %vm487_vm2, %v3283_v24  ;;  %742 = vst.msk [vmem:[#allocation5 + $0x28] sm:$0xff] (!%p382_p8), %vm487_vm2, %v3283_v24  ;;  %v748_v28 = vld [vmem:[%s3385_s25 + $0x18] sm:$0x1] (!%p382_p8)  ;;  %v749_v29 = vld [vmem:[%s3385_s25 + $0x20] sm:$0x1] (!%p382_p8) }
  0x31   : > { %743 = vst.msk [vmem:[#allocation5 + $0x30] sm:$0xff] (!%p382_p8), %vm487_vm2, %v3283_v24  ;;  %744 = vst.msk [vmem:[#allocation5 + $0x38] sm:$0xff] (!%p382_p8), %vm487_vm2, %v3283_v24  ;;  %v750_v30 = vld [vmem:[%s3385_s25 + $0x28] sm:$0x1] (!%p382_p8)  ;;  %v751_v31 = vld [vmem:[%s3385_s25 + $0x30] sm:$0x1] (!%p382_p8) }
  0x32   : > { %v770_v32 = vrot.slane (!%p382_p8), %v746_v26, 7  ;;  %v773_v33 = vrot.slane (!%p382_p8), %v747_v27, 6  ;;  %v752_v34 = vld [vmem:[%s3385_s25 + $0x38] sm:$0x1] (!%p382_p8)  ;;  %v776_v35 = vrot.slane (!%p382_p8), %v748_v28, 5  ;;  %v779_v36 = vrot.slane (!%p382_p8), %v749_v29, 4 }
  0x33   : > { %v782_v37 = vrot.slane (!%p382_p8), %v750_v30, 3  ;;  %v785_v38 = vrot.slane (!%p382_p8), %v751_v31, 2  ;;  %v449_v40 = vld [vmem:[%s3417_s12] sm:$0x1] (!%p382_p8)  ;;  %v450_v41 = vld [vmem:[%s3417_s12 + $0x8] sm:$0x1] (!%p382_p8) }
  0x34   : > { %v772_v39 = vsel %vm466_vm0, %v770_v32, %v745_v25  ;;  %v451_v42 = vld [vmem:[%s3417_s12 + $0x10] sm:$0x1]  ;;  %v452_v44 = vld [vmem:[%s3417_s12 + $0x18] sm:$0x1]  ;;  %v453_v45 = vld [vmem:[%s3417_s12 + $0x20] sm:$0x1] }
  0x35   : > { %v775_v43 = vsel %vm469_vm1, %v773_v33, %v772_v39  ;;  %v454_v46 = vld [vmem:[%s3417_s12 + $0x28] sm:$0x1]  ;;  %v788_v48 = vrot.slane %v752_v34, 1  ;;  %v455_v49 = vld [vmem:[%s3417_s12 + $0x30] sm:$0x1]  ;;  %v465_v50 = vrot.slane %v450_v41, 7 }
  0x36   : > { %v778_v47 = vsel %vm472_vm4, %v776_v35, %v775_v43  ;;  %v468_v51 = vrot.slane %v451_v42, 6  ;;  %v456_v53 = vld [vmem:[%s3417_s12 + $0x38] sm:$0x1]  ;;  %v471_v54 = vrot.slane %v452_v44, 5  ;;  %v474_v55 = vrot.slane %v453_v45, 4  ;;  %s3480_s26 = scalar_lea.vmem [#allocation8], %s3381_s24 }
  0x37   : > { %v781_v52 = vsel %vm475_vm5, %v779_v36, %v778_v47  ;;  %vm481_vm7 = vcmask 1046534   ;;  %v467_v57 = vsel %vm466_vm0, %v465_v50, %v449_v40  ;;  %v477_v58 = vrot.slane %v454_v46, 3  ;;  %v754_v14 = vld [vmem:[%s3480_s26 + $0x8] sm:$0x1]  ;;  %v755_v16 = vld [vmem:[%s3480_s26 + $0x10] sm:$0x1] }
  0x38   : > { %v784_v56 = vsel %vm478_vm6, %v782_v37, %v781_v52  ;;  %vm484_vm8 = vcmask 1047559   ;;  %v470_v60 = vsel %vm469_vm1, %v468_v51, %v467_v57  ;;  %v480_v61 = vrot.slane %v455_v49, 2  ;;  %v753_v18 = vld [vmem:[%s3480_s26] sm:$0x1]  ;;  %v756_v19 = vld [vmem:[%s3480_s26 + $0x18] sm:$0x1] }
  0x39   : > { %v787_v59 = vsel %vm481_vm7, %v785_v38, %v784_v56  ;;  %v473_v63 = vsel %vm472_vm4, %v471_v54, %v470_v60  ;;  %v483_v0 = vrot.slane %v456_v53, 1  ;;  %vm720_vm9 = vcmask 7168   ;;  %v757_v21 = vld [vmem:[%s3480_s26 + $0x20] sm:$0x1]  ;;  %v758_v25 = vld [vmem:[%s3480_s26 + $0x28] sm:$0x1] }
  0x3a   : > { %v790_v62 = vsel %vm484_vm8, %v788_v48, %v787_v59  ;;  %v476_v1 = vsel %vm475_vm5, %v474_v55, %v473_v63  ;;  %v3285_v6 = vmov -inf   ;;  %729 = vst.msk [vmem:[#allocation4] sm:$0xff] %vm720_vm9, %v3283_v24  ;;  %730 = vst.msk [vmem:[#allocation4 + $0x8] sm:$0xff] %vm720_vm9, %v3283_v24  ;;  %vm868_vm10 = vcmask 64512   ;;  %v759_v28 = vld [vmem:[%s3480_s26 + $0x30] sm:$0x1] }
  0x3b   : > { %3062 = vmatpush3.xpose.msk.msra.mxu0 %vm487_vm2, %v790_v62  ;;  %v479_v2 = vsel %vm478_vm6, %v477_v58, %v476_v1  ;;  %721 = vst.msk [vmem:[#allocation3] sm:$0xff] %vm720_vm9, %v3285_v6  ;;  %722 = vst.msk [vmem:[#allocation3 + $0x8] sm:$0xff] %vm720_vm9, %v3285_v6  ;;  %v3286_v10 = vmov 0   ;;  %v907_v17 = vrot.slane %v754_v14, 7  ;;  %v909_v20 = vrot.slane %v755_v16, 6  ;;  %s4075_s14 = smov (!%p438_p9, %s3273_s14), 1 }
  0x3c   : > { %3076 = vmatprep.subr.mxu0 %v3283_v24  ;;  %v482_v3 = vsel %vm481_vm7, %v480_v61, %v479_v2  ;;  %723 = vst.msk [vmem:[#allocation3 + $0x10] sm:$0xff] %vm720_vm9, %v3285_v6  ;;  %724 = vst.msk [vmem:[#allocation3 + $0x18] sm:$0xff] %vm720_vm9, %v3285_v6  ;;  %3193 = vset.pattern.permute.xlu0 %v3286_v10  ;;  %v911_v23 = vrot.slane %v756_v19, 5  ;;  %v913_v27 = vrot.slane %v757_v21, 4  ;;  %v760_v29 = vld [vmem:[%s3480_s26 + $0x38] sm:$0x1] }
  0x3d   : > { %v485_v4 = vsel %vm484_vm8, %v483_v0, %v482_v3  ;;  %725 = vst.msk [vmem:[#allocation3 + $0x20] sm:$0xff] %vm720_vm9, %v3285_v6  ;;  %726 = vst.msk [vmem:[#allocation3 + $0x28] sm:$0xff] %vm720_vm9, %v3285_v6  ;;  %3194 = vset.pattern.permute.xlu1 %v3286_v10  ;;  %v908_v22 = vsel %vm466_vm0, %v907_v17, %v753_v18  ;;  %v915_v31 = vrot.slane %v758_v25, 3  ;;  %v917_v33 = vrot.slane %v759_v28, 2  ;;  %v490_v35 = vld [vmem:[%s3417_s12 + $0x9] sm:$0x1] }
  0x3e   : > { %488 = vst.msk [vmem:[#allocation2] sm:$0xff] %vm487_vm2, %v485_v4  ;;  %v910_v26 = vsel %vm469_vm1, %v909_v20, %v908_v22  ;;  %v919_v34 = vrot.slane %v760_v29, 1  ;;  %v491_v36 = vld [vmem:[%s3417_s12 + $0x11] sm:$0x1]  ;;  %v489_v38 = vld [vmem:[%s3417_s12 + $0x1] sm:$0x1] }
  0x3f   : > { %727 = vst.msk [vmem:[#allocation3 + $0x30] sm:$0xff] %vm720_vm9, %v3285_v6  ;;  %728 = vst.msk [vmem:[#allocation3 + $0x38] sm:$0xff] %vm720_vm9, %v3285_v6  ;;  %v912_v30 = vsel %vm472_vm4, %v911_v23, %v910_v26  ;;  %v492_v39 = vld [vmem:[%s3417_s12 + $0x19] sm:$0x1]  ;;  %v493_v41 = vld [vmem:[%s3417_s12 + $0x21] sm:$0x1] }
  0x40   : > { %731 = vst.msk [vmem:[#allocation4 + $0x10] sm:$0xff] %vm720_vm9, %v3283_v24  ;;  %732 = vst.msk [vmem:[#allocation4 + $0x18] sm:$0xff] %vm720_vm9, %v3283_v24  ;;  %v914_v32 = vsel %vm475_vm5, %v913_v27, %v912_v30  ;;  %v505_v42 = vrot.slane %v490_v35, 7  ;;  %v494_v44 = vld [vmem:[%s3417_s12 + $0x29] sm:$0x1]  ;;  %v507_v45 = vrot.slane %v491_v36, 6 }
  0x41   : > { %733 = vst.msk [vmem:[#allocation4 + $0x20] sm:$0xff] %vm720_vm9, %v3283_v24  ;;  %734 = vst.msk [vmem:[#allocation4 + $0x28] sm:$0xff] %vm720_vm9, %v3283_v24  ;;  %v916_v37 = vsel %vm478_vm6, %v915_v31, %v914_v32  ;;  %v495_v46 = vld [vmem:[%s3417_s12 + $0x31] sm:$0x1]  ;;  %v509_v48 = vrot.slane %v492_v39, 5  ;;  %v511_v51 = vrot.slane %v493_v41, 4 }
  0x42   : > { %735 = vst.msk [vmem:[#allocation4 + $0x30] sm:$0xff] %vm720_vm9, %v3283_v24  ;;  %736 = vst.msk [vmem:[#allocation4 + $0x38] sm:$0xff] %vm720_vm9, %v3283_v24  ;;  %v3474_v11 = vld [vmem:[#allocation3] sm:$0xff]  ;;  %v918_v40 = vsel %vm481_vm7, %v917_v33, %v916_v37  ;;  %v506_v47 = vsel %vm466_vm0, %v505_v42, %v489_v38  ;;  %v496_v49 = vld [vmem:[%s3417_s12 + $0x39] sm:$0x1]  ;;  %v513_v53 = vrot.slane %v494_v44, 3 }
  0x43   : > { %v920_v43 = vsel %vm484_vm8, %v919_v34, %v918_v40  ;;  %v508_v50 = vsel %vm469_vm1, %v507_v45, %v506_v47  ;;  %v515_v55 = vrot.slane %v495_v46, 2  ;;  %v517_v57 = vrot.slane %v496_v49, 1  ;;  %v522_v60 = vld [vmem:[%s3417_s12 + $0x2] sm:$0x1]  ;;  %v523_v61 = vld [vmem:[%s3417_s12 + $0xa] sm:$0x1] }
  0x44   : > { %3067 = vmatpush3.msra.mxu1 %v920_v43  ;;  %v510_v52 = vsel %vm472_vm4, %v509_v48, %v508_v50  ;;  %v524_v62 = vld [vmem:[%s3417_s12 + $0x12] sm:$0x1]  ;;  %v525_v63 = vld [vmem:[%s3417_s12 + $0x1a] sm:$0x1]  ;;  %v538_v0 = vrot.slane %v523_v61, 7  ;;  %s3002_s27 = sshll.u32 %s4075_s14, 3 }
  0x45   : > { %v761_v5 = vld [vmem:[#allocation2] sm:$0xff]  ;;  %3071 = vmatprep.subr.mxu1 %v3283_v24  ;;  %v512_v54 = vsel %vm475_vm5, %v511_v51, %v510_v52  ;;  %v527_v2 = vld [vmem:[%s3417_s12 + $0x2a] sm:$0x1]  ;;  %v528_v3 = vld [vmem:[%s3417_s12 + $0x32] sm:$0x1]  ;;  %v540_v6 = vrot.slane %v524_v62, 6  ;;  %s4028_s30 = scalar_lea.vmem %s4066_s3, %s3002_s27 }
  0x46   : > { %3064 = vmatmul.mubr.msk.f32.vlgmr.msra.gmra.mrb[0].mxu0 %vm487_vm2, %v761_v5  ;;  %v514_v56 = vsel %vm478_vm6, %v513_v53, %v512_v54  ;;  %v526_v1 = vld [vmem:[%s3417_s12 + $0x22] sm:$0x1]  ;;  %v529_v4 = vld [vmem:[%s3417_s12 + $0x3a] sm:$0x1]  ;;  %v539_v5 = vsel %vm466_vm0, %v538_v0, %v522_v60  ;;  %v546_v10 = vrot.slane %v527_v2, 3  ;;  %v548_v14 = vrot.slane %v528_v3, 2 }
  0x47   : > { %3078 = vmatprep.mubr.msk.f32.mxu0 %vm3284_vm3, %v3283_v24  ;;  %v516_v58 = vsel %vm481_vm7, %v515_v55, %v514_v56  ;;  %v550_v17 = vrot.slane %v529_v4, 1  ;;  %v555_v21 = vld [vmem:[%s3417_s12 + $0x3] sm:$0x1]  ;;  %v556_v22 = vld [vmem:[%s3417_s12 + $0xb] sm:$0x1]  ;;  %s3287_s14 = smov 4  }
  0x48   : > { %v518_v59 = vsel %vm484_vm8, %v517_v57, %v516_v58  ;;  %v557_v23 = vld [vmem:[%s3417_s12 + $0x13] sm:$0x1]  ;;  %v558_v26 = vld [vmem:[%s3417_s12 + $0x1b] sm:$0x1]  ;;  %v559_v27 = vld [vmem:[%s3417_s12 + $0x23] sm:$0x1] }
  0x49   : > { %521 = vst.msk [vmem:[#allocation2 + $0x8] sm:$0xff] %vm487_vm2, %v518_v59  ;;  %v560_v28 = vld [vmem:[%s3417_s12 + $0x2b] sm:$0x1]  ;;  %v561_v29 = vld [vmem:[%s3417_s12 + $0x33] sm:$0x1]  ;;  %v571_v30 = vrot.slane %v556_v22, 7 }
  0x4a   : > { %v573_v31 = vrot.slane %v557_v23, 6  ;;  %v562_v32 = vld [vmem:[%s3417_s12 + $0x3b] sm:$0x1]  ;;  %v575_v33 = vrot.slane %v558_v26, 5  ;;  %v577_v34 = vrot.slane %v559_v27, 4  ;;  %v579_v36 = vrot.slane %v560_v28, 3 }
  0x4b   : > { %v572_v35 = vsel %vm466_vm0, %v571_v30, %v555_v21  ;;  %v581_v38 = vrot.slane %v561_v29, 2  ;;  %v583_v40 = vrot.slane %v562_v32, 1  ;;  %v588_v43 = vld [vmem:[%s3417_s12 + $0x4] sm:$0x1]  ;;  %v589_v44 = vld [vmem:[%s3417_s12 + $0xc] sm:$0x1] }
  0x4c   : > { %v574_v37 = vsel %vm469_vm1, %v573_v31, %v572_v35  ;;  %v590_v45 = vld [vmem:[%s3417_s12 + $0x14] sm:$0x1]  ;;  %v591_v47 = vld [vmem:[%s3417_s12 + $0x1c] sm:$0x1]  ;;  %v592_v48 = vld [vmem:[%s3417_s12 + $0x24] sm:$0x1] }
  0x4d   : > { %v576_v39 = vsel %vm472_vm4, %v575_v33, %v574_v37  ;;  %v604_v49 = vrot.slane %v589_v44, 7  ;;  %v593_v51 = vld [vmem:[%s3417_s12 + $0x2c] sm:$0x1]  ;;  %v594_v52 = vld [vmem:[%s3417_s12 + $0x34] sm:$0x1]  ;;  %v606_v55 = vrot.slane %v590_v45, 6 }
  0x4e   : > { %v578_v41 = vsel %vm475_vm5, %v577_v34, %v576_v39  ;;  %v595_v53 = vld [vmem:[%s3417_s12 + $0x3c] sm:$0x1]  ;;  %v608_v56 = vrot.slane %v591_v47, 5  ;;  %v610_v57 = vrot.slane %v592_v48, 4  ;;  %v612_v58 = vrot.slane %v593_v51, 3  ;;  %s3288_s4 = smov 8  }
  0x4f   : > { %v580_v42 = vsel %vm478_vm6, %v579_v36, %v578_v41  ;;  %v605_v54 = vsel %vm466_vm0, %v604_v49, %v588_v43  ;;  %v614_v60 = vrot.slane %v594_v52, 2  ;;  %v616_v62 = vrot.slane %v595_v53, 1  ;;  %v622_v0 = vld [vmem:[%s3417_s12 + $0xd] sm:$0x1]  ;;  %v621_v2 = vld [vmem:[%s3417_s12 + $0x5] sm:$0x1] }
  0x50   : > { %v582_v46 = vsel %vm481_vm7, %v581_v38, %v580_v42  ;;  %v607_v59 = vsel %vm469_vm1, %v606_v55, %v605_v54  ;;  %v623_v3 = vld [vmem:[%s3417_s12 + $0x15] sm:$0x1]  ;;  %v655_v28 = vld [vmem:[%s3417_s12 + $0xe] sm:$0x1]  ;;  %v654_v30 = vld [vmem:[%s3417_s12 + $0x6] sm:$0x1] }
  0x51   : > { %v584_v50 = vsel %vm484_vm8, %v583_v40, %v582_v46  ;;  %v609_v61 = vsel %vm472_vm4, %v608_v56, %v607_v59  ;;  %v656_v31 = vld [vmem:[%s3417_s12 + $0x16] sm:$0x1]  ;;  %v657_v33 = vld [vmem:[%s3417_s12 + $0x1e] sm:$0x1]  ;;  %v658_v34 = vld [vmem:[%s3417_s12 + $0x26] sm:$0x1] }
  0x52   : > { %587 = vst.msk [vmem:[#allocation2 + $0x18] sm:$0xff] %vm487_vm2, %v584_v50  ;;  %v670_v35 = vrot.slane %v655_v28, 7  ;;  %v659_v36 = vld [vmem:[%s3417_s12 + $0x2e] sm:$0x1]  ;;  %v660_v37 = vld [vmem:[%s3417_s12 + $0x36] sm:$0x1] }
  0x53   : > { %v672_v38 = vrot.slane %v656_v31, 6  ;;  %v661_v39 = vld [vmem:[%s3417_s12 + $0x3e] sm:$0x1]  ;;  %v674_v41 = vrot.slane %v657_v33, 5  ;;  %v676_v42 = vrot.slane %v658_v34, 4  ;;  %v678_v44 = vrot.slane %v659_v36, 3 }
  0x54   : > { %v671_v40 = vsel %vm466_vm0, %v670_v35, %v654_v30  ;;  %v680_v45 = vrot.slane %v660_v37, 2  ;;  %v682_v47 = vrot.slane %v661_v39, 1  ;;  %v688_v51 = vld [vmem:[%s3417_s12 + $0xf] sm:$0x1]  ;;  %v689_v52 = vld [vmem:[%s3417_s12 + $0x17] sm:$0x1] }
  0x55   : > { %v673_v43 = vsel %vm469_vm1, %v672_v38, %v671_v40  ;;  %v690_v54 = vld [vmem:[%s3417_s12 + $0x1f] sm:$0x1]  ;;  %v691_v55 = vld [vmem:[%s3417_s12 + $0x27] sm:$0x1]  ;;  %v703_v59 = vrot.slane %v688_v51, 7  ;;  %s3289_s5 = smov 12  }
  0x56   : > { %v675_v46 = vsel %vm472_vm4, %v674_v41, %v673_v43  ;;  %v687_v56 = vld [vmem:[%s3417_s12 + $0x7] sm:$0x1]  ;;  %v1248_v30 = vld [vmem:[%s3385_s25 + $0x1a] sm:$0x1]  ;;  %v1494_v33 = vld [vmem:[%s3385_s25 + $0x13] sm:$0x1] }
  0x57   : > { %v677_v48 = vsel %vm475_vm5, %v676_v42, %v675_v46  ;;  %v1003_v36 = vld [vmem:[%s3385_s25 + $0x29] sm:$0x1]  ;;  %v1492_v38 = vld [vmem:[%s3385_s25 + $0x3] sm:$0x1]  ;;  %v1249_v41 = vld [vmem:[%s3385_s25 + $0x22] sm:$0x1] }
  0x58   : > { %v679_v49 = vsel %vm478_vm6, %v678_v44, %v677_v48  ;;  %v1275_v42 = vrot.slane %v1248_v30, 5  ;;  %v1740_v43 = vld [vmem:[%s3385_s25 + $0xc] sm:$0x1]  ;;  %v1004_v44 = vld [vmem:[%s3385_s25 + $0x31] sm:$0x1]  ;;  %s3290_s6 = smov 16  }
  0x59   : > { %v681_v50 = vsel %vm481_vm7, %v680_v45, %v679_v49  ;;  %v1495_v46 = vld [vmem:[%s3385_s25 + $0x1b] sm:$0x1]  ;;  %v1032_v49 = vrot.slane %v1003_v36, 3  ;;  %s3291_s7 = smov 20   ;;  %s3292_s8 = smov 24   ;;  %vm2753_vm11 = vcmask 64544  }
  0x5a   : > { %v683_v53 = vsel %vm484_vm8, %v682_v47, %v681_v50  ;;  %v1520_v47 = vrot.slane %v1494_v33, 6  ;;  %v1250_v50 = vld [vmem:[%s3385_s25 + $0x2a] sm:$0x1]  ;;  %v2235_v33 = vld [vmem:[%s3385_s25 + $0x16] sm:$0x1]  ;;  %vm2768_vm12 = vcmask 97344  }
  0x5b   : > { %686 = vst.msk [vmem:[#allocation2 + $0x30] sm:$0xff] %vm487_vm2, %v683_v53  ;;  %v1496_v53 = vld [vmem:[%s3385_s25 + $0x23] sm:$0x1]  ;;  %vm2783_vm13 = vcmask 130144   ;;  %vm2798_vm14 = vcmask 162944   ;;  %vm2813_vm15 = vcmask 195744  }
  0x5c   : > { %s3293_s9 = smov 28  }
 0x119   : > { %v3470_v7 = vpop.f32.mrb[0].mxu0 }
 0x11a   : > { %v3065_v8 = vpop.f32.mrb[1].mxu0  ;;  %v869_v9 = vsel %vm868_vm10, %v3470_v7, -inf }
 0x11b   : > { %870 = vmax.xlane.f32.xlu0 %v869_v9  ;;  %v542_v8 = vrot.slane %v525_v63, 5  ;;  %v544_v9 = vrot.slane %v526_v1, 4  ;;  %v611_v63 = vsel %vm475_vm5, %v610_v57, %v609_v61  ;;  %v692_v57 = vld [vmem:[%s3417_s12 + $0x2f] sm:$0x1]  ;;  %v707_v61 = vrot.slane %v690_v54, 5 }
 0x11c   : > { %v613_v1 = vsel %vm478_vm6, %v612_v58, %v611_v63  ;;  %v693_v58 = vld [vmem:[%s3417_s12 + $0x37] sm:$0x1]  ;;  %v709_v63 = vrot.slane %v691_v55, 4  ;;  %v1741_v54 = vld [vmem:[%s3385_s25 + $0x14] sm:$0x1]  ;;  %v1765_v55 = vrot.slane %v1740_v43, 7 }
 0x11d   : > { %v615_v4 = vsel %vm481_vm7, %v614_v60, %v613_v1  ;;  %v705_v60 = vrot.slane %v689_v52, 6  ;;  %v711_v1 = vrot.slane %v692_v57, 3  ;;  %v1277_v52 = vrot.slane %v1249_v41, 4  ;;  %v1499_v41 = vld [vmem:[%s3385_s25 + $0x3b] sm:$0x1] }
 0x11e   : > { %v1522_v57 = vrot.slane %v1495_v46, 5  ;;  %v1990_v43 = vld [vmem:[%s3385_s25 + $0x25] sm:$0x1] }
 0x1a8   : > { %v871_v12 = vpop.xlane.xlu0 %870 }
 0x1a9   : > { %v3477_v13 = vmax.f32 %v3474_v11, %v871_v12  ;;  %v541_v12 = vsel %vm469_vm1, %v540_v6, %v539_v5  ;;  %v624_v5 = vld [vmem:[%s3417_s12 + $0x1d] sm:$0x1]  ;;  %v625_v6 = vld [vmem:[%s3417_s12 + $0x25] sm:$0x1] }
 0x1aa   : > { %v543_v16 = vsel %vm472_vm4, %v542_v8, %v541_v12  ;;  %v637_v8 = vrot.slane %v622_v0, 7  ;;  %v627_v12 = vld [vmem:[%s3417_s12 + $0x35] sm:$0x1]  ;;  %v704_v0 = vsel %vm466_vm0, %v703_v59, %v687_v56  ;;  %v1987_v59 = vld [vmem:[%s3385_s25 + $0xd] sm:$0x1] }
 0x1ab   : > { %v873_v15 = vsub.f32 %v3474_v11, %v3477_v13  ;;  %997 = vst.msk [vmem:[#allocation3] sm:$0xff] %vm720_vm9, %v3477_v13  ;;  %878 = vperm.xlu0 %3193, %v3477_v13   ;;  %v545_v18 = vsel %vm475_vm5, %v544_v9, %v543_v16  ;;  %v617_v9 = vsel %vm484_vm8, %v616_v62, %v615_v4  ;;  %v628_v16 = vld [vmem:[%s3417_s12 + $0x3d] sm:$0x1]  ;;  %v647_v22 = vrot.slane %v627_v12, 2  ;;  %v694_v62 = vld [vmem:[%s3417_s12 + $0x3f] sm:$0x1] }
 0x1ac   : > { %v547_v19 = vsel %vm478_vm6, %v546_v10, %v545_v18  ;;  %v626_v10 = vld [vmem:[%s3417_s12 + $0x2d] sm:$0x1]  ;;  %620 = vst.msk [vmem:[#allocation2 + $0x20] sm:$0xff] %vm487_vm2, %v617_v9  ;;  %v641_v18 = vrot.slane %v624_v5, 5  ;;  %v715_v5 = vrot.slane %v694_v62, 1 }
 0x1ad   : > { %v549_v20 = vsel %vm481_vm7, %v548_v14, %v547_v19  ;;  %v639_v14 = vrot.slane %v623_v3, 6  ;;  %v643_v19 = vrot.slane %v625_v6, 4  ;;  %v645_v21 = vrot.slane %v626_v10, 3  ;;  %v999_v12 = vld [vmem:[%s3385_s25 + $0x9] sm:$0x1] }
 0x1ae   : > { %v551_v25 = vsel %vm484_vm8, %v550_v17, %v549_v20  ;;  %v638_v17 = vsel %vm466_vm0, %v637_v8, %v621_v2  ;;  %v706_v2 = vsel %vm469_vm1, %v705_v60, %v704_v0  ;;  %v713_v3 = vrot.slane %v693_v58, 2  ;;  %v1739_v58 = vld [vmem:[%s3385_s25 + $0x4] sm:$0x1]  ;;  %v1005_v60 = vld [vmem:[%s3385_s25 + $0x39] sm:$0x1] }
 0x1af   : > { %554 = vst.msk [vmem:[#allocation2 + $0x10] sm:$0xff] %vm487_vm2, %v551_v25  ;;  %v640_v20 = vsel %vm469_vm1, %v639_v14, %v638_v17  ;;  %v649_v25 = vrot.slane %v628_v16, 1  ;;  %v708_v4 = vsel %vm472_vm4, %v707_v61, %v706_v2  ;;  %v1000_v14 = vld [vmem:[%s3385_s25 + $0x11] sm:$0x1]  ;;  %v1024_v16 = vrot.slane %v999_v12, 7 }
 0x1b0   : > { %v642_v23 = vsel %vm472_vm4, %v641_v18, %v640_v20  ;;  %v710_v6 = vsel %vm475_vm5, %v709_v63, %v708_v4  ;;  %v998_v17 = vld [vmem:[%s3385_s25 + $0x1] sm:$0x1]  ;;  %v1246_v18 = vld [vmem:[%s3385_s25 + $0xa] sm:$0x1]  ;;  %v1026_v20 = vrot.slane %v1000_v14, 6  ;;  %v1034_v61 = vrot.slane %v1004_v44, 2 }
 0x1b1   : > { %v644_v26 = vsel %vm475_vm5, %v643_v19, %v642_v23  ;;  %v712_v8 = vsel %vm478_vm6, %v711_v1, %v710_v6  ;;  %v1001_v19 = vld [vmem:[%s3385_s25 + $0x19] sm:$0x1]  ;;  %v1271_v23 = vrot.slane %v1246_v18, 7  ;;  %v1251_v0 = vld [vmem:[%s3385_s25 + $0x32] sm:$0x1]  ;;  %v1279_v1 = vrot.slane %v1250_v50, 3 }
 0x1b2   : > { %v646_v27 = vsel %vm478_vm6, %v645_v21, %v644_v26  ;;  %v714_v9 = vsel %vm481_vm7, %v713_v3, %v712_v8  ;;  %v1025_v21 = vsel %vm466_vm0, %v1024_v16, %v998_v17  ;;  %v1493_v26 = vld [vmem:[%s3385_s25 + $0xb] sm:$0x1]  ;;  %v1028_v28 = vrot.slane %v1001_v19, 5  ;;  %v1742_v2 = vld [vmem:[%s3385_s25 + $0x1c] sm:$0x1] }
 0x1b3   : > { %v648_v29 = vsel %vm481_vm7, %v647_v22, %v646_v27  ;;  %v716_v10 = vsel %vm484_vm8, %v715_v5, %v714_v9  ;;  %v1247_v22 = vld [vmem:[%s3385_s25 + $0x12] sm:$0x1]  ;;  %v1002_v27 = vld [vmem:[%s3385_s25 + $0x21] sm:$0x1]  ;;  %v1518_v34 = vrot.slane %v1493_v26, 7  ;;  %v1767_v3 = vrot.slane %v1741_v54, 6 }
 0x1b4   : > { %v650_v32 = vsel %vm484_vm8, %v649_v25, %v648_v29  ;;  %719 = vst.msk [vmem:[#allocation2 + $0x38] sm:$0xff] %vm487_vm2, %v716_v10  ;;  %v1245_v25 = vld [vmem:[%s3385_s25 + $0x2] sm:$0x1]  ;;  %v1027_v29 = vsel %vm469_vm1, %v1026_v20, %v1025_v21  ;;  %v1273_v31 = vrot.slane %v1247_v22, 6  ;;  %v1030_v37 = vrot.slane %v1002_v27, 4 }
 0x1b5   : > { %653 = vst.msk [vmem:[#allocation2 + $0x28] sm:$0xff] %vm487_vm2, %v650_v32  ;;  %v1272_v32 = vsel %vm466_vm0, %v1271_v23, %v1245_v25  ;;  %v1029_v40 = vsel %vm472_vm4, %v1028_v28, %v1027_v29  ;;  %v1497_v5 = vld [vmem:[%s3385_s25 + $0x2b] sm:$0x1]  ;;  %v1524_v6 = vrot.slane %v1496_v53, 4  ;;  %v1766_v8 = vsel %vm466_vm0, %v1765_v55, %v1739_v58  ;;  %v1988_v9 = vld [vmem:[%s3385_s25 + $0x15] sm:$0x1] }
 0x1b6   : > { %v1274_v45 = vsel %vm469_vm1, %v1273_v31, %v1272_v32  ;;  %v1031_v51 = vsel %vm475_vm5, %v1030_v37, %v1029_v40  ;;  %v2012_v10 = vrot.slane %v1987_v59, 7  ;;  %v1036_v12 = vrot.slane %v1005_v60, 1  ;;  %v1986_v16 = vld [vmem:[%s3385_s25 + $0x5] sm:$0x1]  ;;  %v2234_v17 = vld [vmem:[%s3385_s25 + $0xe] sm:$0x1] }
 0x1b7   : > { %v1276_v56 = vsel %vm472_vm4, %v1275_v42, %v1274_v45  ;;  %v1033_v63 = vsel %vm478_vm6, %v1032_v49, %v1031_v51  ;;  %v1252_v19 = vld [vmem:[%s3385_s25 + $0x3a] sm:$0x1]  ;;  %v1281_v20 = vrot.slane %v1251_v0, 2  ;;  %v1743_v21 = vld [vmem:[%s3385_s25 + $0x24] sm:$0x1]  ;;  %v1769_v22 = vrot.slane %v1742_v2, 5 }
 0x1b8   : > { %v1278_v4 = vsel %vm475_vm5, %v1277_v52, %v1276_v56  ;;  %v1035_v18 = vsel %vm481_vm7, %v1034_v61, %v1033_v63  ;;  %v1498_v25 = vld [vmem:[%s3385_s25 + $0x33] sm:$0x1]  ;;  %v1526_v26 = vrot.slane %v1497_v5, 3  ;;  %v1768_v27 = vsel %vm469_vm1, %v1767_v3, %v1766_v8  ;;  %v1989_v28 = vld [vmem:[%s3385_s25 + $0x1d] sm:$0x1]  ;;  %v1015_v56 = vld [vmem:[#allocation2 + $0x8] sm:$0xff] }
 0x1b9   : > { %v1280_v23 = vsel %vm478_vm6, %v1279_v1, %v1278_v4  ;;  %v2014_v29 = vrot.slane %v1988_v9, 6  ;;  %v1744_v31 = vld [vmem:[%s3385_s25 + $0x2c] sm:$0x1]  ;;  %v2013_v32 = vsel %vm466_vm0, %v2012_v10, %v1986_v16  ;;  %v1771_v36 = vrot.slane %v1743_v21, 4  ;;  %v2233_v37 = vld [vmem:[%s3385_s25 + $0x6] sm:$0x1] }
 0x1ba   : > { %v1283_v40 = vrot.slane %v1252_v19, 1  ;;  %v1770_v42 = vsel %vm472_vm4, %v1769_v22, %v1768_v27  ;;  %v2016_v44 = vrot.slane %v1989_v28, 5  ;;  %v2236_v50 = vld [vmem:[%s3385_s25 + $0x1e] sm:$0x1]  ;;  %v1773_v52 = vrot.slane %v1744_v31, 3  ;;  %v1262_v16 = vld [vmem:[#allocation2 + $0x10] sm:$0xff] }
 0x1bb   : > { %v2015_v49 = vsel %vm469_vm1, %v2014_v29, %v2013_v32  ;;  %v2482_v54 = vld [vmem:[%s3385_s25 + $0x17] sm:$0x1]  ;;  %v1991_v58 = vld [vmem:[%s3385_s25 + $0x2d] sm:$0x1]  ;;  %v2018_v59 = vrot.slane %v1990_v43, 4  ;;  %v2263_v1 = vrot.slane %v2236_v50, 5 }
 0x1bc   : > { %v2480_v60 = vld [vmem:[%s3385_s25 + $0x7] sm:$0x1]  ;;  %v2017_v63 = vsel %vm472_vm4, %v2016_v44, %v2015_v49  ;;  %v2237_v0 = vld [vmem:[%s3385_s25 + $0x26] sm:$0x1]  ;;  %v1746_v3 = vld [vmem:[%s3385_s25 + $0x3c] sm:$0x1] }
 0x1bd   : > { %v2508_v8 = vrot.slane %v2482_v54, 6  ;;  %v1992_v10 = vld [vmem:[%s3385_s25 + $0x35] sm:$0x1]  ;;  %v2265_v19 = vrot.slane %v2237_v0, 4  ;;  %v1777_v21 = vrot.slane %v1746_v3, 1 }
 0x1be   : > { %v1993_v27 = vld [vmem:[%s3385_s25 + $0x3d] sm:$0x1]  ;;  %v2022_v28 = vrot.slane %v1992_v10, 2  ;;  %v2239_v31 = vld [vmem:[%s3385_s25 + $0x36] sm:$0x1] }
 0x1bf   : > { %v2486_v44 = vld [vmem:[%s3385_s25 + $0x37] sm:$0x1] }
 0x22a   : > { %v879_v35 = vpop.permute.xlu0 %878 }
 0x22b   : > { %v881_v39 = vsub.f32 %v3470_v7, %v879_v35  ;;  %v1519_v7 = vsel %vm466_vm0, %v1518_v34, %v1492_v38  ;;  %v2259_v34 = vrot.slane %v2234_v17, 7  ;;  %v1037_v35 = vsel %vm484_vm8, %v1036_v12, %v1035_v18  ;;  %v2481_v38 = vld [vmem:[%s3385_s25 + $0xf] sm:$0x1]  ;;  %v2238_v18 = vld [vmem:[%s3385_s25 + $0x2e] sm:$0x1] }
 0x22c   : > { %v1521_v62 = vsel %vm469_vm1, %v1520_v47, %v1519_v7  ;;  %v1528_v47 = vrot.slane %v1498_v25, 2  ;;  %v2261_v7 = vrot.slane %v2235_v33, 6  ;;  %v2506_v55 = vrot.slane %v2481_v38, 7  ;;  %v1509_v33 = vld [vmem:[#allocation2 + $0x18] sm:$0xff] }
 0x22d   : > { %v882_v48 = vmul.f32 1.442695, %v881_v39  ;;  %v1523_v14 = vsel %vm472_vm4, %v1522_v57, %v1521_v62  ;;  %v1282_v39 = vsel %vm481_vm7, %v1281_v20, %v1280_v23  ;;  %v2260_v53 = vsel %vm466_vm0, %v2259_v34, %v2233_v37  ;;  %v2484_v23 = vld [vmem:[%s3385_s25 + $0x27] sm:$0x1] }
 0x22e   : > { %v1525_v30 = vsel %vm475_vm5, %v1524_v6, %v1523_v14  ;;  %v1772_v57 = vsel %vm475_vm5, %v1771_v36, %v1770_v42  ;;  %v1284_v61 = vsel %vm484_vm8, %v1283_v40, %v1282_v39  ;;  %v1530_v62 = vrot.slane %v1499_v41, 1  ;;  %v2483_v6 = vld [vmem:[%s3385_s25 + $0x1f] sm:$0x1]  ;;  %v2240_v41 = vld [vmem:[%s3385_s25 + $0x3e] sm:$0x1] }
 0x22f   : > { %3195 = vpow2.f32 %v882_v48  ;;  %v1527_v46 = vsel %vm478_vm6, %v1526_v26, %v1525_v30  ;;  %v1745_v48 = vld [vmem:[%s3385_s25 + $0x34] sm:$0x1]  ;;  %v2262_v5 = vsel %vm469_vm1, %v2261_v7, %v2260_v53  ;;  %v1774_v9 = vsel %vm478_vm6, %v1773_v52, %v1772_v57  ;;  %v2487_v7 = vld [vmem:[%s3385_s25 + $0x3f] sm:$0x1]  ;;  %v2003_v53 = vld [vmem:[#allocation2 + $0x28] sm:$0xff] }
 0x230   : > { %v1529_v2 = vsel %vm481_vm7, %v1528_v47, %v1527_v46  ;;  %v1775_v4 = vrot.slane %v1745_v48, 2  ;;  %v2020_v12 = vrot.slane %v1991_v58, 3  ;;  %v2507_v14 = vsel %vm466_vm0, %v2506_v55, %v2480_v60  ;;  %v1756_v46 = vld [vmem:[#allocation2 + $0x20] sm:$0xff]  ;;  %v2250_v57 = vld [vmem:[#allocation2 + $0x30] sm:$0xff] }
 0x231   : > { %v2019_v17 = vsel %vm475_vm5, %v2018_v59, %v2017_v63  ;;  %v1531_v20 = vsel %vm484_vm8, %v1530_v62, %v1529_v2  ;;  %v2264_v22 = vsel %vm472_vm4, %v2263_v1, %v2262_v5  ;;  %v2510_v25 = vrot.slane %v2483_v6, 5  ;;  %v2497_v59 = vld [vmem:[#allocation2 + $0x38] sm:$0xff]  ;;  %v884_v62 = vld [vmem:[#allocation4] sm:$0xff] }
 0x232   : > { %v1776_v26 = vsel %vm481_vm7, %v1775_v4, %v1774_v9  ;;  %v2509_v29 = vsel %vm469_vm1, %v2508_v8, %v2507_v14  ;;  %v2021_v30 = vsel %vm478_vm6, %v2020_v12, %v2019_v17  ;;  %v2267_v32 = vrot.slane %v2238_v18, 3 }
 0x233   : > { %v2266_v34 = vsel %vm475_vm5, %v2265_v19, %v2264_v22  ;;  %v2512_v36 = vrot.slane %v2484_v23, 4  ;;  %v1778_v37 = vsel %vm484_vm8, %v1777_v21, %v1776_v26  ;;  %v2024_v38 = vrot.slane %v1993_v27, 1  ;;  %v1114_v27 = vld [vmem:[#allocation3 + $0x8] sm:$0xff] }
 0x234   : > { %v2511_v39 = vsel %vm472_vm4, %v2510_v25, %v2509_v29  ;;  %v2023_v40 = vsel %vm481_vm7, %v2022_v28, %v2021_v30  ;;  %v2269_v42 = vrot.slane %v2239_v31, 2  ;;  %v2268_v43 = vsel %vm478_vm6, %v2267_v32, %v2266_v34  ;;  %v1361_v30 = vld [vmem:[#allocation3 + $0x10] sm:$0xff] }
 0x235   : > { %v2513_v47 = vsel %vm475_vm5, %v2512_v36, %v2511_v39  ;;  %v2025_v48 = vsel %vm484_vm8, %v2024_v38, %v2023_v40  ;;  %v2271_v49 = vrot.slane %v2240_v41, 1  ;;  %v2518_v55 = vrot.slane %v2487_v7, 1  ;;  %v1007_v38 = vld [vmem:[%s3480_s26 + $0x9] sm:$0x1]  ;;  %v1008_v40 = vld [vmem:[%s3480_s26 + $0x11] sm:$0x1] }
 0x236   : > { %v2270_v50 = vsel %vm481_vm7, %v2269_v42, %v2268_v43  ;;  %v874_v60 = vmul.f32 1.442695, %v873_v15  ;;  %v1154_v41 = vrot.slane %v1007_v38, 7  ;;  %v3800_v42 = vld [vmem:[#allocation3 + $0x20] sm:$0xff] }
 0x237   : > { %v2272_v54 = vsel %vm484_vm8, %v2271_v49, %v2270_v50  ;;  %v1006_v43 = vld [vmem:[%s3480_s26 + $0x1] sm:$0x1] }
 0x238   : > { %3197 = vpow2.f32 %v874_v60 }
 0x239   : > { %v3196_v45 = vpop.eup %3195 }
 0x23a   : > { %3069 = vmatmul.mubr.msk.f32.vlgmr.msra.gmra.mrb[0].mxu1 %vm868_vm10, %v3196_v45  ;;  %v886_v51 = vsel %vm868_vm10, %v3196_v45, 0.0 }
 0x23b   : > { %3072 = vmatpush3.xpose.msk.msra.mxu1 %vm487_vm2, %v1037_v35  ;;  %887 = vadd.xlane.f32.xlu1 %v886_v51  ;;  %v2485_v35 = vld [vmem:[%s3385_s25 + $0x2f] sm:$0x1]  ;;  %v2516_v51 = vrot.slane %v2486_v44, 2  ;;  %v1009_v44 = vld [vmem:[%s3480_s26 + $0x19] sm:$0x1] }
 0x23c   : > { %3073 = vmatprep.mubr.msk.f32.mxu1 %vm3284_vm3, %v3283_v24  ;;  %3081 = vmatprep.subr.mxu1 %v3283_v24  ;;  %v2514_v45 = vrot.slane %v2485_v35, 3  ;;  %v3792_v35 = vld [vmem:[#allocation3 + $0x18] sm:$0xff]  ;;  %v1158_v49 = vrot.slane %v1009_v44, 5 }
 0x23e   : > { %3074 = vmatmul.mubr.msk.f32.vlgmr.msra.gmra.mrb[2].mxu1 %vm487_vm2, %v1015_v56  ;;  %v2515_v52 = vsel %vm478_vm6, %v2514_v45, %v2513_v47  ;;  %v1156_v45 = vrot.slane %v1008_v40, 6  ;;  %v1010_v47 = vld [vmem:[%s3480_s26 + $0x21] sm:$0x1]  ;;  %v1502_v40 = vld [vmem:[%s3480_s26 + $0x13] sm:$0x1] }
 0x23f   : > { %3082 = vmatpush3.xpose.msk.msra.mxu1 %vm487_vm2, %v1284_v61  ;;  %3083 = vmatprep.mubr.msk.f32.mxu1 %vm3284_vm3, %v3283_v24  ;;  %v2517_v56 = vsel %vm481_vm7, %v2516_v51, %v2515_v52  ;;  %v1011_v51 = vld [vmem:[%s3480_s26 + $0x29] sm:$0x1] }
 0x240   : > { %3091 = vmatprep.subr.mxu1 %v3283_v24  ;;  %v2519_v58 = vsel %vm484_vm8, %v2518_v55, %v2517_v56  ;;  %v1012_v55 = vld [vmem:[%s3480_s26 + $0x31] sm:$0x1] }
 0x242   : > { %3084 = vmatmul.mubr.msk.f32.vlgmr.msra.gmra.mrb[4].mxu1 %vm487_vm2, %v1262_v16  ;;  %v3198_v61 = vpop.eup %3197 }
 0x243   : > { %3092 = vmatpush3.xpose.msk.msra.mxu1 %vm487_vm2, %v1531_v20  ;;  %3093 = vmatprep.mubr.msk.f32.mxu1 %vm3284_vm3, %v3283_v24  ;;  %v885_v63 = vmul.f32 %v3198_v61, %v884_v62 }
 0x244   : > { %3101 = vmatprep.subr.mxu1 %v3283_v24 }
 0x246   : > { %3094 = vmatmul.mubr.msk.f32.vlgmr.msra.gmra.mrb[6].mxu1 %vm487_vm2, %v1509_v33 }
 0x247   : > { %3102 = vmatpush3.xpose.msk.msra.mxu1 %vm487_vm2, %v1778_v37  ;;  %3103 = vmatprep.mubr.msk.f32.mxu1 %vm3284_vm3, %v3283_v24 }
 0x248   : > { %3111 = vmatprep.subr.mxu1 %v3283_v24 }
 0x24a   : > { %3104 = vmatmul.mubr.msk.f32.vlgmr.msra.gmra.mrb[8].mxu1 %vm487_vm2, %v1756_v46 }
 0x24b   : > { %3112 = vmatpush3.xpose.msk.msra.mxu1 %vm487_vm2, %v2025_v48  ;;  %3113 = vmatprep.mubr.msk.f32.mxu1 %vm3284_vm3, %v3283_v24  ;;  %v1155_v48 = vsel %vm466_vm0, %v1154_v41, %v1006_v43  ;;  %v1748_v41 = vld [vmem:[%s3480_s26 + $0xc] sm:$0x1]  ;;  %v1257_v43 = vld [vmem:[%s3480_s26 + $0x22] sm:$0x1] }
 0x24c   : > { %3121 = vmatprep.subr.mxu1 %v3283_v24  ;;  %v1157_v52 = vsel %vm469_vm1, %v1156_v45, %v1155_v48  ;;  %v1500_v45 = vld [vmem:[%s3480_s26 + $0x3] sm:$0x1]  ;;  %v1503_v48 = vld [vmem:[%s3480_s26 + $0x1b] sm:$0x1] }
 0x24d   : > { %v1159_v56 = vsel %vm472_vm4, %v1158_v49, %v1157_v52  ;;  %v1650_v49 = vrot.slane %v1502_v40, 6  ;;  %v1407_v52 = vrot.slane %v1257_v43, 4  ;;  %v1997_v43 = vld [vmem:[%s3480_s26 + $0x1d] sm:$0x1] }
 0x24e   : > { %3114 = vmatmul.mubr.msk.f32.vlgmr.msra.gmra.mrb[10].mxu1 %vm487_vm2, %v2003_v53  ;;  %v1160_v53 = vrot.slane %v1010_v47, 4 }
 0x24f   : > { %3122 = vmatpush3.xpose.msk.msra.mxu1 %vm487_vm2, %v2272_v54  ;;  %3123 = vmatprep.mubr.msk.f32.mxu1 %vm3284_vm3, %v3283_v24 }
 0x250   : > { %3131 = vmatprep.subr.mxu1 %v3283_v24  ;;  %v1161_v60 = vsel %vm475_vm5, %v1160_v53, %v1159_v56 }
 0x252   : > { %3124 = vmatmul.mubr.msk.f32.vlgmr.msra.gmra.mrb[12].mxu1 %vm487_vm2, %v2250_v57  ;;  %v1162_v57 = vrot.slane %v1011_v51, 3 }
 0x253   : > { %3132 = vmatpush3.xpose.msk.msra.mxu1 %vm487_vm2, %v2519_v58  ;;  %3133 = vmatprep.mubr.msk.f32.mxu1 %vm3284_vm3, %v3283_v24  ;;  %v3818_v58 = vld [vmem:[#allocation3 + $0x28] sm:$0xff] }
 0x256   : > { %3134 = vmatmul.mubr.msk.f32.vlgmr.msra.gmra.mrb[14].mxu1 %vm487_vm2, %v2497_v59  ;;  %v1013_v59 = vld [vmem:[%s3480_s26 + $0x39] sm:$0x1] }
 0x2c8   : > { %v888_v0 = vpop.xlane.xlu1 %887 }
 0x2c9   : > { %v889_v1 = vadd.f32 %v888_v0, %v885_v63  ;;  %v1163_v63 = vsel %vm478_vm6, %v1162_v57, %v1161_v60  ;;  %v1166_v0 = vrot.slane %v1013_v59, 1  ;;  %v1258_v57 = vld [vmem:[%s3480_s26 + $0x2a] sm:$0x1]  ;;  %v1995_v60 = vld [vmem:[%s3480_s26 + $0xd] sm:$0x1] }
 0x2cb   : > { %891 = vst.msk [vmem:[#allocation4] sm:$0xff] %vm720_vm9, %v889_v1 }
 0x30d   : > { %v3761_v2 = vpop.f32.mrb[0].mxu1 }
 0x30e   : > { %v3070_v3 = vpop.f32.mrb[1].mxu1 }
 0x311   : > { %v3763_v4 = vpop.f32.mrb[2].mxu1 }
 0x312   : > { %v3075_v5 = vpop.f32.mrb[3].mxu1  ;;  %v1115_v6 = vsel %vm868_vm10, %v3763_v4, -inf }
 0x313   : > { %1116 = vmax.xlane.f32.xlu1 %v1115_v6 }
 0x315   : > { %v3767_v11 = vpop.f32.mrb[4].mxu1 }
 0x316   : > { %v3085_v13 = vpop.f32.mrb[5].mxu1  ;;  %v1362_v15 = vsel %vm868_vm10, %v3767_v11, -inf }
 0x317   : > { %1363 = vmax.xlane.f32.xlu1 %v1362_v15  ;;  %v3835_v15 = vld [vmem:[#allocation3 + $0x30] sm:$0xff] }
 0x319   : > { %v3771_v8 = vpop.f32.mrb[6].mxu1 }
 0x31a   : > { %v1609_v9 = vsel %vm868_vm10, %v3771_v8, -inf  ;;  %v3095_v10 = vpop.f32.mrb[7].mxu1 }
 0x31b   : > { %1610 = vmax.xlane.f32.xlu1 %v1609_v9 }
 0x31d   : > { %v3775_v12 = vpop.f32.mrb[8].mxu1 }
 0x31e   : > { %v1856_v14 = vsel %vm868_vm10, %v3775_v12, -inf  ;;  %v3105_v16 = vpop.f32.mrb[9].mxu1 }
 0x31f   : > { %1857 = vmax.xlane.f32.xlu1 %v1856_v14  ;;  %v3846_v16 = vld [vmem:[#allocation3 + $0x38] sm:$0xff] }
 0x321   : > { %v3779_v17 = vpop.f32.mrb[10].mxu1 }
 0x322   : > { %v3115_v18 = vpop.f32.mrb[11].mxu1  ;;  %v2103_v19 = vsel %vm868_vm10, %v3779_v17, -inf }
 0x323   : > { %2104 = vmax.xlane.f32.xlu1 %v2103_v19 }
 0x325   : > { %v3783_v20 = vpop.f32.mrb[12].mxu1 }
 0x326   : > { %v2350_v21 = vsel %vm868_vm10, %v3783_v20, -inf  ;;  %v3125_v22 = vpop.f32.mrb[13].mxu1 }
 0x327   : > { %2351 = vmax.xlane.f32.xlu0 %v2350_v21 }
 0x329   : > { %v3787_v23 = vpop.f32.mrb[14].mxu1 }
 0x32a   : > { %v2597_v25 = vsel %vm868_vm10, %v3787_v23, -inf  ;;  %v3135_v26 = vpop.f32.mrb[15].mxu1 }
 0x32b   : > { %2598 = vmax.xlane.f32.xlu1 %v2597_v25  ;;  %v892_v25 = vld [vmem:[#allocation5] sm:$0xff] }
 0x33c   : > { %895 = vperm.xlu1 %3194, %v3198_v61   ;;  %v1164_v61 = vrot.slane %v1012_v55, 2  ;;  %v1747_v55 = vld [vmem:[%s3480_s26 + $0x4] sm:$0x1] }
 0x33e   : > { %v1165_v3 = vsel %vm481_vm7, %v1164_v61, %v1163_v63  ;;  %v1504_v61 = vld [vmem:[%s3480_s26 + $0x23] sm:$0x1]  ;;  %v1652_v63 = vrot.slane %v1503_v48, 5 }
 0x33f   : > { %v1167_v13 = vsel %vm484_vm8, %v1166_v0, %v1165_v3  ;;  %v1750_v0 = vld [vmem:[%s3480_s26 + $0x1c] sm:$0x1] }
 0x340   : > { %3077 = vmatpush3.msra.mxu0 %v1167_v13  ;;  %v1259_v13 = vld [vmem:[%s3480_s26 + $0x32] sm:$0x1] }
 0x341   : > { %3086 = vmatprep.subr.mxu0 %v3283_v24 }
 0x3a0   : > { %v1117_v28 = vpop.xlane.xlu1 %1116 }
 0x3a1   : > { %v1118_v29 = vmax.f32 %v1114_v27, %v1117_v28 }
 0x3a3   : > { %v1119_v31 = vsub.f32 %v1114_v27, %v1118_v29  ;;  %1244 = vst.msk [vmem:[#allocation3 + $0x8] sm:$0xff] %vm720_vm9, %v1118_v29  ;;  %1124 = vperm.xlu0 %3193, %v1118_v29  }
 0x3a4   : > { %v1364_v32 = vpop.xlane.xlu1 %1363 }
 0x3a5   : > { %v1120_v33 = vmul.f32 1.442695, %v1119_v31  ;;  %v1365_v34 = vmax.f32 %v1361_v30, %v1364_v32  ;;  %v1255_v31 = vld [vmem:[%s3480_s26 + $0x12] sm:$0x1] }
 0x3a7   : > { %3199 = vpow2.f32 %v1120_v33  ;;  %1491 = vst.msk [vmem:[#allocation3 + $0x10] sm:$0xff] %vm720_vm9, %v1365_v34  ;;  %1371 = vperm.xlu0 %3193, %v1365_v34   ;;  %v1366_v36 = vsub.f32 %v1361_v30, %v1365_v34  ;;  %v1254_v30 = vld [vmem:[%s3480_s26 + $0xa] sm:$0x1]  ;;  %v1253_v33 = vld [vmem:[%s3480_s26 + $0x2] sm:$0x1] }
 0x3a8   : > { %v1611_v37 = vpop.xlane.xlu1 %1610  ;;  %v1401_v32 = vrot.slane %v1254_v30, 7  ;;  %v1501_v34 = vld [vmem:[%s3480_s26 + $0xb] sm:$0x1]  ;;  %v2142_v30 = vrot.slane %v1995_v60, 7  ;;  %v2242_v60 = vld [vmem:[%s3480_s26 + $0xe] sm:$0x1] }
 0x3a9   : > { %v3797_v39 = vmax.f32 %v3792_v35, %v1611_v37  ;;  %v1367_v50 = vmul.f32 1.442695, %v1366_v36  ;;  %v1256_v36 = vld [vmem:[%s3480_s26 + $0x1a] sm:$0x1]  ;;  %v1403_v37 = vrot.slane %v1255_v31, 6 }
 0x3aa   : > { %v1402_v38 = vsel %vm466_vm0, %v1401_v32, %v1253_v33  ;;  %v1405_v44 = vrot.slane %v1256_v36, 5  ;;  %v1654_v32 = vrot.slane %v1504_v61, 4  ;;  %v1751_v33 = vld [vmem:[%s3480_s26 + $0x24] sm:$0x1]  ;;  %v1994_v36 = vld [vmem:[%s3480_s26 + $0x5] sm:$0x1] }
 0x3ab   : > { %v1613_v46 = vsub.f32 %v3792_v35, %v3797_v39  ;;  %1738 = vst.msk [vmem:[#allocation3 + $0x18] sm:$0xff] %vm720_vm9, %v3797_v39  ;;  %1618 = vperm.xlu0 %3193, %v3797_v39   ;;  %3201 = vpow2.f32 %v1367_v50  ;;  %v1404_v47 = vsel %vm469_vm1, %v1403_v37, %v1402_v38  ;;  %v1749_v50 = vld [vmem:[%s3480_s26 + $0x14] sm:$0x1]  ;;  %v1260_v37 = vld [vmem:[%s3480_s26 + $0x3a] sm:$0x1] }
 0x3ac   : > { %v1858_v7 = vpop.xlane.xlu1 %1857  ;;  %v1406_v59 = vsel %vm472_vm4, %v1405_v44, %v1404_v47  ;;  %v1506_v47 = vld [vmem:[%s3480_s26 + $0x33] sm:$0x1] }
 0x3ad   : > { %v3814_v54 = vmax.f32 %v3800_v42, %v1858_v7  ;;  %v1895_v7 = vrot.slane %v1748_v41, 7  ;;  %v1411_v41 = vrot.slane %v1259_v13, 2 }
 0x3af   : > { %v1860_v62 = vsub.f32 %v3800_v42, %v3814_v54  ;;  %1985 = vst.msk [vmem:[#allocation3 + $0x20] sm:$0xff] %vm720_vm9, %v3814_v54  ;;  %1865 = vperm.xlu1 %3194, %v3814_v54   ;;  %v2731_v42 = vld [vmem:[#allocation4] sm:$0xff] }
 0x3b0   : > { %v2105_v1 = vpop.xlane.xlu1 %2104 }
 0x3b1   : > { %v3829_v5 = vpop.eup %3199  ;;  %v3832_v6 = vmax.f32 %v3818_v58, %v2105_v1  ;;  %v1897_v1 = vrot.slane %v1749_v50, 6  ;;  %v2143_v50 = vsel %vm466_vm0, %v2142_v30, %v1994_v36  ;;  %v2389_v30 = vrot.slane %v2242_v60, 7  ;;  %v2489_v36 = vld [vmem:[%s3480_s26 + $0xf] sm:$0x1]  ;;  %v2245_v60 = vld [vmem:[%s3480_s26 + $0x26] sm:$0x1] }
 0x3b3   : > { %1142 = vperm.xlu1 %3194, %v3829_v5   ;;  %v2107_v9 = vsub.f32 %v3818_v58, %v3832_v6  ;;  %2232 = vst.msk [vmem:[#allocation3 + $0x28] sm:$0xff] %vm720_vm9, %v3832_v6 }
 0x3b4   : > { %v2352_v10 = vpop.xlane.xlu0 %2351 }
 0x3b5   : > { %v3844_v14 = vmax.f32 %v3835_v15, %v2352_v10  ;;  %v3857_v22 = vpop.eup %3201 }
 0x3b7   : > { %v2354_v18 = vsub.f32 %v3835_v15, %v3844_v14  ;;  %2479 = vst.msk [vmem:[#allocation3 + $0x30] sm:$0xff] %vm720_vm9, %v3844_v14  ;;  %2359 = vperm.xlu0 %3193, %v3844_v14   ;;  %2112 = vperm.xlu1 %3194, %v3832_v6   ;;  %v1131_v15 = vld [vmem:[#allocation4 + $0x8] sm:$0xff] }
 0x3b8   : > { %v2599_v19 = vpop.xlane.xlu1 %2598 }
 0x3b9   : > { %v3855_v21 = vmax.f32 %v3846_v16, %v2599_v19  ;;  %v1896_v19 = vsel %vm466_vm0, %v1895_v7, %v1747_v55 }
 0x3ba   : > { %v1898_v40 = vsel %vm469_vm1, %v1897_v1, %v1896_v19 }
 0x3bb   : > { %v2601_v26 = vsub.f32 %v3846_v16, %v3855_v21  ;;  %2726 = vst.msk [vmem:[#allocation3 + $0x38] sm:$0xff] %vm720_vm9, %v3855_v21  ;;  %1389 = vperm.xlu1 %3194, %v3857_v22   ;;  %v1378_v16 = vld [vmem:[#allocation4 + $0x10] sm:$0xff] }
 0x3bc   : > { %v896_v27 = vpop.permute.xlu1 %895 }
 0x3bd   : > { %v898_v28 = vmul.f32 %v896_v27, %v892_v25  ;;  %v1409_v27 = vrot.slane %v1258_v57, 3  ;;  %v1998_v57 = vld [vmem:[%s3480_s26 + $0x25] sm:$0x1]  ;;  %v2602_v35 = vmul.f32 1.442695, %v2601_v26 }
 0x3bf   : > { %v995_v29 = vadd.f32 %v3761_v2, %v898_v28  ;;  %2606 = vperm.xlu1 %3194, %v3855_v21   ;;  %v1648_v2 = vrot.slane %v1501_v34, 7  ;;  %v1505_v28 = vld [vmem:[%s3480_s26 + $0x2b] sm:$0x1]  ;;  %v1899_v34 = vrot.slane %v1750_v0, 5  ;;  %v1658_v0 = vrot.slane %v1506_v47, 2 }
 0x3c0   : > { %v1656_v48 = vrot.slane %v1505_v28, 3  ;;  %v2148_v28 = vrot.slane %v1998_v57, 4  ;;  %v2001_v57 = vld [vmem:[%s3480_s26 + $0x3d] sm:$0x1]  ;;  %v1379_v21 = vmul.f32 %v3857_v22, %v1378_v16  ;;  %v2119_v22 = vld [vmem:[#allocation4 + $0x28] sm:$0xff] }
 0x3c1   : > { %996 = vst.msk [vmem:[#allocation5] sm:$0xff] %vm487_vm2, %v995_v29  ;;  %v1649_v53 = vsel %vm466_vm0, %v1648_v2, %v1500_v45  ;;  %v1996_v29 = vld [vmem:[%s3480_s26 + $0x15] sm:$0x1]  ;;  %v1900_v55 = vsel %vm472_vm4, %v1899_v34, %v1898_v40  ;;  %v2241_v34 = vld [vmem:[%s3480_s26 + $0x6] sm:$0x1]  ;;  %v2127_v16 = vld [vmem:[#allocation5 + $0x28] sm:$0xff] }
 0x3c2   : > { %v1651_v10 = vsel %vm469_vm1, %v1650_v49, %v1649_v53  ;;  %v2144_v44 = vrot.slane %v1996_v29, 6  ;;  %v1901_v49 = vrot.slane %v1751_v33, 4  ;;  %v1752_v53 = vld [vmem:[%s3480_s26 + $0x2c] sm:$0x1]  ;;  %v2243_v29 = vld [vmem:[%s3480_s26 + $0x16] sm:$0x1] }
 0x3c3   : > { %v1653_v38 = vsel %vm472_vm4, %v1652_v63, %v1651_v10  ;;  %v1753_v10 = vld [vmem:[%s3480_s26 + $0x34] sm:$0x1]  ;;  %v2391_v47 = vrot.slane %v2243_v29, 6  ;;  %v2246_v29 = vld [vmem:[%s3480_s26 + $0x2e] sm:$0x1] }
 0x3c4   : > { %v1902_v19 = vsel %vm475_vm5, %v1901_v49, %v1900_v55  ;;  %v2390_v49 = vsel %vm466_vm0, %v2389_v30, %v2241_v34  ;;  %v2395_v30 = vrot.slane %v2245_v60, 4 }
 0x422   : > { %v1125_v51 = vpop.permute.xlu0 %1124 }
 0x423   : > { %v1127_v56 = vsub.f32 %v3763_v4, %v1125_v51  ;;  %v1408_v4 = vsel %vm475_vm5, %v1407_v52, %v1406_v59  ;;  %v1507_v51 = vld [vmem:[%s3480_s26 + $0x3b] sm:$0x1]  ;;  %v1655_v52 = vsel %vm475_vm5, %v1654_v32, %v1653_v38  ;;  %v2146_v59 = vrot.slane %v1997_v43, 5  ;;  %v1754_v32 = vld [vmem:[%s3480_s26 + $0x3c] sm:$0x1] }
 0x424   : > { %v1660_v13 = vrot.slane %v1507_v51, 1 }
 0x425   : > { %v1128_v3 = vmul.f32 1.442695, %v1127_v56  ;;  %v1413_v56 = vrot.slane %v1260_v37, 1 }
 0x426   : > { %v1372_v25 = vpop.permute.xlu0 %1371 }
 0x427   : > { %3203 = vpow2.f32 %v1128_v3  ;;  %v1374_v31 = vsub.f32 %v3767_v11, %v1372_v25  ;;  %v1410_v11 = vsel %vm478_vm6, %v1409_v27, %v1408_v4  ;;  %v1657_v3 = vsel %vm478_vm6, %v1656_v48, %v1655_v52  ;;  %v1999_v27 = vld [vmem:[%s3480_s26 + $0x2d] sm:$0x1] }
 0x428   : > { %v1412_v63 = vsel %vm481_vm7, %v1411_v41, %v1410_v11  ;;  %v1903_v25 = vrot.slane %v1752_v53, 3  ;;  %v1659_v40 = vsel %vm481_vm7, %v1658_v0, %v1657_v3  ;;  %v2000_v41 = vld [vmem:[%s3480_s26 + $0x35] sm:$0x1]  ;;  %v2244_v11 = vld [vmem:[%s3480_s26 + $0x1e] sm:$0x1]  ;;  %v1907_v52 = vrot.slane %v1754_v32, 1 }
 0x429   : > { %v1375_v2 = vmul.f32 1.442695, %v1374_v31  ;;  %v1414_v31 = vsel %vm484_vm8, %v1413_v56, %v1412_v63  ;;  %v1661_v51 = vsel %vm484_vm8, %v1660_v13, %v1659_v40  ;;  %v2488_v53 = vld [vmem:[%s3480_s26 + $0x7] sm:$0x1]  ;;  %v2392_v3 = vsel %vm469_vm1, %v2391_v47, %v2390_v49  ;;  %v2491_v13 = vld [vmem:[%s3480_s26 + $0x1f] sm:$0x1] }
 0x42a   : > { %v1619_v45 = vpop.permute.xlu0 %1618  ;;  %v2640_v34 = vrot.slane %v2491_v13, 5 }
 0x42b   : > { %3205 = vpow2.f32 %v1375_v2  ;;  %v1621_v7 = vsub.f32 %v3771_v8, %v1619_v45  ;;  %v2145_v8 = vsel %vm469_vm1, %v2144_v44, %v2143_v50  ;;  %v1905_v2 = vrot.slane %v1753_v10, 2  ;;  %v2490_v50 = vld [vmem:[%s3480_s26 + $0x17] sm:$0x1] }
 0x42c   : > { %v2147_v33 = vsel %vm472_vm4, %v2146_v59, %v2145_v8  ;;  %v1904_v44 = vsel %vm478_vm6, %v1903_v25, %v1902_v19  ;;  %v2150_v45 = vrot.slane %v1999_v27, 3  ;;  %v2152_v59 = vrot.slane %v2000_v41, 2 }
 0x42d   : > { %v1622_v61 = vmul.f32 1.442695, %v1621_v7  ;;  %v2149_v48 = vsel %vm475_vm5, %v2148_v28, %v2147_v33  ;;  %v2636_v7 = vrot.slane %v2489_v36, 7  ;;  %v1906_v56 = vsel %vm481_vm7, %v1905_v2, %v1904_v44  ;;  %v2492_v33 = vld [vmem:[%s3480_s26 + $0x27] sm:$0x1] }
 0x42e   : > { %v1866_v1 = vpop.permute.xlu1 %1865  ;;  %v2638_v10 = vrot.slane %v2490_v50, 6  ;;  %v1908_v27 = vsel %vm484_vm8, %v1907_v52, %v1906_v56  ;;  %v2154_v28 = vrot.slane %v2001_v57, 1  ;;  %v2247_v2 = vld [vmem:[%s3480_s26 + $0x36] sm:$0x1]  ;;  %v2397_v41 = vrot.slane %v2246_v29, 3 }
 0x42f   : > { %3207 = vpow2.f32 %v1622_v61  ;;  %v1868_v4 = vsub.f32 %v3775_v12, %v1866_v1  ;;  %v2393_v61 = vrot.slane %v2244_v11, 5  ;;  %v2151_v1 = vsel %vm478_vm6, %v2150_v45, %v2149_v48  ;;  %v2493_v45 = vld [vmem:[%s3480_s26 + $0x2f] sm:$0x1] }
 0x430   : > { %v2642_v11 = vrot.slane %v2492_v33, 4  ;;  %v2644_v56 = vrot.slane %v2493_v45, 3  ;;  %v1614_v29 = vmul.f32 1.442695, %v1613_v46 }
 0x431   : > { %v3204_v37 = vpop.eup %3203  ;;  %v1869_v38 = vmul.f32 1.442695, %v1868_v4  ;;  %v2637_v4 = vsel %vm466_vm0, %v2636_v7, %v2488_v53  ;;  %v2248_v7 = vld [vmem:[%s3480_s26 + $0x3e] sm:$0x1]  ;;  %vm2828_vm0 = vcmask 228544  }
 0x432   : > { %3079 = vmatmul.mubr.msk.f32.vlgmr.msra.gmra.mrb[2].mxu0 %vm868_vm10, %v3204_v37  ;;  %v3927_v12 = vpop.permute.xlu1 %1142  ;;  %v1133_v43 = vsel %vm868_vm10, %v3204_v37, 0.0  ;;  %v2639_v40 = vsel %vm469_vm1, %v2638_v10, %v2637_v4  ;;  %v2401_v60 = vrot.slane %v2248_v7, 1  ;;  %v2613_v7 = vld [vmem:[#allocation4 + $0x38] sm:$0xff]  ;;  %vm2843_vm1 = vcmask 261344  }
 0x433   : > { %3209 = vpow2.f32 %v1869_v38  ;;  %1134 = vadd.xlane.f32.xlu0 %v1133_v43  ;;  %3087 = vmatpush3.msra.mxu0 %v1414_v31  ;;  %v2641_v48 = vsel %vm472_vm4, %v2640_v34, %v2639_v40  ;;  %v1872_v34 = vld [vmem:[#allocation4 + $0x20] sm:$0xff] }
 0x434   : > { %3088 = vmatprep.mubr.msk.f32.mxu0 %vm3284_vm3, %v3283_v24  ;;  %3096 = vmatprep.subr.mxu0 %v3283_v24  ;;  %v2643_v57 = vsel %vm475_vm5, %v2642_v11, %v2641_v48 }
 0x435   : > { %v3206_v55 = vpop.eup %3205 }
 0x436   : > { %3089 = vmatmul.mubr.msk.f32.vlgmr.msra.gmra.mrb[4].mxu0 %vm868_vm10, %v3206_v55  ;;  %v2360_v63 = vpop.permute.xlu0 %2359  ;;  %v2113_v0 = vpop.permute.xlu1 %2112  ;;  %v1380_v8 = vsel %vm868_vm10, %v3206_v55, 0.0  ;;  %v2494_v55 = vld [vmem:[%s3480_s26 + $0x37] sm:$0x1] }
 0x437   : > { %v2362_v19 = vsub.f32 %v3783_v20, %v2360_v63  ;;  %v2115_v25 = vsub.f32 %v3779_v17, %v2113_v0  ;;  %1381 = vadd.xlane.f32.xlu0 %v1380_v8  ;;  %3097 = vmatpush3.msra.mxu0 %v1661_v51  ;;  %v2153_v20 = vsel %vm481_vm7, %v2152_v59, %v2151_v1  ;;  %v2399_v51 = vrot.slane %v2247_v2, 2  ;;  %v2495_v63 = vld [vmem:[%s3480_s26 + $0x3f] sm:$0x1] }
 0x438   : > { %3098 = vmatprep.mubr.msk.f32.mxu0 %vm3284_vm3, %v3283_v24  ;;  %3106 = vmatprep.subr.mxu0 %v3283_v24  ;;  %v2394_v17 = vsel %vm472_vm4, %v2393_v61, %v2392_v3  ;;  %v2155_v43 = vsel %vm484_vm8, %v2154_v28, %v2153_v20  ;;  %v2646_v0 = vrot.slane %v2494_v55, 2  ;;  %v2648_v1 = vrot.slane %v2495_v63, 1 }
 0x439   : > { %v3208_v31 = vpop.eup %3207  ;;  %v2116_v32 = vmul.f32 1.442695, %v2115_v25  ;;  %v2363_v36 = vmul.f32 1.442695, %v2362_v19  ;;  %v2396_v44 = vsel %vm475_vm5, %v2395_v30, %v2394_v17  ;;  %v1861_v30 = vmul.f32 1.442695, %v1860_v62 }
 0x43a   : > { %3099 = vmatmul.mubr.msk.f32.vlgmr.msra.gmra.mrb[6].mxu0 %vm868_vm10, %v3208_v31  ;;  %v3960_v37 = vpop.permute.xlu1 %1389  ;;  %v1627_v38 = vsel %vm868_vm10, %v3208_v31, 0.0  ;;  %v2398_v53 = vsel %vm478_vm6, %v2397_v41, %v2396_v44  ;;  %v2108_v31 = vmul.f32 1.442695, %v2107_v9  ;;  %v1132_v9 = vmul.f32 %v3829_v5, %v1131_v15 }
 0x43b   : > { %1628 = vadd.xlane.f32.xlu0 %v1627_v38  ;;  %3107 = vmatpush3.msra.mxu0 %v1908_v27  ;;  %3211 = vpow2.f32 %v2116_v32  ;;  %v2400_v61 = vsel %vm481_vm7, %v2399_v51, %v2398_v53  ;;  %v1625_v32 = vld [vmem:[#allocation4 + $0x18] sm:$0xff] }
 0x43c   : > { %3108 = vmatprep.mubr.msk.f32.mxu0 %vm3284_vm3, %v3283_v24  ;;  %3116 = vmatprep.subr.mxu0 %v3283_v24  ;;  %3213 = vpow2.f32 %v2363_v36  ;;  %v2402_v8 = vsel %vm484_vm8, %v2401_v60, %v2400_v61 }
 0x43d   : > { %v3210_v47 = vpop.eup %3209 }
 0x43e   : > { %3109 = vmatmul.mubr.msk.f32.vlgmr.msra.gmra.mrb[8].mxu0 %vm868_vm10, %v3210_v47  ;;  %v2607_v49 = vpop.permute.xlu1 %2606  ;;  %v1874_v50 = vsel %vm868_vm10, %v3210_v47, 0.0  ;;  %v2366_v47 = vld [vmem:[#allocation4 + $0x30] sm:$0xff] }
 0x43f   : > { %v2609_v52 = vsub.f32 %v3787_v23, %v2607_v49  ;;  %1875 = vadd.xlane.f32.xlu1 %v1874_v50  ;;  %3117 = vmatpush3.msra.mxu0 %v2155_v43  ;;  %v2645_v23 = vsel %vm478_vm6, %v2644_v56, %v2643_v57 }
 0x440   : > { %3118 = vmatprep.mubr.msk.f32.mxu0 %vm3284_vm3, %v3283_v24  ;;  %3126 = vmatprep.subr.mxu0 %v3283_v24  ;;  %v2647_v13 = vsel %vm481_vm7, %v2646_v0, %v2645_v23 }
 0x441   : > { %v2610_v59 = vmul.f32 1.442695, %v2609_v52  ;;  %v2649_v25 = vsel %vm484_vm8, %v2648_v1, %v2647_v13 }
 0x443   : > { %3215 = vpow2.f32 %v2610_v59 }
 0x444   : > { %3217 = vpow2.f32 %v1614_v29 }
 0x445   : > { %v3212_v3 = vpop.eup %3211  ;;  %3219 = vpow2.f32 %v1861_v30 }
 0x446   : > { %3119 = vmatmul.mubr.msk.f32.vlgmr.msra.gmra.mrb[10].mxu0 %vm868_vm10, %v3212_v3  ;;  %v2121_v10 = vsel %vm868_vm10, %v3212_v3, 0.0  ;;  %v3214_v19 = vpop.eup %3213  ;;  %3221 = vpow2.f32 %v2108_v31  ;;  %v2730_v3 = vld [vmem:[#allocation5] sm:$0xff] }
 0x447   : > { %2122 = vadd.xlane.f32.xlu0 %v2121_v10  ;;  %3127 = vmatpush3.msra.mxu0 %v2402_v8  ;;  %v2368_v4 = vsel %vm868_vm10, %v3214_v19, 0.0 }
 0x448   : > { %3128 = vmatprep.mubr.msk.f32.mxu0 %vm3284_vm3, %v3283_v24  ;;  %3136 = vmatprep.subr.mxu0 %v3283_v24 }
 0x44a   : > { %3129 = vmatmul.mubr.msk.f32.vlgmr.msra.gmra.mrb[12].mxu0 %vm868_vm10, %v3214_v19 }
 0x44b   : > { %2369 = vadd.xlane.f32.xlu0 %v2368_v4  ;;  %3137 = vmatpush3.msra.mxu0 %v2649_v25  ;;  %v1139_v25 = vld [vmem:[#allocation5 + $0x8] sm:$0xff] }
 0x44c   : > { %3138 = vmatprep.mubr.msk.f32.mxu0 %vm3284_vm3, %v3283_v24  ;;  %v2355_v24 = vmul.f32 1.442695, %v2354_v18  ;;  %v1145_v4 = vmul.f32 %v3927_v12, %v1139_v25 }
 0x44d   : > { %v3216_v27 = vpop.eup %3215 }
 0x44e   : > { %v2615_v28 = vsel %vm868_vm10, %v3216_v27, 0.0  ;;  %3139 = vmatmul.mubr.msk.f32.vlgmr.msra.gmra.mrb[14].mxu0 %vm868_vm10, %v3216_v27  ;;  %3223 = vpow2.f32 %v2355_v24  ;;  %v3218_v39 = vpop.eup %3217  ;;  %v1386_v27 = vld [vmem:[#allocation5 + $0x10] sm:$0xff]  ;;  %v1633_v24 = vld [vmem:[#allocation5 + $0x18] sm:$0xff] }
 0x44f   : > { %2616 = vadd.xlane.f32.xlu1 %v2615_v28  ;;  %3225 = vpow2.f32 %v2602_v35  ;;  %v3220_v46 = vpop.eup %3219  ;;  %v1626_v17 = vmul.f32 %v3218_v39, %v1625_v32  ;;  %v1392_v31 = vmul.f32 %v3960_v37, %v1386_v27 }
 0x450   : > { %v3222_v54 = vpop.eup %3221  ;;  %3227 = vrcp.f32 %v2731_v42  ;;  %v1873_v5 = vmul.f32 %v3220_v46, %v1872_v34  ;;  %v2621_v34 = vld [vmem:[#allocation5 + $0x38] sm:$0xff] }
 0x451   : > { %v2120_v44 = vmul.f32 %v3222_v54, %v2119_v22 }
 0x458   : > { %v3224_v58 = vpop.eup %3223 }
 0x459   : > { %v3226_v62 = vpop.eup %3225  ;;  %v2367_v50 = vmul.f32 %v3224_v58, %v2366_v47 }
 0x45a   : > { %v3228_v6 = vpop.eup %3227  ;;  %v2614_v55 = vmul.f32 %v3226_v62, %v2613_v7 }
 0x460   : > { %1636 = vperm.xlu1 %3194, %v3218_v39  }
 0x461   : > { %1883 = vperm.xlu0 %3193, %v3220_v46  }
 0x464   : > { %2130 = vperm.xlu1 %3194, %v3222_v54  }
 0x465   : > { %2377 = vperm.xlu0 %3193, %v3224_v58   ;;  %v1880_v58 = vld [vmem:[#allocation5 + $0x20] sm:$0xff] }
 0x469   : > { %2624 = vperm.xlu0 %3193, %v3226_v62  }
 0x46d   : > { %2735 = vperm.xlu0 %3193, %v3228_v6  }
 0x4c0   : > { %v1135_v14 = vpop.xlane.xlu0 %1134 }
 0x4c1   : > { %v1136_v18 = vadd.f32 %v1135_v14, %v1132_v9 }
 0x4c3   : > { %1137 = vst.msk [vmem:[#allocation4 + $0x8] sm:$0xff] %vm720_vm9, %v1136_v18 }
 0x4c4   : > { %v1382_v26 = vpop.xlane.xlu0 %1381 }
 0x4c5   : > { %v1383_v20 = vadd.f32 %v1382_v26, %v1379_v21  ;;  %v2374_v26 = vld [vmem:[#allocation5 + $0x30] sm:$0xff] }
 0x4c7   : > { %1384 = vst.msk [vmem:[#allocation4 + $0x10] sm:$0xff] %vm720_vm9, %v1383_v20 }
 0x4c8   : > { %v1629_v33 = vpop.xlane.xlu0 %1628 }
 0x4c9   : > { %v1630_v36 = vadd.f32 %v1629_v33, %v1626_v17 }
 0x4ca   : > { %v2741_v38 = vld [vmem:[#allocation4 + $0x8] sm:$0xff] }
 0x4cb   : > { %1631 = vst.msk [vmem:[#allocation4 + $0x18] sm:$0xff] %vm720_vm9, %v1630_v36  ;;  %3229 = vrcp.f32 %v2741_v38 }
 0x4cc   : > { %v1876_v40 = vpop.xlane.xlu1 %1875 }
 0x4cd   : > { %v1877_v2 = vadd.f32 %v1876_v40, %v1873_v5 }
 0x4ce   : > { %v2756_v41 = vld [vmem:[#allocation4 + $0x10] sm:$0xff] }
 0x4cf   : > { %1878 = vst.msk [vmem:[#allocation4 + $0x20] sm:$0xff] %vm720_vm9, %v1877_v2  ;;  %3231 = vrcp.f32 %v2756_v41 }
 0x4d2   : > { %v2771_v43 = vld [vmem:[#allocation4 + $0x18] sm:$0xff] }
 0x4d3   : > { %3233 = vrcp.f32 %v2771_v43 }
 0x4d4   : > { %v2123_v11 = vpop.xlane.xlu0 %2122 }
 0x4d5   : > { %v3230_v45 = vpop.eup %3229  ;;  %v2124_v48 = vadd.f32 %v2123_v11, %v2120_v44 }
 0x4d6   : > { %2745 = vperm.xlu0 %3193, %v3230_v45   ;;  %v2786_v49 = vld [vmem:[#allocation4 + $0x20] sm:$0xff] }
 0x4d7   : > { %3235 = vrcp.f32 %v2786_v49  ;;  %2125 = vst.msk [vmem:[#allocation4 + $0x28] sm:$0xff] %vm720_vm9, %v2124_v48 }
 0x4d8   : > { %v2370_v52 = vpop.xlane.xlu0 %2369 }
 0x4d9   : > { %v3232_v51 = vpop.eup %3231  ;;  %v2371_v53 = vadd.f32 %v2370_v52, %v2367_v50 }
 0x4da   : > { %2760 = vperm.xlu0 %3193, %v3232_v51  }
 0x4db   : > { %2372 = vst.msk [vmem:[#allocation4 + $0x30] sm:$0xff] %vm720_vm9, %v2371_v53 }
 0x4dc   : > { %v2617_v56 = vpop.xlane.xlu1 %2616 }
 0x4dd   : > { %v3234_v57 = vpop.eup %3233  ;;  %v2618_v59 = vadd.f32 %v2617_v56, %v2614_v55 }
 0x4de   : > { %2775 = vperm.xlu0 %3193, %v3234_v57   ;;  %v2801_v60 = vld [vmem:[#allocation4 + $0x28] sm:$0xff] }
 0x4df   : > { %2619 = vst.msk [vmem:[#allocation4 + $0x38] sm:$0xff] %vm720_vm9, %v2618_v59  ;;  %3237 = vrcp.f32 %v2801_v60 }
 0x4e0   : > { %v1884_v63 = vpop.permute.xlu0 %1883  ;;  %v1637_v35 = vpop.permute.xlu1 %1636 }
 0x4e1   : > { %v3236_v61 = vpop.eup %3235  ;;  %v1639_v54 = vmul.f32 %v1637_v35, %v1633_v24  ;;  %v1886_v15 = vmul.f32 %v1884_v63, %v1880_v58 }
 0x4e2   : > { %2790 = vperm.xlu0 %3193, %v3236_v61   ;;  %v2816_v0 = vld [vmem:[#allocation4 + $0x30] sm:$0xff] }
 0x4e3   : > { %3239 = vrcp.f32 %v2816_v0 }
 0x4e4   : > { %v2378_v23 = vpop.permute.xlu0 %2377  ;;  %v2131_v18 = vpop.permute.xlu1 %2130 }
 0x4e5   : > { %v2133_v21 = vmul.f32 %v2131_v18, %v2127_v16  ;;  %v2380_v33 = vmul.f32 %v2378_v23, %v2374_v26 }
 0x4e6   : > { %v2831_v43 = vld [vmem:[#allocation4 + $0x38] sm:$0xff] }
 0x4e7   : > { %3241 = vrcp.f32 %v2831_v43 }
 0x4e8   : > { %v2625_v8 = vpop.permute.xlu0 %2624 }
 0x4e9   : > { %v3238_v1 = vpop.eup %3237  ;;  %v2627_v40 = vmul.f32 %v2625_v8, %v2621_v34 }
 0x4ea   : > { %2805 = vperm.xlu1 %3194, %v3238_v1  }
 0x4ec   : > { %v2736_v13 = vpop.permute.xlu0 %2735 }
 0x4ed   : > { %v3240_v10 = vpop.eup %3239  ;;  %v2738_v19 = vmul.f32 %v2736_v13, %v2730_v3 }
 0x4ee   : > { %2820 = vperm.xlu1 %3194, %v3240_v10  }
 0x4ef   : > { %2739 = vst.msk [vmem:[%s4028_s30] sm:$0xff] %vm487_vm2, %v2738_v19 }
 0x4f1   : > { %v3242_v52 = vpop.eup %3241 }
 0x505   : > { %v1238_v28 = vpop.f32.mrb[2].mxu0 }
 0x506   : > { %v1242_v29 = vadd.f32 %v1238_v28, %v1145_v4  ;;  %v3080_v30 = vpop.f32.mrb[3].mxu0 }
 0x508   : > { %1243 = vst.msk [vmem:[#allocation5 + $0x8] sm:$0xff] %vm487_vm2, %v1242_v29 }
 0x509   : > { %v1485_v39 = vpop.f32.mrb[4].mxu0 }
 0x50a   : > { %v1489_v42 = vadd.f32 %v1485_v39, %v1392_v31  ;;  %v3090_v46 = vpop.f32.mrb[5].mxu0 }
 0x50c   : > { %1490 = vst.msk [vmem:[#allocation5 + $0x10] sm:$0xff] %vm487_vm2, %v1489_v42 }
 0x50d   : > { %v1732_v62 = vpop.f32.mrb[6].mxu0 }
 0x50e   : > { %v1736_v6 = vadd.f32 %v1732_v62, %v1639_v54  ;;  %v3100_v12 = vpop.f32.mrb[7].mxu0 }
 0x50f   : > { %v2740_v45 = vld [vmem:[#allocation5 + $0x8] sm:$0xff] }
 0x510   : > { %1737 = vst.msk [vmem:[#allocation5 + $0x18] sm:$0xff] %vm487_vm2, %v1736_v6 }
 0x511   : > { %v1979_v9 = vpop.f32.mrb[8].mxu0 }
 0x512   : > { %v1983_v14 = vadd.f32 %v1979_v9, %v1886_v15  ;;  %v3110_v37 = vpop.f32.mrb[9].mxu0 }
 0x513   : > { %v2755_v48 = vld [vmem:[#allocation5 + $0x10] sm:$0xff] }
 0x514   : > { %1984 = vst.msk [vmem:[#allocation5 + $0x20] sm:$0xff] %vm487_vm2, %v1983_v14 }
 0x517   : > { %v2770_v7 = vld [vmem:[#allocation5 + $0x18] sm:$0xff] }
 0x519   : > { %v2226_v32 = vpop.f32.mrb[10].mxu0 }
 0x51a   : > { %v2230_v20 = vadd.f32 %v2226_v32, %v2133_v21  ;;  %v3120_v17 = vpop.f32.mrb[11].mxu0 }
 0x51b   : > { %v2785_v55 = vld [vmem:[#allocation5 + $0x20] sm:$0xff] }
 0x51c   : > { %2231 = vst.msk [vmem:[#allocation5 + $0x28] sm:$0xff] %vm487_vm2, %v2230_v20 }
 0x51d   : > { %v2473_v36 = vpop.f32.mrb[12].mxu0 }
 0x51e   : > { %v2477_v38 = vadd.f32 %v2473_v36, %v2380_v33  ;;  %v3130_v5 = vpop.f32.mrb[13].mxu0 }
 0x520   : > { %2478 = vst.msk [vmem:[#allocation5 + $0x30] sm:$0xff] %vm487_vm2, %v2477_v38 }
 0x521   : > { %v2720_v2 = vpop.f32.mrb[14].mxu0 }
 0x522   : > { %v2724_v41 = vadd.f32 %v2720_v2, %v2627_v40  ;;  %v3140_v22 = vpop.f32.mrb[15].mxu0 }
 0x523   : > { %v2800_v59 = vld [vmem:[#allocation5 + $0x28] sm:$0xff] }
 0x524   : > { %2725 = vst.msk [vmem:[#allocation5 + $0x38] sm:$0xff] %vm487_vm2, %v2724_v41 }
 0x527   : > { %v2815_v63 = vld [vmem:[#allocation5 + $0x30] sm:$0xff] }
 0x52b   : > { %v2830_v19 = vld [vmem:[#allocation5 + $0x38] sm:$0xff] }
 0x555   : > { %v2746_v44 = vpop.permute.xlu0 %2745 }
 0x556   : > { %v2748_v11 = vmul.f32 %v2746_v44, %v2740_v45 }
 0x558   : > { %2750 = vrot.lane.b32.xlu0 %v2748_v11, %s3287_s14 }
 0x559   : > { %v2761_v47 = vpop.permute.xlu0 %2760 }
 0x55a   : > { %v2763_v49 = vmul.f32 %v2761_v47, %v2755_v48 }
 0x55c   : > { %2765 = vrot.lane.b32.xlu1 %v2763_v49, %s3288_s4 }
 0x55d   : > { %v2776_v50 = vpop.permute.xlu0 %2775 }
 0x55e   : > { %v2778_v51 = vmul.f32 %v2776_v50, %v2770_v7 }
 0x560   : > { %2835 = vperm.xlu1 %3194, %v3242_v52   ;;  %2780 = vrot.lane.b32.xlu0 %v2778_v51, %s3289_s5 }
 0x561   : > { %v2791_v53 = vpop.permute.xlu0 %2790 }
 0x562   : > { %v2793_v56 = vmul.f32 %v2791_v53, %v2785_v55 }
 0x564   : > { %2795 = vrot.lane.b32.xlu0 %v2793_v56, %s3290_s6 }
 0x569   : > { %v2806_v57 = vpop.permute.xlu1 %2805 }
 0x56a   : > { %v2808_v60 = vmul.f32 %v2806_v57, %v2800_v59 }
 0x56c   : > { %2810 = vrot.lane.b32.xlu0 %v2808_v60, %s3291_s7 }
 0x56d   : > { %v2821_v61 = vpop.permute.xlu1 %2820 }
 0x56e   : > { %v2823_v0 = vmul.f32 %v2821_v61, %v2815_v63 }
 0x570   : > { %2825 = vrot.lane.b32.xlu0 %v2823_v0, %s3292_s8 }
 0x5ca   : > { %v2751_v23 = vpop.permute.xlu0 %2750 }
 0x5cb   : > { %2754 = vst.msk [vmem:[%s4028_s30] sm:$0xff] %vm2753_vm11, %v2751_v23 }
 0x5ce   : > { %v2766_v8 = vpop.permute.xlu1 %2765 }
 0x5cf   : > { %2769 = vst.msk [vmem:[%s4028_s30] sm:$0xff] %vm2768_vm12, %v2766_v8 }
 0x5d2   : > { %v2781_v1 = vpop.permute.xlu0 %2780 }
 0x5d3   : > { %2784 = vst.msk [vmem:[%s4028_s30] sm:$0xff] %vm2783_vm13, %v2781_v1 }
 0x5d6   : > { %v2796_v3 = vpop.permute.xlu0 %2795 }
 0x5d7   : > { %2799 = vst.msk [vmem:[%s4028_s30] sm:$0xff] %vm2798_vm14, %v2796_v3 }
 0x5de   : > { %v2811_v13 = vpop.permute.xlu0 %2810 }
 0x5df   : > { %v2836_v10 = vpop.permute.xlu1 %2835  ;;  %2814 = vst.msk [vmem:[%s4028_s30] sm:$0xff] %vm2813_vm15, %v2811_v13 }
 0x5e0   : > { %v2838_v25 = vmul.f32 %v2836_v10, %v2830_v19 }
 0x5e2   : > { %2840 = vrot.lane.b32.xlu0 %v2838_v25, %s3293_s9  ;;  %v2826_v4 = vpop.permute.xlu0 %2825 }
 0x5e3   : > { %2829 = vst.msk [vmem:[%s4028_s30] sm:$0xff] %vm2828_vm0, %v2826_v4 }
 0x654   : > { %v2841_v27 = vpop.permute.xlu0 %2840 }
 0x655   : > { %2844 = vst.msk [vmem:[%s4028_s30] sm:$0xff] %vm2843_vm1, %v2841_v27 }
 0x656 PF: > { %s13_s16 = sadd.s32 1, %s3281_s16   ;;  %s4068_s12 = smov %s3269_s13 }
 0x657   : > { %p10_p10 = scmp.ge.s32.totalorder %s13_s16, 4   ;;  %s4069_s13 = smov %s3353_s21 }
 0x658   : > { %s4070_s14 = smov %s3277_s15  ;;  %s4071_s15 = smov %s4073_s17 }
 0x659   :  { %12 = sbr.rel (!%p10_p10) target bundleno = 3 (0x3), region = 240 }

</bundles_post_ra>
